<compile_context>
chip_gen: v7x
topology: tpu7x:2x2x1
jax: 0.10.0
libtpu: 0.0.40
codegen_flags: <defaults>
</compile_context>

<pallas_src>
import math

import jax
import jax.numpy as jnp
from jax.experimental import pallas as pl
from jax.experimental.pallas import tpu as pltpu

_SQRT_2_OVER_PI = 0.7978845608028654

_LAYER_WEIGHT_NAMES = ("wq", "bq", "wk", "bk", "wv", "bv", "wo", "bo",
                       "bn1_scale", "bn1_shift", "w1", "b1", "w2", "b2",
                       "bn2_scale", "bn2_shift")


def _gelu(x):
    # tanh-approximate GELU (EUP friendly); see TODO above about exact erf.
    return 0.5 * x * (1.0 + jnp.tanh(_SQRT_2_OVER_PI * (x + 0.044715 * x * x * x)))


def _row_tile(n_rows, bytes_per_row, target_bytes=8 << 20):
    """Largest divisor of n_rows whose block stays under ~target_bytes, preferring
    grids with >=4 steps (v7x: 2 TensorCores x >=2 pipelined steps), then >=2."""
    divisors = [t for t in range(1, n_rows + 1) if n_rows % t == 0]
    fits = [t for t in divisors if t == 1 or t * bytes_per_row <= target_bytes]
    for min_steps in (4, 2, 1):
        cand = [t for t in fits if n_rows // t >= min_steps]
        if cand:
            return max(cand)
    return 1


# ---------------------------------------------------------------------------
# Kernel 1: RevIN 'norm' + replication padding + per-row denorm scale/shift.
#   (the two permutes around RevIN are fused away: stats over the last dim)
# ---------------------------------------------------------------------------
def _make_revin_kernel(eps, L, pad):
    def kernel(x_ref, rw_ref, rb_ref, xpad_ref, scale_ref, shift_ref):
        x = x_ref[...].astype(jnp.float32)                        # (1, C, L)
        mean = jnp.mean(x, axis=-1, keepdims=True)                # (1, C, 1)
        var = jnp.mean(jnp.square(x - mean), axis=-1, keepdims=True)
        std = jnp.sqrt(var + eps)
        rw = rw_ref[...]                                          # (C, 1)
        rb = rb_ref[...]
        xn = (x - mean) / std * rw + rb
        if pad:
            xpad_ref[:, :, :L] = xn
            # ReplicationPad1d((0, stride)) fused into the output block.
            xpad_ref[:, :, L:] = jnp.broadcast_to(
                xn[:, :, L - 1:], (1, xn.shape[1], pad))
        else:
            xpad_ref[...] = xn
        # Denorm constants:  y_out = y_head * scale + shift
        den_scale = std / (rw + eps * eps)
        scale_ref[...] = den_scale
        shift_ref[...] = mean - rb * den_scale
    return kernel


def _revin_norm_pad(z, revin_w, revin_b, eps, pad):
    B, C, L = z.shape
    Lp = L + pad
    return pl.pallas_call(
        _make_revin_kernel(eps, L, pad),
        out_shape=(jax.ShapeDtypeStruct((B, C, Lp), jnp.float32),
                   jax.ShapeDtypeStruct((B, C, 1), jnp.float32),
                   jax.ShapeDtypeStruct((B, C, 1), jnp.float32)),
        grid_spec=pltpu.PrefetchScalarGridSpec(
            num_scalar_prefetch=0,
            grid=(B,),
            in_specs=[pl.BlockSpec((1, C, L), lambda b: (b, 0, 0)),
                      pl.BlockSpec((C, 1), lambda b: (0, 0)),
                      pl.BlockSpec((C, 1), lambda b: (0, 0))],
            out_specs=(pl.BlockSpec((1, C, Lp), lambda b: (b, 0, 0)),
                       pl.BlockSpec((1, C, 1), lambda b: (b, 0, 0)),
                       pl.BlockSpec((1, C, 1), lambda b: (b, 0, 0)))),
        compiler_params=pltpu.CompilerParams(dimension_semantics=("parallel",)),
    )(z, revin_w, revin_b)


# ---------------------------------------------------------------------------
# Kernel 2: fused patch-embed + all encoder layers + Flatten_Head + denorm.
#   One pallas_call; u and the residual-attention scores never leave the chip.
# ---------------------------------------------------------------------------
def _make_encoder_head_kernel(n_layers, n_heads):
    def kernel(*refs):
        patches_ref, scale_ref, shift_ref = refs[0:3]
        w_p_ref, b_p_ref, w_pos_ref = refs[3:6]
        layer_refs = refs[6:6 + 16 * n_layers]
        w_head_ref = refs[6 + 16 * n_layers]
        b_head_ref = refs[7 + 16 * n_layers]
        o_ref, attn_buf = refs[-2], refs[-1]

        TB, Q, PL = patches_ref.shape
        D = w_p_ref.shape[1]
        dk = D // n_heads
        attn_scale = float(dk) ** -0.5

        def bmm(x2d, w):
            # MXU in bf16, accumulate in f32 (w is already stored as bf16).
            return jnp.dot(x2d.astype(jnp.bfloat16), w,
                           preferred_element_type=jnp.float32)

        # --- patch embedding + positional encoding --------------------------
        patches = patches_ref[...].astype(jnp.float32)            # (TB, Q, PL)
        u = bmm(patches.reshape(TB * Q, PL), w_p_ref[...]).reshape(TB, Q, D)
        u = u + b_p_ref[...] + w_pos_ref[...]   # b_p (1,D), W_pos (Q,1) per spec

        # --- encoder layers (residual attention; scores stay on-chip) -------
        prev_scores = None
        for li in range(n_layers):
            (wq, bq, wk, bk, wv, bv, wo, bo, bn1s, bn1b,
             w1, b1, w2, b2, bn2s, bn2b) = layer_refs[16 * li:16 * (li + 1)]

            x2 = u.reshape(TB * Q, D)
            q = (bmm(x2, wq[...]) + bq[...]).reshape(TB, Q, D)
            k = (bmm(x2, wk[...]) + bk[...]).reshape(TB, Q, D)
            v = (bmm(x2, wv[...]) + bv[...]).reshape(TB, Q, D)

            new_scores = []
            for h in range(n_heads):
                sl = slice(h * dk, (h + 1) * dk)
                qh = q[:, :, sl].astype(jnp.bfloat16)
                kh = k[:, :, sl].astype(jnp.bfloat16)
                vh = v[:, :, sl].astype(jnp.bfloat16)
                s = jnp.einsum("bqd,bkd->bqk", qh, kh,
                               preferred_element_type=jnp.float32) * attn_scale
                if prev_scores is not None:
                    s = s + prev_scores[h]
                new_scores.append(s)               # forwarded to the next layer
                p = jnp.exp(s - jnp.max(s, axis=-1, keepdims=True))
                p = p * pl.reciprocal(jnp.sum(p, axis=-1, keepdims=True),
                                      approx=True)
                oh = jnp.einsum("bqk,bkd->bqd", p.astype(jnp.bfloat16), vh,
                                preferred_element_type=jnp.float32)
                attn_buf[:, :, sl] = oh            # head-merge via VMEM scratch
            prev_scores = new_scores

            # Single K=D output projection over the merged heads.
            attn = bmm(attn_buf[...].reshape(TB * Q, D), wo[...]).reshape(TB, Q, D)
            u = u + attn + bo[...]
            u = u * bn1s[...] + bn1b[...]          # BatchNorm1d (eval, folded)
            hid = _gelu(bmm(u.reshape(TB * Q, D), w1[...]) + b1[...])
            u = u + (bmm(hid, w2[...]).reshape(TB, Q, D) + b2[...])
            u = u * bn2s[...] + bn2b[...]

        # --- Flatten_Head linear fused with RevIN 'denorm' -------------------
        # The permute(0,1,3,2)+flatten is folded into the (patch, d_model, T)
        # weight layout; row-tiled M replaces the previous per-batch M=C matmuls.
        wh = w_head_ref[...]                       # (Q, D, T)
        T = wh.shape[-1]
        acc = jnp.zeros((TB, T), jnp.float32)
        for p_idx in range(Q):
            acc = acc + bmm(u[:, p_idx, :], wh[p_idx])
        y = acc + b_head_ref[...]
        y = y * scale_ref[...][:, 0, :] + shift_ref[...][:, 0, :]
        o_ref[:, 0, :] = y.astype(o_ref.dtype)

    return kernel


def _encoder_head_forward(patches, scale_row, shift_row, params, n_layers,
                          n_heads, target_window):
    BC, Q, PL = patches.shape
    D = params["w_p"].shape[1]
    dff = params["layers"][0]["w1"].shape[1]
    H, T = n_heads, target_window

    # Rough live-VMEM bytes per (batch*n_vars) row inside the fused kernel.
    bytes_per_row = 4 * (Q * PL + 6 * Q * D + 2 * H * Q * Q + Q * dff + 2 * T)
    TB = _row_tile(BC, bytes_per_row, target_bytes=8 << 20)
    grid = (BC // TB,)

    weights = [params["w_p"], params["b_p"], params["w_pos"]]
    for lp in params["layers"]:
        weights.extend(lp[name] for name in _LAYER_WEIGHT_NAMES)
    weights.extend([params["w_head"], params["b_head"]])

    in_specs = [pl.BlockSpec((TB, Q, PL), lambda i: (i, 0, 0)),
                pl.BlockSpec((TB, 1, 1), lambda i: (i, 0, 0)),
                pl.BlockSpec((TB, 1, 1), lambda i: (i, 0, 0))]
    # Weights use constant index_maps -> DMA'd once, resident across grid steps.
    for w in weights:
        in_specs.append(pl.BlockSpec(w.shape, lambda i, nd=w.ndim: (0,) * nd))

    flops = int(BC * (2 * Q * PL * D
                      + n_layers * (8 * Q * D * D + 4 * Q * Q * D + 4 * Q * D * dff)
                      + 2 * Q * D * T))
    trans = int(BC * n_layers * (H * Q * Q + Q * dff))
    w_bytes = int(sum(int(w.size) * w.dtype.itemsize for w in weights))
    byts = int(4 * BC * (Q * PL + 2 + T) + w_bytes)

    return pl.pallas_call(
        _make_encoder_head_kernel(n_layers, n_heads),
        out_shape=jax.ShapeDtypeStruct((BC, 1, T), jnp.float32),
        grid_spec=pltpu.PrefetchScalarGridSpec(
            num_scalar_prefetch=0,
            grid=grid,
            in_specs=in_specs,
            out_specs=pl.BlockSpec((TB, 1, T), lambda i: (i, 0, 0)),
            scratch_shapes=[pltpu.VMEM((TB, Q, D), jnp.float32)]),
        compiler_params=pltpu.CompilerParams(
            dimension_semantics=("parallel",),
            vmem_limit_bytes=64 * 1024 * 1024),
        cost_estimate=pl.CostEstimate(flops=flops, transcendentals=trans,
                                      bytes_accessed=byts),
    )(patches, scale_row, shift_row, *weights)


# ---------------------------------------------------------------------------
# Model wrapper
# ---------------------------------------------------------------------------
class PatchTSTBackbonePallas:
    """Inference-mode JAX/Pallas port of PCTFormer's PatchTST_backbone
    (affine RevIN, BatchNorm encoder, residual attention, flatten head)."""

    def __init__(self, c_in, context_window, target_window, patch_len, stride,
                 n_layers=3, d_model=128, n_heads=16, d_ff=256,
                 padding_patch=None, revin_eps=1e-5, bn_eps=1e-5, *, key):
        assert d_model % n_heads == 0
        self.c_in, self.context_window = c_in, context_window
        self.target_window = target_window
        self.patch_len, self.stride = patch_len, stride
        self.padding_patch = padding_patch
        self.n_layers, self.d_model, self.n_heads, self.d_ff = (
            n_layers, d_model, n_heads, d_ff)
        self.revin_eps = revin_eps
        patch_num = int((context_window - patch_len) / stride + 1)
        if padding_patch == "end":
            patch_num += 1
        self.patch_num = patch_num
        self.head_nf = d_model * patch_num
        self.params = self._init_params(key, bn_eps)

    def _init_params(self, key, bn_eps):
        C, PL, D = self.c_in, self.patch_len, self.d_model
        dff, Q, T = self.d_ff, self.patch_num, self.target_window
        keys = iter(jax.random.split(key, 8 + 16 * self.n_layers))

        def lin(fan_in, shape):
            # MXU weights stored in bf16 (native MXU dtype); f32 accumulation in-kernel.
            w = jax.random.normal(next(keys), shape, jnp.float32) / math.sqrt(fan_in)
            return w.astype(jnp.bfloat16)

        def bias(shape):
            return 0.05 * jax.random.normal(next(keys), shape, jnp.float32)

        # BatchNorm1d folded to per-feature scale/shift (fresh running stats, eval).
        bn_scale = jnp.full((1, D), 1.0 / math.sqrt(1.0 + bn_eps), jnp.float32)
        bn_shift = jnp.zeros((1, D), jnp.float32)
        params = {
            "revin_w": 1.0 + 0.1 * jax.random.normal(next(keys), (C, 1), jnp.float32),
            "revin_b": 0.05 * jax.random.normal(next(keys), (C, 1), jnp.float32),
            "w_p": lin(PL, (PL, D)),
            "b_p": bias((1, D)),
            # The spec's W_pos is (q_len, 1), broadcast over d_model.
            "w_pos": jax.random.uniform(next(keys), (Q, 1), jnp.float32, -0.02, 0.02),
            # Flatten_Head weight stored as (patch, d_model, target):
            #   w_head[p, d, t] == torch_W[t, d * patch_num + p]
            "w_head": lin(D * Q, (Q, D, T)),
            "b_head": bias((1, T)),
            "layers": [],
        }
        for _ in range(self.n_layers):
            params["layers"].append({
                "wq": lin(D, (D, D)), "bq": bias((1, D)),
                "wk": lin(D, (D, D)), "bk": bias((1, D)),
                "wv": lin(D, (D, D)), "bv": bias((1, D)),
                "wo": lin(D, (D, D)), "bo": bias((1, D)),
                "bn1_scale": bn_scale, "bn1_shift": bn_shift,
                "w1": lin(D, (D, dff)), "b1": bias((1, dff)),
                "w2": lin(dff, (dff, D)), "b2": bias((1, D)),
                "bn2_scale": bn_scale, "bn2_shift": bn_shift,
            })
        return params

    def __call__(self, z):
        B, C, L = z.shape
        assert C == self.c_in and L == self.context_window
        p = self.params
        pad = self.stride if self.padding_patch == "end" else 0
        # Kernel 1: RevIN norm (+ replication padding + per-row denorm constants).
        xpad, den_scale, den_shift = _revin_norm_pad(
            z, p["revin_w"], p["revin_b"], self.revin_eps, pad)
        Q, PL, S = self.patch_num, self.patch_len, self.stride
        x2 = xpad.reshape(B * C, L + pad)
        # torch unfold == overlapping windows, built from static slices in XLA
        # (the two cancelling permutes around it are skipped entirely).
        patches = jnp.stack([x2[:, i * S:i * S + PL] for i in range(Q)], axis=1)
        out = _encoder_head_forward(
            patches, den_scale.reshape(B * C, 1, 1), den_shift.reshape(B * C, 1, 1),
            p, self.n_layers, self.n_heads, self.target_window)
        return out.reshape(B, C, self.target_window)


# ---------------------------------------------------------------------------
# Pure-JAX reference following the torch op order literally (permutes & all).
# It mirrors the kernel's bf16-at-matmul-entry / f32-accumulation convention.
# ---------------------------------------------------------------------------
def _bmm_ref(x, w):
    return jnp.einsum("...i,io->...o", x.astype(jnp.bfloat16), w,
                      preferred_element_type=jnp.float32)


def _reference_forward(model, z):
    p, eps = model.params, model.revin_eps
    B, C, L = z.shape
    x = jnp.transpose(z, (0, 2, 1))                              # (B, L, C)
    mean = jnp.mean(x, axis=1, keepdims=True)
    std = jnp.sqrt(jnp.mean(jnp.square(x - mean), axis=1, keepdims=True) + eps)
    x = (x - mean) / std
    x = x * p["revin_w"][:, 0] + p["revin_b"][:, 0]
    x = jnp.transpose(x, (0, 2, 1))                              # (B, C, L)
    if model.padding_patch == "end":
        x = jnp.concatenate(
            [x, jnp.repeat(x[:, :, -1:], model.stride, axis=-1)], axis=-1)
    Q, PL, D, H = model.patch_num, model.patch_len, model.d_model, model.n_heads
    dk = D // H
    idx = jnp.arange(Q)[:, None] * model.stride + jnp.arange(PL)[None, :]
    xp = x[:, :, idx]                                            # unfold (B,C,Q,PL)
    xp = jnp.transpose(xp, (0, 1, 3, 2))                         # permute(0,1,3,2)
    xp = jnp.transpose(xp, (0, 1, 3, 2))                         # TSTiEncoder permute
    u = _bmm_ref(xp, p["w_p"]) + p["b_p"][0]                     # (B,C,Q,D)
    u = u.reshape(B * C, Q, D) + p["w_pos"]
    scores, sc_attn = None, float(dk) ** -0.5
    for lp in p["layers"]:
        q = _bmm_ref(u, lp["wq"]) + lp["bq"][0]
        k = _bmm_ref(u, lp["wk"]) + lp["bk"][0]
        v = _bmm_ref(u, lp["wv"]) + lp["bv"][0]
        qh = q.reshape(B * C, Q, H, dk).transpose(0, 2, 1, 3).astype(jnp.bfloat16)
        kh = k.reshape(B * C, Q, H, dk).transpose(0, 2, 1, 3).astype(jnp.bfloat16)
        vh = v.reshape(B * C, Q, H, dk).transpose(0, 2, 1, 3).astype(jnp.bfloat16)
        s = jnp.einsum("bhqd,bhkd->bhqk", qh, kh,
                       preferred_element_type=jnp.float32) * sc_attn
        if scores is not None:
            s = s + scores
        scores = s
        a = jax.nn.softmax(s, axis=-1)
        o = jnp.einsum("bhqk,bhkd->bhqd", a.astype(jnp.bfloat16), vh,
                       preferred_element_type=jnp.float32)
        o = o.transpose(0, 2, 1, 3).reshape(B * C, Q, D)
        u = u + (_bmm_ref(o, lp["wo"]) + lp["bo"][0])
        u = u * lp["bn1_scale"][0] + lp["bn1_shift"][0]
        ff = _bmm_ref(_gelu(_bmm_ref(u, lp["w1"]) + lp["b1"][0]),
                      lp["w2"]) + lp["b2"][0]
        u = u + ff
        u = u * lp["bn2_scale"][0] + lp["bn2_shift"][0]
    zenc = u.reshape(B, C, Q, D)
    zperm = jnp.transpose(zenc, (0, 1, 3, 2)).reshape(B, C, D * Q)  # flatten(-2)
    w_torch = jnp.transpose(p["w_head"], (2, 1, 0)).reshape(-1, D * Q)  # (T, D*Q)
    y = jnp.einsum("bcf,tf->bct", zperm.astype(jnp.bfloat16), w_torch,
                   preferred_element_type=jnp.float32) + p["b_head"][0]
    y = jnp.transpose(y, (0, 2, 1))                              # (B, T, C)
    y = (y - p["revin_b"][:, 0]) / (p["revin_w"][:, 0] + eps * eps)
    y = y * std + mean
    return jnp.transpose(y, (0, 2, 1))                           # (B, C, T)


if __name__ == "__main__":
    key = jax.random.PRNGKey(0)
    k_param, k_data = jax.random.split(key)

    B, c_in, context_window, target_window = 2, 4, 64, 16
    patch_len, stride = 16, 8
    model = PatchTSTBackbonePallas(
        c_in=c_in, context_window=context_window, target_window=target_window,
        patch_len=patch_len, stride=stride, n_layers=2, d_model=32, n_heads=4,
        d_ff=64, padding_patch="end", key=k_param)

    z = jax.random.normal(k_data, (B, c_in, context_window), jnp.float32)

    fwd = jax.jit(lambda inp: model(inp))
    y = jax.block_until_ready(fwd(z))

    assert y.shape == (B, c_in, target_window), y.shape
    assert bool(jnp.all(jnp.isfinite(y)))

    y_ref = jax.block_until_ready(_reference_forward(model, z))
    max_err = float(jnp.max(jnp.abs(y - y_ref)))
    assert jnp.allclose(y, y_ref, rtol=2e-2, atol=2e-2), f"max abs err {max_err}"

    print("KERNEL_OK")
</pallas_src>

<mosaic_0001>
module attributes {stable_mosaic.version = 11 : i64} {
  func.func @kernel(%arg0: i32, %arg1: memref<1x4x64xf32, #tpu.memory_space<vmem>>, %arg2: memref<4x1xf32, #tpu.memory_space<vmem>>, %arg3: memref<4x1xf32, #tpu.memory_space<vmem>>, %arg4: memref<1x4x72xf32, #tpu.memory_space<vmem>>, %arg5: memref<1x4x1xf32, #tpu.memory_space<vmem>>, %arg6: memref<1x4x1xf32, #tpu.memory_space<vmem>>) attributes {dimension_semantics = [#tpu.dimension_semantics<parallel>], iteration_bounds = array<i64: 2>, scalar_prefetch = 0 : i64, scratch_operands = 0 : i64, tpu.core_type = #tpu.core_type<tc>, window_params = [{transform_indices = @transform_0, window_bounds = array<i64: 1, 4, 64>}, {pipeline_mode = #tpu.pipeline_mode<synchronous>, transform_indices = @transform_1, window_bounds = array<i64: 4, 1>}, {pipeline_mode = #tpu.pipeline_mode<synchronous>, transform_indices = @transform_2, window_bounds = array<i64: 4, 1>}, {transform_indices = @transform_3, window_bounds = array<i64: 1, 4, 72>}, {transform_indices = @transform_4, window_bounds = array<i64: 1, 4, 1>}, {transform_indices = @transform_5, window_bounds = array<i64: 1, 4, 1>}]} {
    %c0 = arith.constant 0 : index
    %c0_0 = arith.constant 0 : index
    %c0_1 = arith.constant 0 : index
    %0 = vector.load %arg1[%c0, %c0_0, %c0_1] : memref<1x4x64xf32, #tpu.memory_space<vmem>>, vector<1x4x64xf32>
    %cst = arith.constant dense<0.000000e+00> : vector<1x4xf32>
    %1 = vector.multi_reduction <add>, %0, %cst [2] : vector<1x4x64xf32> to vector<1x4xf32>
    %2 = vector.shape_cast %1 : vector<1x4xf32> to vector<1x4x1xf32>
    %cst_2 = arith.constant 6.400000e+01 : f32
    %3 = vector.broadcast %cst_2 : f32 to vector<1x4x1xf32>
    %4 = arith.divf %2, %3 : vector<1x4x1xf32>
    %5 = vector.broadcast %4 : vector<1x4x1xf32> to vector<1x4x64xf32>
    %6 = arith.subf %0, %5 : vector<1x4x64xf32>
    %7 = arith.mulf %6, %6 : vector<1x4x64xf32>
    %cst_3 = arith.constant dense<0.000000e+00> : vector<1x4xf32>
    %8 = vector.multi_reduction <add>, %7, %cst_3 [2] : vector<1x4x64xf32> to vector<1x4xf32>
    %9 = vector.shape_cast %8 : vector<1x4xf32> to vector<1x4x1xf32>
    %cst_4 = arith.constant 6.400000e+01 : f32
    %10 = vector.broadcast %cst_4 : f32 to vector<1x4x1xf32>
    %11 = arith.divf %9, %10 : vector<1x4x1xf32>
    %cst_5 = arith.constant 9.99999974E-6 : f32
    %12 = vector.broadcast %cst_5 : f32 to vector<1x4x1xf32>
    %13 = arith.addf %11, %12 : vector<1x4x1xf32>
    %14 = math.sqrt %13 : vector<1x4x1xf32>
    %c0_6 = arith.constant 0 : index
    %c0_7 = arith.constant 0 : index
    %15 = vector.load %arg2[%c0_6, %c0_7] : memref<4x1xf32, #tpu.memory_space<vmem>>, vector<4x1xf32>
    %c0_8 = arith.constant 0 : index
    %c0_9 = arith.constant 0 : index
    %16 = vector.load %arg3[%c0_8, %c0_9] : memref<4x1xf32, #tpu.memory_space<vmem>>, vector<4x1xf32>
    %17 = vector.broadcast %4 : vector<1x4x1xf32> to vector<1x4x64xf32>
    %18 = arith.subf %0, %17 : vector<1x4x64xf32>
    %19 = vector.broadcast %14 : vector<1x4x1xf32> to vector<1x4x64xf32>
    %20 = arith.divf %18, %19 : vector<1x4x64xf32>
    %21 = vector.shape_cast %15 : vector<4x1xf32> to vector<1x4x1xf32>
    %22 = vector.broadcast %21 : vector<1x4x1xf32> to vector<1x4x64xf32>
    %23 = arith.mulf %20, %22 : vector<1x4x64xf32>
    %24 = vector.shape_cast %16 : vector<4x1xf32> to vector<1x4x1xf32>
    %25 = vector.broadcast %24 : vector<1x4x1xf32> to vector<1x4x64xf32>
    %26 = arith.addf %23, %25 : vector<1x4x64xf32>
    %c0_10 = arith.constant 0 : index
    %c0_11 = arith.constant 0 : index
    %c0_12 = arith.constant 0 : index
    %27 = vector.load %arg4[%c0_10, %c0_11, %c0_12] : memref<1x4x72xf32, #tpu.memory_space<vmem>>, vector<1x4x64xf32>
    tpu.vector_store %arg4[%c0_10, %c0_11, %c0_12], %26 {strides = array<i32>} : memref<1x4x72xf32, #tpu.memory_space<vmem>>, vector<1x4x64xf32>,
    %28 = vector.extract_strided_slice %26 {offsets = [0, 0, 63], sizes = [1, 4, 1], strides = [1, 1, 1]} : vector<1x4x64xf32> to vector<1x4x1xf32>
    %29 = vector.shape_cast %28 : vector<1x4x1xf32> to vector<1x4x1xf32>
    %30 = vector.broadcast %29 : vector<1x4x1xf32> to vector<1x4x8xf32>
    %c0_13 = arith.constant 0 : index
    %c0_14 = arith.constant 0 : index
    %c64 = arith.constant 64 : index
    %31 = vector.load %arg4[%c0_13, %c0_14, %c64] : memref<1x4x72xf32, #tpu.memory_space<vmem>>, vector<1x4x8xf32>
    tpu.vector_store %arg4[%c0_13, %c0_14, %c64], %30 {strides = array<i32>} : memref<1x4x72xf32, #tpu.memory_space<vmem>>, vector<1x4x8xf32>,
    %cst_15 = arith.constant 1.000000e-10 : f32
    %32 = vector.broadcast %cst_15 : f32 to vector<4x1xf32>
    %33 = arith.addf %15, %32 : vector<4x1xf32>
    %34 = vector.shape_cast %33 : vector<4x1xf32> to vector<1x4x1xf32>
    %35 = arith.divf %14, %34 : vector<1x4x1xf32>
    %c0_16 = arith.constant 0 : index
    %c0_17 = arith.constant 0 : index
    %c0_18 = arith.constant 0 : index
    %36 = vector.load %arg5[%c0_16, %c0_17, %c0_18] : memref<1x4x1xf32, #tpu.memory_space<vmem>>, vector<1x4x1xf32>
    tpu.vector_store %arg5[%c0_16, %c0_17, %c0_18], %35 {strides = array<i32>} : memref<1x4x1xf32, #tpu.memory_space<vmem>>, vector<1x4x1xf32>,
    %37 = vector.shape_cast %16 : vector<4x1xf32> to vector<1x4x1xf32>
    %38 = arith.mulf %37, %35 : vector<1x4x1xf32>
    %39 = arith.subf %4, %38 : vector<1x4x1xf32>
    %c0_19 = arith.constant 0 : index
    %c0_20 = arith.constant 0 : index
    %c0_21 = arith.constant 0 : index
    %40 = vector.load %arg6[%c0_19, %c0_20, %c0_21] : memref<1x4x1xf32, #tpu.memory_space<vmem>>, vector<1x4x1xf32>
    tpu.vector_store %arg6[%c0_19, %c0_20, %c0_21], %39 {strides = array<i32>} : memref<1x4x1xf32, #tpu.memory_space<vmem>>, vector<1x4x1xf32>,
    return
  }
  func.func @transform_0(%arg0: i32) -> (i32, i32, i32) {
    %c0_i32 = arith.constant 0 : i32
    %c0_i32_0 = arith.constant 0 : i32
    %c0_i32_1 = arith.constant 0 : i32
    return %arg0, %c0_i32, %c0_i32_0 : i32, i32, i32
  }
  func.func @transform_1(%arg0: i32) -> (i32, i32) {
    %c0_i32 = arith.constant 0 : i32
    %c0_i32_0 = arith.constant 0 : i32
    %c0_i32_1 = arith.constant 0 : i32
    return %c0_i32, %c0_i32_0 : i32, i32
  }
  func.func @transform_2(%arg0: i32) -> (i32, i32) {
    %c0_i32 = arith.constant 0 : i32
    %c0_i32_0 = arith.constant 0 : i32
    %c0_i32_1 = arith.constant 0 : i32
    return %c0_i32, %c0_i32_0 : i32, i32
  }
  func.func @transform_3(%arg0: i32) -> (i32, i32, i32) {
    %c0_i32 = arith.constant 0 : i32
    %c0_i32_0 = arith.constant 0 : i32
    %c0_i32_1 = arith.constant 0 : i32
    return %arg0, %c0_i32, %c0_i32_0 : i32, i32, i32
  }
  func.func @transform_4(%arg0: i32) -> (i32, i32, i32) {
    %c0_i32 = arith.constant 0 : i32
    %c0_i32_0 = arith.constant 0 : i32
    %c0_i32_1 = arith.constant 0 : i32
    return %arg0, %c0_i32, %c0_i32_0 : i32, i32, i32
  }
  func.func @transform_5(%arg0: i32) -> (i32, i32, i32) {
    %c0_i32 = arith.constant 0 : i32
    %c0_i32_0 = arith.constant 0 : i32
    %c0_i32_1 = arith.constant 0 : i32
    return %arg0, %c0_i32, %c0_i32_0 : i32, i32, i32
  }
}

module attributes {stable_mosaic.version = 11 : i64} {
  func.func @kernel(%arg0: i32, %arg1: memref<2x8x16xf32, #tpu.memory_space<vmem>>, %arg2: memref<2x1x1xf32, #tpu.memory_space<vmem>>, %arg3: memref<2x1x1xf32, #tpu.memory_space<vmem>>, %arg4: memref<16x32xbf16, #tpu.memory_space<vmem>>, %arg5: memref<1x32xf32, #tpu.memory_space<vmem>>, %arg6: memref<8x1xf32, #tpu.memory_space<vmem>>, %arg7: memref<32x32xbf16, #tpu.memory_space<vmem>>, %arg8: memref<1x32xf32, #tpu.memory_space<vmem>>, %arg9: memref<32x32xbf16, #tpu.memory_space<vmem>>, %arg10: memref<1x32xf32, #tpu.memory_space<vmem>>, %arg11: memref<32x32xbf16, #tpu.memory_space<vmem>>, %arg12: memref<1x32xf32, #tpu.memory_space<vmem>>, %arg13: memref<32x32xbf16, #tpu.memory_space<vmem>>, %arg14: memref<1x32xf32, #tpu.memory_space<vmem>>, %arg15: memref<1x32xf32, #tpu.memory_space<vmem>>, %arg16: memref<1x32xf32, #tpu.memory_space<vmem>>, %arg17: memref<32x64xbf16, #tpu.memory_space<vmem>>, %arg18: memref<1x64xf32, #tpu.memory_space<vmem>>, %arg19: memref<64x32xbf16, #tpu.memory_space<vmem>>, %arg20: memref<1x32xf32, #tpu.memory_space<vmem>>, %arg21: memref<1x32xf32, #tpu.memory_space<vmem>>, %arg22: memref<1x32xf32, #tpu.memory_space<vmem>>, %arg23: memref<32x32xbf16, #tpu.memory_space<vmem>>, %arg24: memref<1x32xf32, #tpu.memory_space<vmem>>, %arg25: memref<32x32xbf16, #tpu.memory_space<vmem>>, %arg26: memref<1x32xf32, #tpu.memory_space<vmem>>, %arg27: memref<32x32xbf16, #tpu.memory_space<vmem>>, %arg28: memref<1x32xf32, #tpu.memory_space<vmem>>, %arg29: memref<32x32xbf16, #tpu.memory_space<vmem>>, %arg30: memref<1x32xf32, #tpu.memory_space<vmem>>, %arg31: memref<1x32xf32, #tpu.memory_space<vmem>>, %arg32: memref<1x32xf32, #tpu.memory_space<vmem>>, %arg33: memref<32x64xbf16, #tpu.memory_space<vmem>>, %arg34: memref<1x64xf32, #tpu.memory_space<vmem>>, %arg35: memref<64x32xbf16, #tpu.memory_space<vmem>>, %arg36: memref<1x32xf32, #tpu.memory_space<vmem>>, %arg37: memref<1x32xf32, #tpu.memory_space<vmem>>, %arg38: memref<1x32xf32, #tpu.memory_space<vmem>>, %arg39: memref<8x32x16xbf16, #tpu.memory_space<vmem>>, %arg40: memref<1x16xf32, #tpu.memory_space<vmem>>, %arg41: memref<2x1x16xf32, #tpu.memory_space<vmem>>, %arg42: memref<2x8x32xf32, #tpu.memory_space<vmem>>) attributes {dimension_semantics = [#tpu.dimension_semantics<parallel>], iteration_bounds = array<i64: 4>, scalar_prefetch = 0 : i64, scratch_operands = 1 : i64, tpu.core_type = #tpu.core_type<tc>, window_params = [{transform_indices = @transform_0, window_bounds = array<i64: 2, 8, 16>}, {transform_indices = @transform_1, window_bounds = array<i64: 2, 1, 1>}, {transform_indices = @transform_2, window_bounds = array<i64: 2, 1, 1>}, {pipeline_mode = #tpu.pipeline_mode<synchronous>, transform_indices = @transform_3, window_bounds = array<i64: 16, 32>}, {pipeline_mode = #tpu.pipeline_mode<synchronous>, transform_indices = @transform_4, window_bounds = array<i64: 1, 32>}, {pipeline_mode = #tpu.pipeline_mode<synchronous>, transform_indices = @transform_5, window_bounds = array<i64: 8, 1>}, {pipeline_mode = #tpu.pipeline_mode<synchronous>, transform_indices = @transform_6, window_bounds = array<i64: 32, 32>}, {pipeline_mode = #tpu.pipeline_mode<synchronous>, transform_indices = @transform_7, window_bounds = array<i64: 1, 32>}, {pipeline_mode = #tpu.pipeline_mode<synchronous>, transform_indices = @transform_8, window_bounds = array<i64: 32, 32>}, {pipeline_mode = #tpu.pipeline_mode<synchronous>, transform_indices = @transform_9, window_bounds = array<i64: 1, 32>}, {pipeline_mode = #tpu.pipeline_mode<synchronous>, transform_indices = @transform_10, window_bounds = array<i64: 32, 32>}, {pipeline_mode = #tpu.pipeline_mode<synchronous>, transform_indices = @transform_11, window_bounds = array<i64: 1, 32>}, {pipeline_mode = #tpu.pipeline_mode<synchronous>, transform_indices = @transform_12, window_bounds = array<i64: 32, 32>}, {pipeline_mode = #tpu.pipeline_mode<synchronous>, transform_indices = @transform_13, window_bounds = array<i64: 1, 32>}, {pipeline_mode = #tpu.pipeline_mode<synchronous>, transform_indices = @transform_14, window_bounds = array<i64: 1, 32>}, {pipeline_mode = #tpu.pipeline_mode<synchronous>, transform_indices = @transform_15, window_bounds = array<i64: 1, 32>}, {pipeline_mode = #tpu.pipeline_mode<synchronous>, transform_indices = @transform_16, window_bounds = array<i64: 32, 64>}, {pipeline_mode = #tpu.pipeline_mode<synchronous>, transform_indices = @transform_17, window_bounds = array<i64: 1, 64>}, {pipeline_mode = #tpu.pipeline_mode<synchronous>, transform_indices = @transform_18, window_bounds = array<i64: 64, 32>}, {pipeline_mode = #tpu.pipeline_mode<synchronous>, transform_indices = @transform_19, window_bounds = array<i64: 1, 32>}, {pipeline_mode = #tpu.pipeline_mode<synchronous>, transform_indices = @transform_20, window_bounds = array<i64: 1, 32>}, {pipeline_mode = #tpu.pipeline_mode<synchronous>, transform_indices = @transform_21, window_bounds = array<i64: 1, 32>}, {pipeline_mode = #tpu.pipeline_mode<synchronous>, transform_indices = @transform_22, window_bounds = array<i64: 32, 32>}, {pipeline_mode = #tpu.pipeline_mode<synchronous>, transform_indices = @transform_23, window_bounds = array<i64: 1, 32>}, {pipeline_mode = #tpu.pipeline_mode<synchronous>, transform_indices = @transform_24, window_bounds = array<i64: 32, 32>}, {pipeline_mode = #tpu.pipeline_mode<synchronous>, transform_indices = @transform_25, window_bounds = array<i64: 1, 32>}, {pipeline_mode = #tpu.pipeline_mode<synchronous>, transform_indices = @transform_26, window_bounds = array<i64: 32, 32>}, {pipeline_mode = #tpu.pipeline_mode<synchronous>, transform_indices = @transform_27, window_bounds = array<i64: 1, 32>}, {pipeline_mode = #tpu.pipeline_mode<synchronous>, transform_indices = @transform_28, window_bounds = array<i64: 32, 32>}, {pipeline_mode = #tpu.pipeline_mode<synchronous>, transform_indices = @transform_29, window_bounds = array<i64: 1, 32>}, {pipeline_mode = #tpu.pipeline_mode<synchronous>, transform_indices = @transform_30, window_bounds = array<i64: 1, 32>}, {pipeline_mode = #tpu.pipeline_mode<synchronous>, transform_indices = @transform_31, window_bounds = array<i64: 1, 32>}, {pipeline_mode = #tpu.pipeline_mode<synchronous>, transform_indices = @transform_32, window_bounds = array<i64: 32, 64>}, {pipeline_mode = #tpu.pipeline_mode<synchronous>, transform_indices = @transform_33, window_bounds = array<i64: 1, 64>}, {pipeline_mode = #tpu.pipeline_mode<synchronous>, transform_indices = @transform_34, window_bounds = array<i64: 64, 32>}, {pipeline_mode = #tpu.pipeline_mode<synchronous>, transform_indices = @transform_35, window_bounds = array<i64: 1, 32>}, {pipeline_mode = #tpu.pipeline_mode<synchronous>, transform_indices = @transform_36, window_bounds = array<i64: 1, 32>}, {pipeline_mode = #tpu.pipeline_mode<synchronous>, transform_indices = @transform_37, window_bounds = array<i64: 1, 32>}, {pipeline_mode = #tpu.pipeline_mode<synchronous>, transform_indices = @transform_38, window_bounds = array<i64: 8, 32, 16>}, {pipeline_mode = #tpu.pipeline_mode<synchronous>, transform_indices = @transform_39, window_bounds = array<i64: 1, 16>}, {transform_indices = @transform_40, window_bounds = array<i64: 2, 1, 16>}]} {
    %c0 = arith.constant 0 : index
    %c0_0 = arith.constant 0 : index
    %c0_1 = arith.constant 0 : index
    %0 = vector.load %arg1[%c0, %c0_0, %c0_1] : memref<2x8x16xf32, #tpu.memory_space<vmem>>, vector<2x8x16xf32>
    %1 = vector.shape_cast %0 : vector<2x8x16xf32> to vector<16x16xf32>
    %c0_2 = arith.constant 0 : index
    %c0_3 = arith.constant 0 : index
    %2 = vector.load %arg4[%c0_2, %c0_3] : memref<16x32xbf16, #tpu.memory_space<vmem>>, vector<16x32xbf16>
    %3 = arith.truncf %1 : vector<16x16xf32> to vector<16x16xbf16>
    %cst = arith.constant dense<0.000000e+00> : vector<16x32xf32>
    %4 = tpu.matmul %3, %2, %cst {dimension_numbers = #tpu.dot_dimension_numbers<[1], [0], [0], [1], [0, 0, 1, 1], [], []>} : vector<16x16xbf16>, vector<16x32xbf16>, vector<16x32xf32> -> vector<16x32xf32>
    %5 = vector.shape_cast %4 : vector<16x32xf32> to vector<2x8x32xf32>
    %c0_4 = arith.constant 0 : index
    %c0_5 = arith.constant 0 : index
    %6 = vector.load %arg5[%c0_4, %c0_5] : memref<1x32xf32, #tpu.memory_space<vmem>>, vector<1x32xf32>
    %7 = vector.shape_cast %6 : vector<1x32xf32> to vector<1x1x32xf32>
    %8 = vector.broadcast %7 : vector<1x1x32xf32> to vector<2x8x32xf32>
    %9 = arith.addf %5, %8 : vector<2x8x32xf32>
    %c0_6 = arith.constant 0 : index
    %c0_7 = arith.constant 0 : index
    %10 = vector.load %arg6[%c0_6, %c0_7] : memref<8x1xf32, #tpu.memory_space<vmem>>, vector<8x1xf32>
    %11 = vector.shape_cast %10 : vector<8x1xf32> to vector<1x8x1xf32>
    %12 = vector.broadcast %11 : vector<1x8x1xf32> to vector<2x8x32xf32>
    %13 = arith.addf %9, %12 : vector<2x8x32xf32>
    %14 = vector.shape_cast %13 : vector<2x8x32xf32> to vector<16x32xf32>
    %c0_8 = arith.constant 0 : index
    %c0_9 = arith.constant 0 : index
    %15 = vector.load %arg7[%c0_8, %c0_9] : memref<32x32xbf16, #tpu.memory_space<vmem>>, vector<32x32xbf16>
    %16 = arith.truncf %14 : vector<16x32xf32> to vector<16x32xbf16>
    %cst_10 = arith.constant dense<0.000000e+00> : vector<16x32xf32>
    %17 = tpu.matmul %16, %15, %cst_10 {dimension_numbers = #tpu.dot_dimension_numbers<[1], [0], [0], [1], [0, 0, 1, 1], [], []>} : vector<16x32xbf16>, vector<32x32xbf16>, vector<16x32xf32> -> vector<16x32xf32>
    %c0_11 = arith.constant 0 : index
    %c0_12 = arith.constant 0 : index
    %18 = vector.load %arg8[%c0_11, %c0_12] : memref<1x32xf32, #tpu.memory_space<vmem>>, vector<1x32xf32>
    %19 = vector.broadcast %18 : vector<1x32xf32> to vector<16x32xf32>
    %20 = arith.addf %17, %19 : vector<16x32xf32>
    %21 = vector.shape_cast %20 : vector<16x32xf32> to vector<2x8x32xf32>
    %c0_13 = arith.constant 0 : index
    %c0_14 = arith.constant 0 : index
    %22 = vector.load %arg9[%c0_13, %c0_14] : memref<32x32xbf16, #tpu.memory_space<vmem>>, vector<32x32xbf16>
    %23 = arith.truncf %14 : vector<16x32xf32> to vector<16x32xbf16>
    %cst_15 = arith.constant dense<0.000000e+00> : vector<16x32xf32>
    %24 = tpu.matmul %23, %22, %cst_15 {dimension_numbers = #tpu.dot_dimension_numbers<[1], [0], [0], [1], [0, 0, 1, 1], [], []>} : vector<16x32xbf16>, vector<32x32xbf16>, vector<16x32xf32> -> vector<16x32xf32>
    %c0_16 = arith.constant 0 : index
    %c0_17 = arith.constant 0 : index
    %25 = vector.load %arg10[%c0_16, %c0_17] : memref<1x32xf32, #tpu.memory_space<vmem>>, vector<1x32xf32>
    %26 = vector.broadcast %25 : vector<1x32xf32> to vector<16x32xf32>
    %27 = arith.addf %24, %26 : vector<16x32xf32>
    %28 = vector.shape_cast %27 : vector<16x32xf32> to vector<2x8x32xf32>
    %c0_18 = arith.constant 0 : index
    %c0_19 = arith.constant 0 : index
    %29 = vector.load %arg11[%c0_18, %c0_19] : memref<32x32xbf16, #tpu.memory_space<vmem>>, vector<32x32xbf16>
    %30 = arith.truncf %14 : vector<16x32xf32> to vector<16x32xbf16>
    %cst_20 = arith.constant dense<0.000000e+00> : vector<16x32xf32>
    %31 = tpu.matmul %30, %29, %cst_20 {dimension_numbers = #tpu.dot_dimension_numbers<[1], [0], [0], [1], [0, 0, 1, 1], [], []>} : vector<16x32xbf16>, vector<32x32xbf16>, vector<16x32xf32> -> vector<16x32xf32>
    %c0_21 = arith.constant 0 : index
    %c0_22 = arith.constant 0 : index
    %32 = vector.load %arg12[%c0_21, %c0_22] : memref<1x32xf32, #tpu.memory_space<vmem>>, vector<1x32xf32>
    %33 = vector.broadcast %32 : vector<1x32xf32> to vector<16x32xf32>
    %34 = arith.addf %31, %33 : vector<16x32xf32>
    %35 = vector.shape_cast %34 : vector<16x32xf32> to vector<2x8x32xf32>
    %36 = vector.extract_strided_slice %21 {offsets = [0, 0, 0], sizes = [2, 8, 8], strides = [1, 1, 1]} : vector<2x8x32xf32> to vector<2x8x8xf32>
    %37 = arith.truncf %36 : vector<2x8x8xf32> to vector<2x8x8xbf16>
    %38 = vector.extract_strided_slice %28 {offsets = [0, 0, 0], sizes = [2, 8, 8], strides = [1, 1, 1]} : vector<2x8x32xf32> to vector<2x8x8xf32>
    %39 = arith.truncf %38 : vector<2x8x8xf32> to vector<2x8x8xbf16>
    %40 = vector.extract_strided_slice %35 {offsets = [0, 0, 0], sizes = [2, 8, 8], strides = [1, 1, 1]} : vector<2x8x32xf32> to vector<2x8x8xf32>
    %41 = arith.truncf %40 : vector<2x8x8xf32> to vector<2x8x8xbf16>
    "tpu.trace_start"() <{level = 10 : i32, message = "bqd,bkd->bqk"}> : () -> ()
    %cst_23 = arith.constant dense<0.000000e+00> : vector<2x8x8xf32>
    %42 = tpu.matmul %37, %39, %cst_23 {dimension_numbers = #tpu.dot_dimension_numbers<[2], [2], [1], [1], [0, 0, 0, 1, 1, 1], [0], [0]>} : vector<2x8x8xbf16>, vector<2x8x8xbf16>, vector<2x8x8xf32> -> vector<2x8x8xf32>
    "tpu.trace_stop"() : () -> ()
    %cst_24 = arith.constant 0.353553385 : f32
    %43 = vector.broadcast %cst_24 : f32 to vector<2x8x8xf32>
    %44 = arith.mulf %42, %43 : vector<2x8x8xf32>
    %cst_25 = arith.constant dense<0xFF800000> : vector<2x8xf32>
    %45 = vector.multi_reduction <maximumf>, %44, %cst_25 [2] : vector<2x8x8xf32> to vector<2x8xf32>
    %46 = vector.shape_cast %45 : vector<2x8xf32> to vector<2x8x1xf32>
    %47 = vector.broadcast %46 : vector<2x8x1xf32> to vector<2x8x8xf32>
    %48 = arith.subf %44, %47 : vector<2x8x8xf32>
    %49 = math.exp %48 : vector<2x8x8xf32>
    %cst_26 = arith.constant dense<0.000000e+00> : vector<2x8xf32>
    %50 = vector.multi_reduction <add>, %49, %cst_26 [2] : vector<2x8x8xf32> to vector<2x8xf32>
    %51 = vector.shape_cast %50 : vector<2x8xf32> to vector<2x8x1xf32>
    %52 = tpu.reciprocal %51 {approx = true} : vector<2x8x1xf32> -> vector<2x8x1xf32>
    %53 = vector.broadcast %52 : vector<2x8x1xf32> to vector<2x8x8xf32>
    %54 = arith.mulf %49, %53 : vector<2x8x8xf32>
    %55 = arith.truncf %54 : vector<2x8x8xf32> to vector<2x8x8xbf16>
    "tpu.trace_start"() <{level = 10 : i32, message = "bqk,bkd->bqd"}> : () -> ()
    %cst_27 = arith.constant dense<0.000000e+00> : vector<2x8x8xf32>
    %56 = tpu.matmul %55, %41, %cst_27 {dimension_numbers = #tpu.dot_dimension_numbers<[2], [1], [1], [2], [0, 0, 0, 1, 1, 2], [0], [0]>} : vector<2x8x8xbf16>, vector<2x8x8xbf16>, vector<2x8x8xf32> -> vector<2x8x8xf32>
    "tpu.trace_stop"() : () -> ()
    %c0_28 = arith.constant 0 : index
    %c0_29 = arith.constant 0 : index
    %c0_30 = arith.constant 0 : index
    %57 = vector.load %arg42[%c0_28, %c0_29, %c0_30] : memref<2x8x32xf32, #tpu.memory_space<vmem>>, vector<2x8x8xf32>
    tpu.vector_store %arg42[%c0_28, %c0_29, %c0_30], %56 {strides = array<i32>} : memref<2x8x32xf32, #tpu.memory_space<vmem>>, vector<2x8x8xf32>,
    %58 = vector.extract_strided_slice %21 {offsets = [0, 0, 8], sizes = [2, 8, 8], strides = [1, 1, 1]} : vector<2x8x32xf32> to vector<2x8x8xf32>
    %59 = arith.truncf %58 : vector<2x8x8xf32> to vector<2x8x8xbf16>
    %60 = vector.extract_strided_slice %28 {offsets = [0, 0, 8], sizes = [2, 8, 8], strides = [1, 1, 1]} : vector<2x8x32xf32> to vector<2x8x8xf32>
    %61 = arith.truncf %60 : vector<2x8x8xf32> to vector<2x8x8xbf16>
    %62 = vector.extract_strided_slice %35 {offsets = [0, 0, 8], sizes = [2, 8, 8], strides = [1, 1, 1]} : vector<2x8x32xf32> to vector<2x8x8xf32>
    %63 = arith.truncf %62 : vector<2x8x8xf32> to vector<2x8x8xbf16>
    "tpu.trace_start"() <{level = 10 : i32, message = "bqd,bkd->bqk"}> : () -> ()
    %cst_31 = arith.constant dense<0.000000e+00> : vector<2x8x8xf32>
    %64 = tpu.matmul %59, %61, %cst_31 {dimension_numbers = #tpu.dot_dimension_numbers<[2], [2], [1], [1], [0, 0, 0, 1, 1, 1], [0], [0]>} : vector<2x8x8xbf16>, vector<2x8x8xbf16>, vector<2x8x8xf32> -> vector<2x8x8xf32>
    "tpu.trace_stop"() : () -> ()
    %cst_32 = arith.constant 0.353553385 : f32
    %65 = vector.broadcast %cst_32 : f32 to vector<2x8x8xf32>
    %66 = arith.mulf %64, %65 : vector<2x8x8xf32>
    %cst_33 = arith.constant dense<0xFF800000> : vector<2x8xf32>
    %67 = vector.multi_reduction <maximumf>, %66, %cst_33 [2] : vector<2x8x8xf32> to vector<2x8xf32>
    %68 = vector.shape_cast %67 : vector<2x8xf32> to vector<2x8x1xf32>
    %69 = vector.broadcast %68 : vector<2x8x1xf32> to vector<2x8x8xf32>
    %70 = arith.subf %66, %69 : vector<2x8x8xf32>
    %71 = math.exp %70 : vector<2x8x8xf32>
    %cst_34 = arith.constant dense<0.000000e+00> : vector<2x8xf32>
    %72 = vector.multi_reduction <add>, %71, %cst_34 [2] : vector<2x8x8xf32> to vector<2x8xf32>
    %73 = vector.shape_cast %72 : vector<2x8xf32> to vector<2x8x1xf32>
    %74 = tpu.reciprocal %73 {approx = true} : vector<2x8x1xf32> -> vector<2x8x1xf32>
    %75 = vector.broadcast %74 : vector<2x8x1xf32> to vector<2x8x8xf32>
    %76 = arith.mulf %71, %75 : vector<2x8x8xf32>
    %77 = arith.truncf %76 : vector<2x8x8xf32> to vector<2x8x8xbf16>
    "tpu.trace_start"() <{level = 10 : i32, message = "bqk,bkd->bqd"}> : () -> ()
    %cst_35 = arith.constant dense<0.000000e+00> : vector<2x8x8xf32>
    %78 = tpu.matmul %77, %63, %cst_35 {dimension_numbers = #tpu.dot_dimension_numbers<[2], [1], [1], [2], [0, 0, 0, 1, 1, 2], [0], [0]>} : vector<2x8x8xbf16>, vector<2x8x8xbf16>, vector<2x8x8xf32> -> vector<2x8x8xf32>
    "tpu.trace_stop"() : () -> ()
    %c0_36 = arith.constant 0 : index
    %c0_37 = arith.constant 0 : index
    %c8 = arith.constant 8 : index
    %79 = vector.load %arg42[%c0_36, %c0_37, %c8] : memref<2x8x32xf32, #tpu.memory_space<vmem>>, vector<2x8x8xf32>
    tpu.vector_store %arg42[%c0_36, %c0_37, %c8], %78 {strides = array<i32>} : memref<2x8x32xf32, #tpu.memory_space<vmem>>, vector<2x8x8xf32>,
    %80 = vector.extract_strided_slice %21 {offsets = [0, 0, 16], sizes = [2, 8, 8], strides = [1, 1, 1]} : vector<2x8x32xf32> to vector<2x8x8xf32>
    %81 = arith.truncf %80 : vector<2x8x8xf32> to vector<2x8x8xbf16>
    %82 = vector.extract_strided_slice %28 {offsets = [0, 0, 16], sizes = [2, 8, 8], strides = [1, 1, 1]} : vector<2x8x32xf32> to vector<2x8x8xf32>
    %83 = arith.truncf %82 : vector<2x8x8xf32> to vector<2x8x8xbf16>
    %84 = vector.extract_strided_slice %35 {offsets = [0, 0, 16], sizes = [2, 8, 8], strides = [1, 1, 1]} : vector<2x8x32xf32> to vector<2x8x8xf32>
    %85 = arith.truncf %84 : vector<2x8x8xf32> to vector<2x8x8xbf16>
    "tpu.trace_start"() <{level = 10 : i32, message = "bqd,bkd->bqk"}> : () -> ()
    %cst_38 = arith.constant dense<0.000000e+00> : vector<2x8x8xf32>
    %86 = tpu.matmul %81, %83, %cst_38 {dimension_numbers = #tpu.dot_dimension_numbers<[2], [2], [1], [1], [0, 0, 0, 1, 1, 1], [0], [0]>} : vector<2x8x8xbf16>, vector<2x8x8xbf16>, vector<2x8x8xf32> -> vector<2x8x8xf32>
    "tpu.trace_stop"() : () -> ()
    %cst_39 = arith.constant 0.353553385 : f32
    %87 = vector.broadcast %cst_39 : f32 to vector<2x8x8xf32>
    %88 = arith.mulf %86, %87 : vector<2x8x8xf32>
    %cst_40 = arith.constant dense<0xFF800000> : vector<2x8xf32>
    %89 = vector.multi_reduction <maximumf>, %88, %cst_40 [2] : vector<2x8x8xf32> to vector<2x8xf32>
    %90 = vector.shape_cast %89 : vector<2x8xf32> to vector<2x8x1xf32>
    %91 = vector.broadcast %90 : vector<2x8x1xf32> to vector<2x8x8xf32>
    %92 = arith.subf %88, %91 : vector<2x8x8xf32>
    %93 = math.exp %92 : vector<2x8x8xf32>
    %cst_41 = arith.constant dense<0.000000e+00> : vector<2x8xf32>
    %94 = vector.multi_reduction <add>, %93, %cst_41 [2] : vector<2x8x8xf32> to vector<2x8xf32>
    %95 = vector.shape_cast %94 : vector<2x8xf32> to vector<2x8x1xf32>
    %96 = tpu.reciprocal %95 {approx = true} : vector<2x8x1xf32> -> vector<2x8x1xf32>
    %97 = vector.broadcast %96 : vector<2x8x1xf32> to vector<2x8x8xf32>
    %98 = arith.mulf %93, %97 : vector<2x8x8xf32>
    %99 = arith.truncf %98 : vector<2x8x8xf32> to vector<2x8x8xbf16>
    "tpu.trace_start"() <{level = 10 : i32, message = "bqk,bkd->bqd"}> : () -> ()
    %cst_42 = arith.constant dense<0.000000e+00> : vector<2x8x8xf32>
    %100 = tpu.matmul %99, %85, %cst_42 {dimension_numbers = #tpu.dot_dimension_numbers<[2], [1], [1], [2], [0, 0, 0, 1, 1, 2], [0], [0]>} : vector<2x8x8xbf16>, vector<2x8x8xbf16>, vector<2x8x8xf32> -> vector<2x8x8xf32>
    "tpu.trace_stop"() : () -> ()
    %c0_43 = arith.constant 0 : index
    %c0_44 = arith.constant 0 : index
    %c16 = arith.constant 16 : index
    %101 = vector.load %arg42[%c0_43, %c0_44, %c16] : memref<2x8x32xf32, #tpu.memory_space<vmem>>, vector<2x8x8xf32>
    tpu.vector_store %arg42[%c0_43, %c0_44, %c16], %100 {strides = array<i32>} : memref<2x8x32xf32, #tpu.memory_space<vmem>>, vector<2x8x8xf32>,
    %102 = vector.extract_strided_slice %21 {offsets = [0, 0, 24], sizes = [2, 8, 8], strides = [1, 1, 1]} : vector<2x8x32xf32> to vector<2x8x8xf32>
    %103 = arith.truncf %102 : vector<2x8x8xf32> to vector<2x8x8xbf16>
    %104 = vector.extract_strided_slice %28 {offsets = [0, 0, 24], sizes = [2, 8, 8], strides = [1, 1, 1]} : vector<2x8x32xf32> to vector<2x8x8xf32>
    %105 = arith.truncf %104 : vector<2x8x8xf32> to vector<2x8x8xbf16>
    %106 = vector.extract_strided_slice %35 {offsets = [0, 0, 24], sizes = [2, 8, 8], strides = [1, 1, 1]} : vector<2x8x32xf32> to vector<2x8x8xf32>
    %107 = arith.truncf %106 : vector<2x8x8xf32> to vector<2x8x8xbf16>
    "tpu.trace_start"() <{level = 10 : i32, message = "bqd,bkd->bqk"}> : () -> ()
    %cst_45 = arith.constant dense<0.000000e+00> : vector<2x8x8xf32>
    %108 = tpu.matmul %103, %105, %cst_45 {dimension_numbers = #tpu.dot_dimension_numbers<[2], [2], [1], [1], [0, 0, 0, 1, 1, 1], [0], [0]>} : vector<2x8x8xbf16>, vector<2x8x8xbf16>, vector<2x8x8xf32> -> vector<2x8x8xf32>
    "tpu.trace_stop"() : () -> ()
    %cst_46 = arith.constant 0.353553385 : f32
    %109 = vector.broadcast %cst_46 : f32 to vector<2x8x8xf32>
    %110 = arith.mulf %108, %109 : vector<2x8x8xf32>
    %cst_47 = arith.constant dense<0xFF800000> : vector<2x8xf32>
    %111 = vector.multi_reduction <maximumf>, %110, %cst_47 [2] : vector<2x8x8xf32> to vector<2x8xf32>
    %112 = vector.shape_cast %111 : vector<2x8xf32> to vector<2x8x1xf32>
    %113 = vector.broadcast %112 : vector<2x8x1xf32> to vector<2x8x8xf32>
    %114 = arith.subf %110, %113 : vector<2x8x8xf32>
    %115 = math.exp %114 : vector<2x8x8xf32>
    %cst_48 = arith.constant dense<0.000000e+00> : vector<2x8xf32>
    %116 = vector.multi_reduction <add>, %115, %cst_48 [2] : vector<2x8x8xf32> to vector<2x8xf32>
    %117 = vector.shape_cast %116 : vector<2x8xf32> to vector<2x8x1xf32>
    %118 = tpu.reciprocal %117 {approx = true} : vector<2x8x1xf32> -> vector<2x8x1xf32>
    %119 = vector.broadcast %118 : vector<2x8x1xf32> to vector<2x8x8xf32>
    %120 = arith.mulf %115, %119 : vector<2x8x8xf32>
    %121 = arith.truncf %120 : vector<2x8x8xf32> to vector<2x8x8xbf16>
    "tpu.trace_start"() <{level = 10 : i32, message = "bqk,bkd->bqd"}> : () -> ()
    %cst_49 = arith.constant dense<0.000000e+00> : vector<2x8x8xf32>
    %122 = tpu.matmul %121, %107, %cst_49 {dimension_numbers = #tpu.dot_dimension_numbers<[2], [1], [1], [2], [0, 0, 0, 1, 1, 2], [0], [0]>} : vector<2x8x8xbf16>, vector<2x8x8xbf16>, vector<2x8x8xf32> -> vector<2x8x8xf32>
    "tpu.trace_stop"() : () -> ()
    %c0_50 = arith.constant 0 : index
    %c0_51 = arith.constant 0 : index
    %c24 = arith.constant 24 : index
    %123 = vector.load %arg42[%c0_50, %c0_51, %c24] : memref<2x8x32xf32, #tpu.memory_space<vmem>>, vector<2x8x8xf32>
    tpu.vector_store %arg42[%c0_50, %c0_51, %c24], %122 {strides = array<i32>} : memref<2x8x32xf32, #tpu.memory_space<vmem>>, vector<2x8x8xf32>,
    %c0_52 = arith.constant 0 : index
    %c0_53 = arith.constant 0 : index
    %c0_54 = arith.constant 0 : index
    %124 = vector.load %arg42[%c0_52, %c0_53, %c0_54] : memref<2x8x32xf32, #tpu.memory_space<vmem>>, vector<2x8x32xf32>
    %125 = vector.shape_cast %124 : vector<2x8x32xf32> to vector<16x32xf32>
    %c0_55 = arith.constant 0 : index
    %c0_56 = arith.constant 0 : index
    %126 = vector.load %arg13[%c0_55, %c0_56] : memref<32x32xbf16, #tpu.memory_space<vmem>>, vector<32x32xbf16>
    %127 = arith.truncf %125 : vector<16x32xf32> to vector<16x32xbf16>
    %cst_57 = arith.constant dense<0.000000e+00> : vector<16x32xf32>
    %128 = tpu.matmul %127, %126, %cst_57 {dimension_numbers = #tpu.dot_dimension_numbers<[1], [0], [0], [1], [0, 0, 1, 1], [], []>} : vector<16x32xbf16>, vector<32x32xbf16>, vector<16x32xf32> -> vector<16x32xf32>
    %129 = vector.shape_cast %128 : vector<16x32xf32> to vector<2x8x32xf32>
    %130 = arith.addf %13, %129 : vector<2x8x32xf32>
    %c0_58 = arith.constant 0 : index
    %c0_59 = arith.constant 0 : index
    %131 = vector.load %arg14[%c0_58, %c0_59] : memref<1x32xf32, #tpu.memory_space<vmem>>, vector<1x32xf32>
    %132 = vector.shape_cast %131 : vector<1x32xf32> to vector<1x1x32xf32>
    %133 = vector.broadcast %132 : vector<1x1x32xf32> to vector<2x8x32xf32>
    %134 = arith.addf %130, %133 : vector<2x8x32xf32>
    %c0_60 = arith.constant 0 : index
    %c0_61 = arith.constant 0 : index
    %135 = vector.load %arg15[%c0_60, %c0_61] : memref<1x32xf32, #tpu.memory_space<vmem>>, vector<1x32xf32>
    %136 = vector.shape_cast %135 : vector<1x32xf32> to vector<1x1x32xf32>
    %137 = vector.broadcast %136 : vector<1x1x32xf32> to vector<2x8x32xf32>
    %138 = arith.mulf %134, %137 : vector<2x8x32xf32>
    %c0_62 = arith.constant 0 : index
    %c0_63 = arith.constant 0 : index
    %139 = vector.load %arg16[%c0_62, %c0_63] : memref<1x32xf32, #tpu.memory_space<vmem>>, vector<1x32xf32>
    %140 = vector.shape_cast %139 : vector<1x32xf32> to vector<1x1x32xf32>
    %141 = vector.broadcast %140 : vector<1x1x32xf32> to vector<2x8x32xf32>
    %142 = arith.addf %138, %141 : vector<2x8x32xf32>
    %143 = vector.shape_cast %142 : vector<2x8x32xf32> to vector<16x32xf32>
    %c0_64 = arith.constant 0 : index
    %c0_65 = arith.constant 0 : index
    %144 = vector.load %arg17[%c0_64, %c0_65] : memref<32x64xbf16, #tpu.memory_space<vmem>>, vector<32x64xbf16>
    %145 = arith.truncf %143 : vector<16x32xf32> to vector<16x32xbf16>
    %cst_66 = arith.constant dense<0.000000e+00> : vector<16x64xf32>
    %146 = tpu.matmul %145, %144, %cst_66 {dimension_numbers = #tpu.dot_dimension_numbers<[1], [0], [0], [1], [0, 0, 1, 1], [], []>} : vector<16x32xbf16>, vector<32x64xbf16>, vector<16x64xf32> -> vector<16x64xf32>
    %c0_67 = arith.constant 0 : index
    %c0_68 = arith.constant 0 : index
    %147 = vector.load %arg18[%c0_67, %c0_68] : memref<1x64xf32, #tpu.memory_space<vmem>>, vector<1x64xf32>
    %148 = vector.broadcast %147 : vector<1x64xf32> to vector<16x64xf32>
    %149 = arith.addf %146, %148 : vector<16x64xf32>
    %cst_69 = arith.constant 5.000000e-01 : f32
    %150 = vector.broadcast %cst_69 : f32 to vector<16x64xf32>
    %151 = arith.mulf %150, %149 : vector<16x64xf32>
    %cst_70 = arith.constant 4.471500e-02 : f32
    %152 = vector.broadcast %cst_70 : f32 to vector<16x64xf32>
    %153 = arith.mulf %152, %149 : vector<16x64xf32>
    %154 = arith.mulf %153, %149 : vector<16x64xf32>
    %155 = arith.mulf %154, %149 : vector<16x64xf32>
    %156 = arith.addf %149, %155 : vector<16x64xf32>
    %cst_71 = arith.constant 0.797884583 : f32
    %157 = vector.broadcast %cst_71 : f32 to vector<16x64xf32>
    %158 = arith.mulf %157, %156 : vector<16x64xf32>
    %159 = math.tanh %158 : vector<16x64xf32>
    %cst_72 = arith.constant 1.000000e+00 : f32
    %160 = vector.broadcast %cst_72 : f32 to vector<16x64xf32>
    %161 = arith.addf %160, %159 : vector<16x64xf32>
    %162 = arith.mulf %151, %161 : vector<16x64xf32>
    %c0_73 = arith.constant 0 : index
    %c0_74 = arith.constant 0 : index
    %163 = vector.load %arg19[%c0_73, %c0_74] : memref<64x32xbf16, #tpu.memory_space<vmem>>, vector<64x32xbf16>
    %164 = arith.truncf %162 : vector<16x64xf32> to vector<16x64xbf16>
    %cst_75 = arith.constant dense<0.000000e+00> : vector<16x32xf32>
    %165 = tpu.matmul %164, %163, %cst_75 {dimension_numbers = #tpu.dot_dimension_numbers<[1], [0], [0], [1], [0, 0, 1, 1], [], []>} : vector<16x64xbf16>, vector<64x32xbf16>, vector<16x32xf32> -> vector<16x32xf32>
    %166 = vector.shape_cast %165 : vector<16x32xf32> to vector<2x8x32xf32>
    %c0_76 = arith.constant 0 : index
    %c0_77 = arith.constant 0 : index
    %167 = vector.load %arg20[%c0_76, %c0_77] : memref<1x32xf32, #tpu.memory_space<vmem>>, vector<1x32xf32>
    %168 = vector.shape_cast %167 : vector<1x32xf32> to vector<1x1x32xf32>
    %169 = vector.broadcast %168 : vector<1x1x32xf32> to vector<2x8x32xf32>
    %170 = arith.addf %166, %169 : vector<2x8x32xf32>
    %171 = arith.addf %142, %170 : vector<2x8x32xf32>
    %c0_78 = arith.constant 0 : index
    %c0_79 = arith.constant 0 : index
    %172 = vector.load %arg21[%c0_78, %c0_79] : memref<1x32xf32, #tpu.memory_space<vmem>>, vector<1x32xf32>
    %173 = vector.shape_cast %172 : vector<1x32xf32> to vector<1x1x32xf32>
    %174 = vector.broadcast %173 : vector<1x1x32xf32> to vector<2x8x32xf32>
    %175 = arith.mulf %171, %174 : vector<2x8x32xf32>
    %c0_80 = arith.constant 0 : index
    %c0_81 = arith.constant 0 : index
    %176 = vector.load %arg22[%c0_80, %c0_81] : memref<1x32xf32, #tpu.memory_space<vmem>>, vector<1x32xf32>
    %177 = vector.shape_cast %176 : vector<1x32xf32> to vector<1x1x32xf32>
    %178 = vector.broadcast %177 : vector<1x1x32xf32> to vector<2x8x32xf32>
    %179 = arith.addf %175, %178 : vector<2x8x32xf32>
    %180 = vector.shape_cast %179 : vector<2x8x32xf32> to vector<16x32xf32>
    %c0_82 = arith.constant 0 : index
    %c0_83 = arith.constant 0 : index
    %181 = vector.load %arg23[%c0_82, %c0_83] : memref<32x32xbf16, #tpu.memory_space<vmem>>, vector<32x32xbf16>
    %182 = arith.truncf %180 : vector<16x32xf32> to vector<16x32xbf16>
    %cst_84 = arith.constant dense<0.000000e+00> : vector<16x32xf32>
    %183 = tpu.matmul %182, %181, %cst_84 {dimension_numbers = #tpu.dot_dimension_numbers<[1], [0], [0], [1], [0, 0, 1, 1], [], []>} : vector<16x32xbf16>, vector<32x32xbf16>, vector<16x32xf32> -> vector<16x32xf32>
    %c0_85 = arith.constant 0 : index
    %c0_86 = arith.constant 0 : index
    %184 = vector.load %arg24[%c0_85, %c0_86] : memref<1x32xf32, #tpu.memory_space<vmem>>, vector<1x32xf32>
    %185 = vector.broadcast %184 : vector<1x32xf32> to vector<16x32xf32>
    %186 = arith.addf %183, %185 : vector<16x32xf32>
    %187 = vector.shape_cast %186 : vector<16x32xf32> to vector<2x8x32xf32>
    %c0_87 = arith.constant 0 : index
    %c0_88 = arith.constant 0 : index
    %188 = vector.load %arg25[%c0_87, %c0_88] : memref<32x32xbf16, #tpu.memory_space<vmem>>, vector<32x32xbf16>
    %189 = arith.truncf %180 : vector<16x32xf32> to vector<16x32xbf16>
    %cst_89 = arith.constant dense<0.000000e+00> : vector<16x32xf32>
    %190 = tpu.matmul %189, %188, %cst_89 {dimension_numbers = #tpu.dot_dimension_numbers<[1], [0], [0], [1], [0, 0, 1, 1], [], []>} : vector<16x32xbf16>, vector<32x32xbf16>, vector<16x32xf32> -> vector<16x32xf32>
    %c0_90 = arith.constant 0 : index
    %c0_91 = arith.constant 0 : index
    %191 = vector.load %arg26[%c0_90, %c0_91] : memref<1x32xf32, #tpu.memory_space<vmem>>, vector<1x32xf32>
    %192 = vector.broadcast %191 : vector<1x32xf32> to vector<16x32xf32>
    %193 = arith.addf %190, %192 : vector<16x32xf32>
    %194 = vector.shape_cast %193 : vector<16x32xf32> to vector<2x8x32xf32>
    %c0_92 = arith.constant 0 : index
    %c0_93 = arith.constant 0 : index
    %195 = vector.load %arg27[%c0_92, %c0_93] : memref<32x32xbf16, #tpu.memory_space<vmem>>, vector<32x32xbf16>
    %196 = arith.truncf %180 : vector<16x32xf32> to vector<16x32xbf16>
    %cst_94 = arith.constant dense<0.000000e+00> : vector<16x32xf32>
    %197 = tpu.matmul %196, %195, %cst_94 {dimension_numbers = #tpu.dot_dimension_numbers<[1], [0], [0], [1], [0, 0, 1, 1], [], []>} : vector<16x32xbf16>, vector<32x32xbf16>, vector<16x32xf32> -> vector<16x32xf32>
    %c0_95 = arith.constant 0 : index
    %c0_96 = arith.constant 0 : index
    %198 = vector.load %arg28[%c0_95, %c0_96] : memref<1x32xf32, #tpu.memory_space<vmem>>, vector<1x32xf32>
    %199 = vector.broadcast %198 : vector<1x32xf32> to vector<16x32xf32>
    %200 = arith.addf %197, %199 : vector<16x32xf32>
    %201 = vector.shape_cast %200 : vector<16x32xf32> to vector<2x8x32xf32>
    %202 = vector.extract_strided_slice %187 {offsets = [0, 0, 0], sizes = [2, 8, 8], strides = [1, 1, 1]} : vector<2x8x32xf32> to vector<2x8x8xf32>
    %203 = arith.truncf %202 : vector<2x8x8xf32> to vector<2x8x8xbf16>
    %204 = vector.extract_strided_slice %194 {offsets = [0, 0, 0], sizes = [2, 8, 8], strides = [1, 1, 1]} : vector<2x8x32xf32> to vector<2x8x8xf32>
    %205 = arith.truncf %204 : vector<2x8x8xf32> to vector<2x8x8xbf16>
    %206 = vector.extract_strided_slice %201 {offsets = [0, 0, 0], sizes = [2, 8, 8], strides = [1, 1, 1]} : vector<2x8x32xf32> to vector<2x8x8xf32>
    %207 = arith.truncf %206 : vector<2x8x8xf32> to vector<2x8x8xbf16>
    "tpu.trace_start"() <{level = 10 : i32, message = "bqd,bkd->bqk"}> : () -> ()
    %cst_97 = arith.constant dense<0.000000e+00> : vector<2x8x8xf32>
    %208 = tpu.matmul %203, %205, %cst_97 {dimension_numbers = #tpu.dot_dimension_numbers<[2], [2], [1], [1], [0, 0, 0, 1, 1, 1], [0], [0]>} : vector<2x8x8xbf16>, vector<2x8x8xbf16>, vector<2x8x8xf32> -> vector<2x8x8xf32>
    "tpu.trace_stop"() : () -> ()
    %cst_98 = arith.constant 0.353553385 : f32
    %209 = vector.broadcast %cst_98 : f32 to vector<2x8x8xf32>
    %210 = arith.mulf %208, %209 : vector<2x8x8xf32>
    %211 = arith.addf %210, %44 : vector<2x8x8xf32>
    %cst_99 = arith.constant dense<0xFF800000> : vector<2x8xf32>
    %212 = vector.multi_reduction <maximumf>, %211, %cst_99 [2] : vector<2x8x8xf32> to vector<2x8xf32>
    %213 = vector.shape_cast %212 : vector<2x8xf32> to vector<2x8x1xf32>
    %214 = vector.broadcast %213 : vector<2x8x1xf32> to vector<2x8x8xf32>
    %215 = arith.subf %211, %214 : vector<2x8x8xf32>
    %216 = math.exp %215 : vector<2x8x8xf32>
    %cst_100 = arith.constant dense<0.000000e+00> : vector<2x8xf32>
    %217 = vector.multi_reduction <add>, %216, %cst_100 [2] : vector<2x8x8xf32> to vector<2x8xf32>
    %218 = vector.shape_cast %217 : vector<2x8xf32> to vector<2x8x1xf32>
    %219 = tpu.reciprocal %218 {approx = true} : vector<2x8x1xf32> -> vector<2x8x1xf32>
    %220 = vector.broadcast %219 : vector<2x8x1xf32> to vector<2x8x8xf32>
    %221 = arith.mulf %216, %220 : vector<2x8x8xf32>
    %222 = arith.truncf %221 : vector<2x8x8xf32> to vector<2x8x8xbf16>
    "tpu.trace_start"() <{level = 10 : i32, message = "bqk,bkd->bqd"}> : () -> ()
    %cst_101 = arith.constant dense<0.000000e+00> : vector<2x8x8xf32>
    %223 = tpu.matmul %222, %207, %cst_101 {dimension_numbers = #tpu.dot_dimension_numbers<[2], [1], [1], [2], [0, 0, 0, 1, 1, 2], [0], [0]>} : vector<2x8x8xbf16>, vector<2x8x8xbf16>, vector<2x8x8xf32> -> vector<2x8x8xf32>
    "tpu.trace_stop"() : () -> ()
    %c0_102 = arith.constant 0 : index
    %c0_103 = arith.constant 0 : index
    %c0_104 = arith.constant 0 : index
    %224 = vector.load %arg42[%c0_102, %c0_103, %c0_104] : memref<2x8x32xf32, #tpu.memory_space<vmem>>, vector<2x8x8xf32>
    tpu.vector_store %arg42[%c0_102, %c0_103, %c0_104], %223 {strides = array<i32>} : memref<2x8x32xf32, #tpu.memory_space<vmem>>, vector<2x8x8xf32>,
    %225 = vector.extract_strided_slice %187 {offsets = [0, 0, 8], sizes = [2, 8, 8], strides = [1, 1, 1]} : vector<2x8x32xf32> to vector<2x8x8xf32>
    %226 = arith.truncf %225 : vector<2x8x8xf32> to vector<2x8x8xbf16>
    %227 = vector.extract_strided_slice %194 {offsets = [0, 0, 8], sizes = [2, 8, 8], strides = [1, 1, 1]} : vector<2x8x32xf32> to vector<2x8x8xf32>
    %228 = arith.truncf %227 : vector<2x8x8xf32> to vector<2x8x8xbf16>
    %229 = vector.extract_strided_slice %201 {offsets = [0, 0, 8], sizes = [2, 8, 8], strides = [1, 1, 1]} : vector<2x8x32xf32> to vector<2x8x8xf32>
    %230 = arith.truncf %229 : vector<2x8x8xf32> to vector<2x8x8xbf16>
    "tpu.trace_start"() <{level = 10 : i32, message = "bqd,bkd->bqk"}> : () -> ()
    %cst_105 = arith.constant dense<0.000000e+00> : vector<2x8x8xf32>
    %231 = tpu.matmul %226, %228, %cst_105 {dimension_numbers = #tpu.dot_dimension_numbers<[2], [2], [1], [1], [0, 0, 0, 1, 1, 1], [0], [0]>} : vector<2x8x8xbf16>, vector<2x8x8xbf16>, vector<2x8x8xf32> -> vector<2x8x8xf32>
    "tpu.trace_stop"() : () -> ()
    %cst_106 = arith.constant 0.353553385 : f32
    %232 = vector.broadcast %cst_106 : f32 to vector<2x8x8xf32>
    %233 = arith.mulf %231, %232 : vector<2x8x8xf32>
    %234 = arith.addf %233, %66 : vector<2x8x8xf32>
    %cst_107 = arith.constant dense<0xFF800000> : vector<2x8xf32>
    %235 = vector.multi_reduction <maximumf>, %234, %cst_107 [2] : vector<2x8x8xf32> to vector<2x8xf32>
    %236 = vector.shape_cast %235 : vector<2x8xf32> to vector<2x8x1xf32>
    %237 = vector.broadcast %236 : vector<2x8x1xf32> to vector<2x8x8xf32>
    %238 = arith.subf %234, %237 : vector<2x8x8xf32>
    %239 = math.exp %238 : vector<2x8x8xf32>
    %cst_108 = arith.constant dense<0.000000e+00> : vector<2x8xf32>
    %240 = vector.multi_reduction <add>, %239, %cst_108 [2] : vector<2x8x8xf32> to vector<2x8xf32>
    %241 = vector.shape_cast %240 : vector<2x8xf32> to vector<2x8x1xf32>
    %242 = tpu.reciprocal %241 {approx = true} : vector<2x8x1xf32> -> vector<2x8x1xf32>
    %243 = vector.broadcast %242 : vector<2x8x1xf32> to vector<2x8x8xf32>
    %244 = arith.mulf %239, %243 : vector<2x8x8xf32>
    %245 = arith.truncf %244 : vector<2x8x8xf32> to vector<2x8x8xbf16>
    "tpu.trace_start"() <{level = 10 : i32, message = "bqk,bkd->bqd"}> : () -> ()
    %cst_109 = arith.constant dense<0.000000e+00> : vector<2x8x8xf32>
    %246 = tpu.matmul %245, %230, %cst_109 {dimension_numbers = #tpu.dot_dimension_numbers<[2], [1], [1], [2], [0, 0, 0, 1, 1, 2], [0], [0]>} : vector<2x8x8xbf16>, vector<2x8x8xbf16>, vector<2x8x8xf32> -> vector<2x8x8xf32>
    "tpu.trace_stop"() : () -> ()
    %c0_110 = arith.constant 0 : index
    %c0_111 = arith.constant 0 : index
    %c8_112 = arith.constant 8 : index
    %247 = vector.load %arg42[%c0_110, %c0_111, %c8_112] : memref<2x8x32xf32, #tpu.memory_space<vmem>>, vector<2x8x8xf32>
    tpu.vector_store %arg42[%c0_110, %c0_111, %c8_112], %246 {strides = array<i32>} : memref<2x8x32xf32, #tpu.memory_space<vmem>>, vector<2x8x8xf32>,
    %248 = vector.extract_strided_slice %187 {offsets = [0, 0, 16], sizes = [2, 8, 8], strides = [1, 1, 1]} : vector<2x8x32xf32> to vector<2x8x8xf32>
    %249 = arith.truncf %248 : vector<2x8x8xf32> to vector<2x8x8xbf16>
    %250 = vector.extract_strided_slice %194 {offsets = [0, 0, 16], sizes = [2, 8, 8], strides = [1, 1, 1]} : vector<2x8x32xf32> to vector<2x8x8xf32>
    %251 = arith.truncf %250 : vector<2x8x8xf32> to vector<2x8x8xbf16>
    %252 = vector.extract_strided_slice %201 {offsets = [0, 0, 16], sizes = [2, 8, 8], strides = [1, 1, 1]} : vector<2x8x32xf32> to vector<2x8x8xf32>
    %253 = arith.truncf %252 : vector<2x8x8xf32> to vector<2x8x8xbf16>
    "tpu.trace_start"() <{level = 10 : i32, message = "bqd,bkd->bqk"}> : () -> ()
    %cst_113 = arith.constant dense<0.000000e+00> : vector<2x8x8xf32>
    %254 = tpu.matmul %249, %251, %cst_113 {dimension_numbers = #tpu.dot_dimension_numbers<[2], [2], [1], [1], [0, 0, 0, 1, 1, 1], [0], [0]>} : vector<2x8x8xbf16>, vector<2x8x8xbf16>, vector<2x8x8xf32> -> vector<2x8x8xf32>
    "tpu.trace_stop"() : () -> ()
    %cst_114 = arith.constant 0.353553385 : f32
    %255 = vector.broadcast %cst_114 : f32 to vector<2x8x8xf32>
    %256 = arith.mulf %254, %255 : vector<2x8x8xf32>
    %257 = arith.addf %256, %88 : vector<2x8x8xf32>
    %cst_115 = arith.constant dense<0xFF800000> : vector<2x8xf32>
    %258 = vector.multi_reduction <maximumf>, %257, %cst_115 [2] : vector<2x8x8xf32> to vector<2x8xf32>
    %259 = vector.shape_cast %258 : vector<2x8xf32> to vector<2x8x1xf32>
    %260 = vector.broadcast %259 : vector<2x8x1xf32> to vector<2x8x8xf32>
    %261 = arith.subf %257, %260 : vector<2x8x8xf32>
    %262 = math.exp %261 : vector<2x8x8xf32>
    %cst_116 = arith.constant dense<0.000000e+00> : vector<2x8xf32>
    %263 = vector.multi_reduction <add>, %262, %cst_116 [2] : vector<2x8x8xf32> to vector<2x8xf32>
    %264 = vector.shape_cast %263 : vector<2x8xf32> to vector<2x8x1xf32>
    %265 = tpu.reciprocal %264 {approx = true} : vector<2x8x1xf32> -> vector<2x8x1xf32>
    %266 = vector.broadcast %265 : vector<2x8x1xf32> to vector<2x8x8xf32>
    %267 = arith.mulf %262, %266 : vector<2x8x8xf32>
    %268 = arith.truncf %267 : vector<2x8x8xf32> to vector<2x8x8xbf16>
    "tpu.trace_start"() <{level = 10 : i32, message = "bqk,bkd->bqd"}> : () -> ()
    %cst_117 = arith.constant dense<0.000000e+00> : vector<2x8x8xf32>
    %269 = tpu.matmul %268, %253, %cst_117 {dimension_numbers = #tpu.dot_dimension_numbers<[2], [1], [1], [2], [0, 0, 0, 1, 1, 2], [0], [0]>} : vector<2x8x8xbf16>, vector<2x8x8xbf16>, vector<2x8x8xf32> -> vector<2x8x8xf32>
    "tpu.trace_stop"() : () -> ()
    %c0_118 = arith.constant 0 : index
    %c0_119 = arith.constant 0 : index
    %c16_120 = arith.constant 16 : index
    %270 = vector.load %arg42[%c0_118, %c0_119, %c16_120] : memref<2x8x32xf32, #tpu.memory_space<vmem>>, vector<2x8x8xf32>
    tpu.vector_store %arg42[%c0_118, %c0_119, %c16_120], %269 {strides = array<i32>} : memref<2x8x32xf32, #tpu.memory_space<vmem>>, vector<2x8x8xf32>,
    %271 = vector.extract_strided_slice %187 {offsets = [0, 0, 24], sizes = [2, 8, 8], strides = [1, 1, 1]} : vector<2x8x32xf32> to vector<2x8x8xf32>
    %272 = arith.truncf %271 : vector<2x8x8xf32> to vector<2x8x8xbf16>
    %273 = vector.extract_strided_slice %194 {offsets = [0, 0, 24], sizes = [2, 8, 8], strides = [1, 1, 1]} : vector<2x8x32xf32> to vector<2x8x8xf32>
    %274 = arith.truncf %273 : vector<2x8x8xf32> to vector<2x8x8xbf16>
    %275 = vector.extract_strided_slice %201 {offsets = [0, 0, 24], sizes = [2, 8, 8], strides = [1, 1, 1]} : vector<2x8x32xf32> to vector<2x8x8xf32>
    %276 = arith.truncf %275 : vector<2x8x8xf32> to vector<2x8x8xbf16>
    "tpu.trace_start"() <{level = 10 : i32, message = "bqd,bkd->bqk"}> : () -> ()
    %cst_121 = arith.constant dense<0.000000e+00> : vector<2x8x8xf32>
    %277 = tpu.matmul %272, %274, %cst_121 {dimension_numbers = #tpu.dot_dimension_numbers<[2], [2], [1], [1], [0, 0, 0, 1, 1, 1], [0], [0]>} : vector<2x8x8xbf16>, vector<2x8x8xbf16>, vector<2x8x8xf32> -> vector<2x8x8xf32>
    "tpu.trace_stop"() : () -> ()
    %cst_122 = arith.constant 0.353553385 : f32
    %278 = vector.broadcast %cst_122 : f32 to vector<2x8x8xf32>
    %279 = arith.mulf %277, %278 : vector<2x8x8xf32>
    %280 = arith.addf %279, %110 : vector<2x8x8xf32>
    %cst_123 = arith.constant dense<0xFF800000> : vector<2x8xf32>
    %281 = vector.multi_reduction <maximumf>, %280, %cst_123 [2] : vector<2x8x8xf32> to vector<2x8xf32>
    %282 = vector.shape_cast %281 : vector<2x8xf32> to vector<2x8x1xf32>
    %283 = vector.broadcast %282 : vector<2x8x1xf32> to vector<2x8x8xf32>
    %284 = arith.subf %280, %283 : vector<2x8x8xf32>
    %285 = math.exp %284 : vector<2x8x8xf32>
    %cst_124 = arith.constant dense<0.000000e+00> : vector<2x8xf32>
    %286 = vector.multi_reduction <add>, %285, %cst_124 [2] : vector<2x8x8xf32> to vector<2x8xf32>
    %287 = vector.shape_cast %286 : vector<2x8xf32> to vector<2x8x1xf32>
    %288 = tpu.reciprocal %287 {approx = true} : vector<2x8x1xf32> -> vector<2x8x1xf32>
    %289 = vector.broadcast %288 : vector<2x8x1xf32> to vector<2x8x8xf32>
    %290 = arith.mulf %285, %289 : vector<2x8x8xf32>
    %291 = arith.truncf %290 : vector<2x8x8xf32> to vector<2x8x8xbf16>
    "tpu.trace_start"() <{level = 10 : i32, message = "bqk,bkd->bqd"}> : () -> ()
    %cst_125 = arith.constant dense<0.000000e+00> : vector<2x8x8xf32>
    %292 = tpu.matmul %291, %276, %cst_125 {dimension_numbers = #tpu.dot_dimension_numbers<[2], [1], [1], [2], [0, 0, 0, 1, 1, 2], [0], [0]>} : vector<2x8x8xbf16>, vector<2x8x8xbf16>, vector<2x8x8xf32> -> vector<2x8x8xf32>
    "tpu.trace_stop"() : () -> ()
    %c0_126 = arith.constant 0 : index
    %c0_127 = arith.constant 0 : index
    %c24_128 = arith.constant 24 : index
    %293 = vector.load %arg42[%c0_126, %c0_127, %c24_128] : memref<2x8x32xf32, #tpu.memory_space<vmem>>, vector<2x8x8xf32>
    tpu.vector_store %arg42[%c0_126, %c0_127, %c24_128], %292 {strides = array<i32>} : memref<2x8x32xf32, #tpu.memory_space<vmem>>, vector<2x8x8xf32>,
    %c0_129 = arith.constant 0 : index
    %c0_130 = arith.constant 0 : index
    %c0_131 = arith.constant 0 : index
    %294 = vector.load %arg42[%c0_129, %c0_130, %c0_131] : memref<2x8x32xf32, #tpu.memory_space<vmem>>, vector<2x8x32xf32>
    %295 = vector.shape_cast %294 : vector<2x8x32xf32> to vector<16x32xf32>
    %c0_132 = arith.constant 0 : index
    %c0_133 = arith.constant 0 : index
    %296 = vector.load %arg29[%c0_132, %c0_133] : memref<32x32xbf16, #tpu.memory_space<vmem>>, vector<32x32xbf16>
    %297 = arith.truncf %295 : vector<16x32xf32> to vector<16x32xbf16>
    %cst_134 = arith.constant dense<0.000000e+00> : vector<16x32xf32>
    %298 = tpu.matmul %297, %296, %cst_134 {dimension_numbers = #tpu.dot_dimension_numbers<[1], [0], [0], [1], [0, 0, 1, 1], [], []>} : vector<16x32xbf16>, vector<32x32xbf16>, vector<16x32xf32> -> vector<16x32xf32>
    %299 = vector.shape_cast %298 : vector<16x32xf32> to vector<2x8x32xf32>
    %300 = arith.addf %179, %299 : vector<2x8x32xf32>
    %c0_135 = arith.constant 0 : index
    %c0_136 = arith.constant 0 : index
    %301 = vector.load %arg30[%c0_135, %c0_136] : memref<1x32xf32, #tpu.memory_space<vmem>>, vector<1x32xf32>
    %302 = vector.shape_cast %301 : vector<1x32xf32> to vector<1x1x32xf32>
    %303 = vector.broadcast %302 : vector<1x1x32xf32> to vector<2x8x32xf32>
    %304 = arith.addf %300, %303 : vector<2x8x32xf32>
    %c0_137 = arith.constant 0 : index
    %c0_138 = arith.constant 0 : index
    %305 = vector.load %arg31[%c0_137, %c0_138] : memref<1x32xf32, #tpu.memory_space<vmem>>, vector<1x32xf32>
    %306 = vector.shape_cast %305 : vector<1x32xf32> to vector<1x1x32xf32>
    %307 = vector.broadcast %306 : vector<1x1x32xf32> to vector<2x8x32xf32>
    %308 = arith.mulf %304, %307 : vector<2x8x32xf32>
    %c0_139 = arith.constant 0 : index
    %c0_140 = arith.constant 0 : index
    %309 = vector.load %arg32[%c0_139, %c0_140] : memref<1x32xf32, #tpu.memory_space<vmem>>, vector<1x32xf32>
    %310 = vector.shape_cast %309 : vector<1x32xf32> to vector<1x1x32xf32>
    %311 = vector.broadcast %310 : vector<1x1x32xf32> to vector<2x8x32xf32>
    %312 = arith.addf %308, %311 : vector<2x8x32xf32>
    %313 = vector.shape_cast %312 : vector<2x8x32xf32> to vector<16x32xf32>
    %c0_141 = arith.constant 0 : index
    %c0_142 = arith.constant 0 : index
    %314 = vector.load %arg33[%c0_141, %c0_142] : memref<32x64xbf16, #tpu.memory_space<vmem>>, vector<32x64xbf16>
    %315 = arith.truncf %313 : vector<16x32xf32> to vector<16x32xbf16>
    %cst_143 = arith.constant dense<0.000000e+00> : vector<16x64xf32>
    %316 = tpu.matmul %315, %314, %cst_143 {dimension_numbers = #tpu.dot_dimension_numbers<[1], [0], [0], [1], [0, 0, 1, 1], [], []>} : vector<16x32xbf16>, vector<32x64xbf16>, vector<16x64xf32> -> vector<16x64xf32>
    %c0_144 = arith.constant 0 : index
    %c0_145 = arith.constant 0 : index
    %317 = vector.load %arg34[%c0_144, %c0_145] : memref<1x64xf32, #tpu.memory_space<vmem>>, vector<1x64xf32>
    %318 = vector.broadcast %317 : vector<1x64xf32> to vector<16x64xf32>
    %319 = arith.addf %316, %318 : vector<16x64xf32>
    %cst_146 = arith.constant 5.000000e-01 : f32
    %320 = vector.broadcast %cst_146 : f32 to vector<16x64xf32>
    %321 = arith.mulf %320, %319 : vector<16x64xf32>
    %cst_147 = arith.constant 4.471500e-02 : f32
    %322 = vector.broadcast %cst_147 : f32 to vector<16x64xf32>
    %323 = arith.mulf %322, %319 : vector<16x64xf32>
    %324 = arith.mulf %323, %319 : vector<16x64xf32>
    %325 = arith.mulf %324, %319 : vector<16x64xf32>
    %326 = arith.addf %319, %325 : vector<16x64xf32>
    %cst_148 = arith.constant 0.797884583 : f32
    %327 = vector.broadcast %cst_148 : f32 to vector<16x64xf32>
    %328 = arith.mulf %327, %326 : vector<16x64xf32>
    %329 = math.tanh %328 : vector<16x64xf32>
    %cst_149 = arith.constant 1.000000e+00 : f32
    %330 = vector.broadcast %cst_149 : f32 to vector<16x64xf32>
    %331 = arith.addf %330, %329 : vector<16x64xf32>
    %332 = arith.mulf %321, %331 : vector<16x64xf32>
    %c0_150 = arith.constant 0 : index
    %c0_151 = arith.constant 0 : index
    %333 = vector.load %arg35[%c0_150, %c0_151] : memref<64x32xbf16, #tpu.memory_space<vmem>>, vector<64x32xbf16>
    %334 = arith.truncf %332 : vector<16x64xf32> to vector<16x64xbf16>
    %cst_152 = arith.constant dense<0.000000e+00> : vector<16x32xf32>
    %335 = tpu.matmul %334, %333, %cst_152 {dimension_numbers = #tpu.dot_dimension_numbers<[1], [0], [0], [1], [0, 0, 1, 1], [], []>} : vector<16x64xbf16>, vector<64x32xbf16>, vector<16x32xf32> -> vector<16x32xf32>
    %336 = vector.shape_cast %335 : vector<16x32xf32> to vector<2x8x32xf32>
    %c0_153 = arith.constant 0 : index
    %c0_154 = arith.constant 0 : index
    %337 = vector.load %arg36[%c0_153, %c0_154] : memref<1x32xf32, #tpu.memory_space<vmem>>, vector<1x32xf32>
    %338 = vector.shape_cast %337 : vector<1x32xf32> to vector<1x1x32xf32>
    %339 = vector.broadcast %338 : vector<1x1x32xf32> to vector<2x8x32xf32>
    %340 = arith.addf %336, %339 : vector<2x8x32xf32>
    %341 = arith.addf %312, %340 : vector<2x8x32xf32>
    %c0_155 = arith.constant 0 : index
    %c0_156 = arith.constant 0 : index
    %342 = vector.load %arg37[%c0_155, %c0_156] : memref<1x32xf32, #tpu.memory_space<vmem>>, vector<1x32xf32>
    %343 = vector.shape_cast %342 : vector<1x32xf32> to vector<1x1x32xf32>
    %344 = vector.broadcast %343 : vector<1x1x32xf32> to vector<2x8x32xf32>
    %345 = arith.mulf %341, %344 : vector<2x8x32xf32>
    %c0_157 = arith.constant 0 : index
    %c0_158 = arith.constant 0 : index
    %346 = vector.load %arg38[%c0_157, %c0_158] : memref<1x32xf32, #tpu.memory_space<vmem>>, vector<1x32xf32>
    %347 = vector.shape_cast %346 : vector<1x32xf32> to vector<1x1x32xf32>
    %348 = vector.broadcast %347 : vector<1x1x32xf32> to vector<2x8x32xf32>
    %349 = arith.addf %345, %348 : vector<2x8x32xf32>
    %c0_159 = arith.constant 0 : index
    %c0_160 = arith.constant 0 : index
    %c0_161 = arith.constant 0 : index
    %350 = vector.load %arg39[%c0_159, %c0_160, %c0_161] : memref<8x32x16xbf16, #tpu.memory_space<vmem>>, vector<8x32x16xbf16>
    %cst_162 = arith.constant 0.000000e+00 : f32
    %351 = vector.broadcast %cst_162 : f32 to vector<2x16xf32>
    %352 = vector.extract_strided_slice %349 {offsets = [0, 0, 0], sizes = [2, 1, 32], strides = [1, 1, 1]} : vector<2x8x32xf32> to vector<2x1x32xf32>
    %353 = vector.shape_cast %352 : vector<2x1x32xf32> to vector<2x32xf32>
    %354 = vector.extract_strided_slice %350 {offsets = [0, 0, 0], sizes = [1, 32, 16], strides = [1, 1, 1]} : vector<8x32x16xbf16> to vector<1x32x16xbf16>
    %355 = vector.shape_cast %354 : vector<1x32x16xbf16> to vector<32x16xbf16>
    %356 = arith.truncf %353 : vector<2x32xf32> to vector<2x32xbf16>
    %cst_163 = arith.constant dense<0.000000e+00> : vector<2x16xf32>
    %357 = tpu.matmul %356, %355, %cst_163 {dimension_numbers = #tpu.dot_dimension_numbers<[1], [0], [0], [1], [0, 0, 1, 1], [], []>} : vector<2x32xbf16>, vector<32x16xbf16>, vector<2x16xf32> -> vector<2x16xf32>
    %358 = arith.addf %351, %357 : vector<2x16xf32>
    %359 = vector.extract_strided_slice %349 {offsets = [0, 1, 0], sizes = [2, 1, 32], strides = [1, 1, 1]} : vector<2x8x32xf32> to vector<2x1x32xf32>
    %360 = vector.shape_cast %359 : vector<2x1x32xf32> to vector<2x32xf32>
    %361 = vector.extract_strided_slice %350 {offsets = [1, 0, 0], sizes = [1, 32, 16], strides = [1, 1, 1]} : vector<8x32x16xbf16> to vector<1x32x16xbf16>
    %362 = vector.shape_cast %361 : vector<1x32x16xbf16> to vector<32x16xbf16>
    %363 = arith.truncf %360 : vector<2x32xf32> to vector<2x32xbf16>
    %cst_164 = arith.constant dense<0.000000e+00> : vector<2x16xf32>
    %364 = tpu.matmul %363, %362, %cst_164 {dimension_numbers = #tpu.dot_dimension_numbers<[1], [0], [0], [1], [0, 0, 1, 1], [], []>} : vector<2x32xbf16>, vector<32x16xbf16>, vector<2x16xf32> -> vector<2x16xf32>
    %365 = arith.addf %358, %364 : vector<2x16xf32>
    %366 = vector.extract_strided_slice %349 {offsets = [0, 2, 0], sizes = [2, 1, 32], strides = [1, 1, 1]} : vector<2x8x32xf32> to vector<2x1x32xf32>
    %367 = vector.shape_cast %366 : vector<2x1x32xf32> to vector<2x32xf32>
    %368 = vector.extract_strided_slice %350 {offsets = [2, 0, 0], sizes = [1, 32, 16], strides = [1, 1, 1]} : vector<8x32x16xbf16> to vector<1x32x16xbf16>
    %369 = vector.shape_cast %368 : vector<1x32x16xbf16> to vector<32x16xbf16>
    %370 = arith.truncf %367 : vector<2x32xf32> to vector<2x32xbf16>
    %cst_165 = arith.constant dense<0.000000e+00> : vector<2x16xf32>
    %371 = tpu.matmul %370, %369, %cst_165 {dimension_numbers = #tpu.dot_dimension_numbers<[1], [0], [0], [1], [0, 0, 1, 1], [], []>} : vector<2x32xbf16>, vector<32x16xbf16>, vector<2x16xf32> -> vector<2x16xf32>
    %372 = arith.addf %365, %371 : vector<2x16xf32>
    %373 = vector.extract_strided_slice %349 {offsets = [0, 3, 0], sizes = [2, 1, 32], strides = [1, 1, 1]} : vector<2x8x32xf32> to vector<2x1x32xf32>
    %374 = vector.shape_cast %373 : vector<2x1x32xf32> to vector<2x32xf32>
    %375 = vector.extract_strided_slice %350 {offsets = [3, 0, 0], sizes = [1, 32, 16], strides = [1, 1, 1]} : vector<8x32x16xbf16> to vector<1x32x16xbf16>
    %376 = vector.shape_cast %375 : vector<1x32x16xbf16> to vector<32x16xbf16>
    %377 = arith.truncf %374 : vector<2x32xf32> to vector<2x32xbf16>
    %cst_166 = arith.constant dense<0.000000e+00> : vector<2x16xf32>
    %378 = tpu.matmul %377, %376, %cst_166 {dimension_numbers = #tpu.dot_dimension_numbers<[1], [0], [0], [1], [0, 0, 1, 1], [], []>} : vector<2x32xbf16>, vector<32x16xbf16>, vector<2x16xf32> -> vector<2x16xf32>
    %379 = arith.addf %372, %378 : vector<2x16xf32>
    %380 = vector.extract_strided_slice %349 {offsets = [0, 4, 0], sizes = [2, 1, 32], strides = [1, 1, 1]} : vector<2x8x32xf32> to vector<2x1x32xf32>
    %381 = vector.shape_cast %380 : vector<2x1x32xf32> to vector<2x32xf32>
    %382 = vector.extract_strided_slice %350 {offsets = [4, 0, 0], sizes = [1, 32, 16], strides = [1, 1, 1]} : vector<8x32x16xbf16> to vector<1x32x16xbf16>
    %383 = vector.shape_cast %382 : vector<1x32x16xbf16> to vector<32x16xbf16>
    %384 = arith.truncf %381 : vector<2x32xf32> to vector<2x32xbf16>
    %cst_167 = arith.constant dense<0.000000e+00> : vector<2x16xf32>
    %385 = tpu.matmul %384, %383, %cst_167 {dimension_numbers = #tpu.dot_dimension_numbers<[1], [0], [0], [1], [0, 0, 1, 1], [], []>} : vector<2x32xbf16>, vector<32x16xbf16>, vector<2x16xf32> -> vector<2x16xf32>
    %386 = arith.addf %379, %385 : vector<2x16xf32>
    %387 = vector.extract_strided_slice %349 {offsets = [0, 5, 0], sizes = [2, 1, 32], strides = [1, 1, 1]} : vector<2x8x32xf32> to vector<2x1x32xf32>
    %388 = vector.shape_cast %387 : vector<2x1x32xf32> to vector<2x32xf32>
    %389 = vector.extract_strided_slice %350 {offsets = [5, 0, 0], sizes = [1, 32, 16], strides = [1, 1, 1]} : vector<8x32x16xbf16> to vector<1x32x16xbf16>
    %390 = vector.shape_cast %389 : vector<1x32x16xbf16> to vector<32x16xbf16>
    %391 = arith.truncf %388 : vector<2x32xf32> to vector<2x32xbf16>
    %cst_168 = arith.constant dense<0.000000e+00> : vector<2x16xf32>
    %392 = tpu.matmul %391, %390, %cst_168 {dimension_numbers = #tpu.dot_dimension_numbers<[1], [0], [0], [1], [0, 0, 1, 1], [], []>} : vector<2x32xbf16>, vector<32x16xbf16>, vector<2x16xf32> -> vector<2x16xf32>
    %393 = arith.addf %386, %392 : vector<2x16xf32>
    %394 = vector.extract_strided_slice %349 {offsets = [0, 6, 0], sizes = [2, 1, 32], strides = [1, 1, 1]} : vector<2x8x32xf32> to vector<2x1x32xf32>
    %395 = vector.shape_cast %394 : vector<2x1x32xf32> to vector<2x32xf32>
    %396 = vector.extract_strided_slice %350 {offsets = [6, 0, 0], sizes = [1, 32, 16], strides = [1, 1, 1]} : vector<8x32x16xbf16> to vector<1x32x16xbf16>
    %397 = vector.shape_cast %396 : vector<1x32x16xbf16> to vector<32x16xbf16>
    %398 = arith.truncf %395 : vector<2x32xf32> to vector<2x32xbf16>
    %cst_169 = arith.constant dense<0.000000e+00> : vector<2x16xf32>
    %399 = tpu.matmul %398, %397, %cst_169 {dimension_numbers = #tpu.dot_dimension_numbers<[1], [0], [0], [1], [0, 0, 1, 1], [], []>} : vector<2x32xbf16>, vector<32x16xbf16>, vector<2x16xf32> -> vector<2x16xf32>
    %400 = arith.addf %393, %399 : vector<2x16xf32>
    %401 = vector.extract_strided_slice %349 {offsets = [0, 7, 0], sizes = [2, 1, 32], strides = [1, 1, 1]} : vector<2x8x32xf32> to vector<2x1x32xf32>
    %402 = vector.shape_cast %401 : vector<2x1x32xf32> to vector<2x32xf32>
    %403 = vector.extract_strided_slice %350 {offsets = [7, 0, 0], sizes = [1, 32, 16], strides = [1, 1, 1]} : vector<8x32x16xbf16> to vector<1x32x16xbf16>
    %404 = vector.shape_cast %403 : vector<1x32x16xbf16> to vector<32x16xbf16>
    %405 = arith.truncf %402 : vector<2x32xf32> to vector<2x32xbf16>
    %cst_170 = arith.constant dense<0.000000e+00> : vector<2x16xf32>
    %406 = tpu.matmul %405, %404, %cst_170 {dimension_numbers = #tpu.dot_dimension_numbers<[1], [0], [0], [1], [0, 0, 1, 1], [], []>} : vector<2x32xbf16>, vector<32x16xbf16>, vector<2x16xf32> -> vector<2x16xf32>
    %407 = arith.addf %400, %406 : vector<2x16xf32>
    %c0_171 = arith.constant 0 : index
    %c0_172 = arith.constant 0 : index
    %408 = vector.load %arg40[%c0_171, %c0_172] : memref<1x16xf32, #tpu.memory_space<vmem>>, vector<1x16xf32>
    %409 = vector.broadcast %408 : vector<1x16xf32> to vector<2x16xf32>
    %410 = arith.addf %407, %409 : vector<2x16xf32>
    %c0_173 = arith.constant 0 : index
    %c0_174 = arith.constant 0 : index
    %c0_175 = arith.constant 0 : index
    %411 = vector.load %arg2[%c0_173, %c0_174, %c0_175] : memref<2x1x1xf32, #tpu.memory_space<vmem>>, vector<2x1x1xf32>
    %412 = vector.shape_cast %411 : vector<2x1x1xf32> to vector<2x1xf32>
    %413 = vector.broadcast %412 : vector<2x1xf32> to vector<2x16xf32>
    %414 = arith.mulf %410, %413 : vector<2x16xf32>
    %c0_176 = arith.constant 0 : index
    %c0_177 = arith.constant 0 : index
    %c0_178 = arith.constant 0 : index
    %415 = vector.load %arg3[%c0_176, %c0_177, %c0_178] : memref<2x1x1xf32, #tpu.memory_space<vmem>>, vector<2x1x1xf32>
    %416 = vector.shape_cast %415 : vector<2x1x1xf32> to vector<2x1xf32>
    %417 = vector.broadcast %416 : vector<2x1xf32> to vector<2x16xf32>
    %418 = arith.addf %414, %417 : vector<2x16xf32>
    %c0_179 = arith.constant 0 : index
    %c0_180 = arith.constant 0 : index
    %c0_181 = arith.constant 0 : index
    %419 = vector.load %arg41[%c0_179, %c0_180, %c0_181] : memref<2x1x16xf32, #tpu.memory_space<vmem>>, vector<2x1x16xf32>
    %420 = vector.shape_cast %419 : vector<2x1x16xf32> to vector<2x16xf32>
    %421 = vector.shape_cast %418 : vector<2x16xf32> to vector<2x1x16xf32>
    tpu.vector_store %arg41[%c0_179, %c0_180, %c0_181], %421 {strides = array<i32>} : memref<2x1x16xf32, #tpu.memory_space<vmem>>, vector<2x1x16xf32>,
    return
  }
  func.func @transform_0(%arg0: i32) -> (i32, i32, i32) {
    %c0_i32 = arith.constant 0 : i32
    %c0_i32_0 = arith.constant 0 : i32
    %c0_i32_1 = arith.constant 0 : i32
    return %arg0, %c0_i32, %c0_i32_0 : i32, i32, i32
  }
  func.func @transform_1(%arg0: i32) -> (i32, i32, i32) {
    %c0_i32 = arith.constant 0 : i32
    %c0_i32_0 = arith.constant 0 : i32
    %c0_i32_1 = arith.constant 0 : i32
    return %arg0, %c0_i32, %c0_i32_0 : i32, i32, i32
  }
  func.func @transform_2(%arg0: i32) -> (i32, i32, i32) {
    %c0_i32 = arith.constant 0 : i32
    %c0_i32_0 = arith.constant 0 : i32
    %c0_i32_1 = arith.constant 0 : i32
    return %arg0, %c0_i32, %c0_i32_0 : i32, i32, i32
  }
  func.func @transform_3(%arg0: i32) -> (i32, i32) {
    %c0_i32 = arith.constant 0 : i32
    %c0_i32_0 = arith.constant 0 : i32
    %c0_i32_1 = arith.constant 0 : i32
    return %c0_i32, %c0_i32_0 : i32, i32
  }
  func.func @transform_4(%arg0: i32) -> (i32, i32) {
    %c0_i32 = arith.constant 0 : i32
    %c0_i32_0 = arith.constant 0 : i32
    %c0_i32_1 = arith.constant 0 : i32
    return %c0_i32, %c0_i32_0 : i32, i32
  }
  func.func @transform_5(%arg0: i32) -> (i32, i32) {
    %c0_i32 = arith.constant 0 : i32
    %c0_i32_0 = arith.constant 0 : i32
    %c0_i32_1 = arith.constant 0 : i32
    return %c0_i32, %c0_i32_0 : i32, i32
  }
  func.func @transform_6(%arg0: i32) -> (i32, i32) {
    %c0_i32 = arith.constant 0 : i32
    %c0_i32_0 = arith.constant 0 : i32
    %c0_i32_1 = arith.constant 0 : i32
    return %c0_i32, %c0_i32_0 : i32, i32
  }
  func.func @transform_7(%arg0: i32) -> (i32, i32) {
    %c0_i32 = arith.constant 0 : i32
    %c0_i32_0 = arith.constant 0 : i32
    %c0_i32_1 = arith.constant 0 : i32
    return %c0_i32, %c0_i32_0 : i32, i32
  }
  func.func @transform_8(%arg0: i32) -> (i32, i32) {
    %c0_i32 = arith.constant 0 : i32
    %c0_i32_0 = arith.constant 0 : i32
    %c0_i32_1 = arith.constant 0 : i32
    return %c0_i32, %c0_i32_0 : i32, i32
  }
  func.func @transform_9(%arg0: i32) -> (i32, i32) {
    %c0_i32 = arith.constant 0 : i32
    %c0_i32_0 = arith.constant 0 : i32
    %c0_i32_1 = arith.constant 0 : i32
    return %c0_i32, %c0_i32_0 : i32, i32
  }
  func.func @transform_10(%arg0: i32) -> (i32, i32) {
    %c0_i32 = arith.constant 0 : i32
    %c0_i32_0 = arith.constant 0 : i32
    %c0_i32_1 = arith.constant 0 : i32
    return %c0_i32, %c0_i32_0 : i32, i32
  }
  func.func @transform_11(%arg0: i32) -> (i32, i32) {
    %c0_i32 = arith.constant 0 : i32
    %c0_i32_0 = arith.constant 0 : i32
    %c0_i32_1 = arith.constant 0 : i32
    return %c0_i32, %c0_i32_0 : i32, i32
  }
  func.func @transform_12(%arg0: i32) -> (i32, i32) {
    %c0_i32 = arith.constant 0 : i32
    %c0_i32_0 = arith.constant 0 : i32
    %c0_i32_1 = arith.constant 0 : i32
    return %c0_i32, %c0_i32_0 : i32, i32
  }
  func.func @transform_13(%arg0: i32) -> (i32, i32) {
    %c0_i32 = arith.constant 0 : i32
    %c0_i32_0 = arith.constant 0 : i32
    %c0_i32_1 = arith.constant 0 : i32
    return %c0_i32, %c0_i32_0 : i32, i32
  }
  func.func @transform_14(%arg0: i32) -> (i32, i32) {
    %c0_i32 = arith.constant 0 : i32
    %c0_i32_0 = arith.constant 0 : i32
    %c0_i32_1 = arith.constant 0 : i32
    return %c0_i32, %c0_i32_0 : i32, i32
  }
  func.func @transform_15(%arg0: i32) -> (i32, i32) {
    %c0_i32 = arith.constant 0 : i32
    %c0_i32_0 = arith.constant 0 : i32
    %c0_i32_1 = arith.constant 0 : i32
    return %c0_i32, %c0_i32_0 : i32, i32
  }
  func.func @transform_16(%arg0: i32) -> (i32, i32) {
    %c0_i32 = arith.constant 0 : i32
    %c0_i32_0 = arith.constant 0 : i32
    %c0_i32_1 = arith.constant 0 : i32
    return %c0_i32, %c0_i32_0 : i32, i32
  }
  func.func @transform_17(%arg0: i32) -> (i32, i32) {
    %c0_i32 = arith.constant 0 : i32
    %c0_i32_0 = arith.constant 0 : i32
    %c0_i32_1 = arith.constant 0 : i32
    return %c0_i32, %c0_i32_0 : i32, i32
  }
  func.func @transform_18(%arg0: i32) -> (i32, i32) {
    %c0_i32 = arith.constant 0 : i32
    %c0_i32_0 = arith.constant 0 : i32
    %c0_i32_1 = arith.constant 0 : i32
    return %c0_i32, %c0_i32_0 : i32, i32
  }
  func.func @transform_19(%arg0: i32) -> (i32, i32) {
    %c0_i32 = arith.constant 0 : i32
    %c0_i32_0 = arith.constant 0 : i32
    %c0_i32_1 = arith.constant 0 : i32
    return %c0_i32, %c0_i32_0 : i32, i32
  }
  func.func @transform_20(%arg0: i32) -> (i32, i32) {
    %c0_i32 = arith.constant 0 : i32
    %c0_i32_0 = arith.constant 0 : i32
    %c0_i32_1 = arith.constant 0 : i32
    return %c0_i32, %c0_i32_0 : i32, i32
  }
  func.func @transform_21(%arg0: i32) -> (i32, i32) {
    %c0_i32 = arith.constant 0 : i32
    %c0_i32_0 = arith.constant 0 : i32
    %c0_i32_1 = arith.constant 0 : i32
    return %c0_i32, %c0_i32_0 : i32, i32
  }
  func.func @transform_22(%arg0: i32) -> (i32, i32) {
    %c0_i32 = arith.constant 0 : i32
    %c0_i32_0 = arith.constant 0 : i32
    %c0_i32_1 = arith.constant 0 : i32
    return %c0_i32, %c0_i32_0 : i32, i32
  }
  func.func @transform_23(%arg0: i32) -> (i32, i32) {
    %c0_i32 = arith.constant 0 : i32
    %c0_i32_0 = arith.constant 0 : i32
    %c0_i32_1 = arith.constant 0 : i32
    return %c0_i32, %c0_i32_0 : i32, i32
  }
  func.func @transform_24(%arg0: i32) -> (i32, i32) {
    %c0_i32 = arith.constant 0 : i32
    %c0_i32_0 = arith.constant 0 : i32
    %c0_i32_1 = arith.constant 0 : i32
    return %c0_i32, %c0_i32_0 : i32, i32
  }
  func.func @transform_25(%arg0: i32) -> (i32, i32) {
    %c0_i32 = arith.constant 0 : i32
    %c0_i32_0 = arith.constant 0 : i32
    %c0_i32_1 = arith.constant 0 : i32
    return %c0_i32, %c0_i32_0 : i32, i32
  }
  func.func @transform_26(%arg0: i32) -> (i32, i32) {
    %c0_i32 = arith.constant 0 : i32
    %c0_i32_0 = arith.constant 0 : i32
    %c0_i32_1 = arith.constant 0 : i32
    return %c0_i32, %c0_i32_0 : i32, i32
  }
  func.func @transform_27(%arg0: i32) -> (i32, i32) {
    %c0_i32 = arith.constant 0 : i32
    %c0_i32_0 = arith.constant 0 : i32
    %c0_i32_1 = arith.constant 0 : i32
    return %c0_i32, %c0_i32_0 : i32, i32
  }
  func.func @transform_28(%arg0: i32) -> (i32, i32) {
    %c0_i32 = arith.constant 0 : i32
    %c0_i32_0 = arith.constant 0 : i32
    %c0_i32_1 = arith.constant 0 : i32
    return %c0_i32, %c0_i32_0 : i32, i32
  }
  func.func @transform_29(%arg0: i32) -> (i32, i32) {
    %c0_i32 = arith.constant 0 : i32
    %c0_i32_0 = arith.constant 0 : i32
    %c0_i32_1 = arith.constant 0 : i32
    return %c0_i32, %c0_i32_0 : i32, i32
  }
  func.func @transform_30(%arg0: i32) -> (i32, i32) {
    %c0_i32 = arith.constant 0 : i32
    %c0_i32_0 = arith.constant 0 : i32
    %c0_i32_1 = arith.constant 0 : i32
    return %c0_i32, %c0_i32_0 : i32, i32
  }
  func.func @transform_31(%arg0: i32) -> (i32, i32) {
    %c0_i32 = arith.constant 0 : i32
    %c0_i32_0 = arith.constant 0 : i32
    %c0_i32_1 = arith.constant 0 : i32
    return %c0_i32, %c0_i32_0 : i32, i32
  }
  func.func @transform_32(%arg0: i32) -> (i32, i32) {
    %c0_i32 = arith.constant 0 : i32
    %c0_i32_0 = arith.constant 0 : i32
    %c0_i32_1 = arith.constant 0 : i32
    return %c0_i32, %c0_i32_0 : i32, i32
  }
  func.func @transform_33(%arg0: i32) -> (i32, i32) {
    %c0_i32 = arith.constant 0 : i32
    %c0_i32_0 = arith.constant 0 : i32
    %c0_i32_1 = arith.constant 0 : i32
    return %c0_i32, %c0_i32_0 : i32, i32
  }
  func.func @transform_34(%arg0: i32) -> (i32, i32) {
    %c0_i32 = arith.constant 0 : i32
    %c0_i32_0 = arith.constant 0 : i32
    %c0_i32_1 = arith.constant 0 : i32
    return %c0_i32, %c0_i32_0 : i32, i32
  }
  func.func @transform_35(%arg0: i32) -> (i32, i32) {
    %c0_i32 = arith.constant 0 : i32
    %c0_i32_0 = arith.constant 0 : i32
    %c0_i32_1 = arith.constant 0 : i32
    return %c0_i32, %c0_i32_0 : i32, i32
  }
  func.func @transform_36(%arg0: i32) -> (i32, i32) {
    %c0_i32 = arith.constant 0 : i32
    %c0_i32_0 = arith.constant 0 : i32
    %c0_i32_1 = arith.constant 0 : i32
    return %c0_i32, %c0_i32_0 : i32, i32
  }
  func.func @transform_37(%arg0: i32) -> (i32, i32) {
    %c0_i32 = arith.constant 0 : i32
    %c0_i32_0 = arith.constant 0 : i32
    %c0_i32_1 = arith.constant 0 : i32
    return %c0_i32, %c0_i32_0 : i32, i32
  }
  func.func @transform_38(%arg0: i32) -> (i32, i32, i32) {
    %c0_i32 = arith.constant 0 : i32
    %c0_i32_0 = arith.constant 0 : i32
    %c0_i32_1 = arith.constant 0 : i32
    %c0_i32_2 = arith.constant 0 : i32
    return %c0_i32, %c0_i32_0, %c0_i32_1 : i32, i32, i32
  }
  func.func @transform_39(%arg0: i32) -> (i32, i32) {
    %c0_i32 = arith.constant 0 : i32
    %c0_i32_0 = arith.constant 0 : i32
    %c0_i32_1 = arith.constant 0 : i32
    return %c0_i32, %c0_i32_0 : i32, i32
  }
  func.func @transform_40(%arg0: i32) -> (i32, i32, i32) {
    %c0_i32 = arith.constant 0 : i32
    %c0_i32_0 = arith.constant 0 : i32
    %c0_i32_1 = arith.constant 0 : i32
    return %arg0, %c0_i32, %c0_i32_0 : i32, i32, i32
  }
}

</mosaic_0001>

<bundles_post_ra>
// kernel: _lambda_.2
= control target key start
LH: loop header
LB: loop body
LE: loop exit
PB: predicated region body
PF: predicated region fallthrough
CT: control target
= control target key end

     0   :  { %s930_s0 = inlined_call_operand.hbm [shape: f32[2,4,64], index: 0, kind: input, shape index: {}]   ;;  %s931_s1 = inlined_call_operand.vmem [shape: f32[4,1], index: 1, kind: input, shape index: {}]   ;;  %s932_s2 = inlined_call_operand.vmem [shape: f32[4,1], index: 2, kind: input, shape index: {}]   ;;  %s933_s3 = inlined_call_operand.vmem [shape: f32[2,4,72], index: 3, kind: output, shape index: {0}]   ;;  %s934_s4 = inlined_call_operand.hbm [shape: f32[2,4,1], index: 4, kind: output, shape index: {1}]   ;;  %s935_s5 = inlined_call_operand.hbm [shape: f32[2,4,1], index: 5, kind: output, shape index: {2}]  }
   0x1   :  { %937 = sst [smem:[#allocation11_spill]] %s930_s0 }
   0x2   :  { %11 = vsyncpa [#allocation3], 0 }
   0x3   :  { %13 = vsyncpa [#allocation3 + $0x1], 0 }
   0x4   :  { %14 = vsyncpa [#allocation4], 0 }
   0x5   :  { %16 = vsyncpa [#allocation4 + $0x1], 0 }
   0x6   :  { %17 = vsyncpa [#allocation7], 0 }
   0x7   :  { %19 = vsyncpa [#allocation7 + $0x1], 0  ;;  %s721_s18 = smov 0   ;;  %s723_s19 = smov 0  }
   0x8   :  { %s725_s20 = smov 0   ;;  %s727_s21 = smov 0  }
   0x9 LB: > { %s742_s22 = sadd.s32 4294967295, %s684_s21   ;;  %s479_s23 = sadd.s32 4294967294, %s684_s21   ;;  %s684_s21 = sphi %s727_s21, %s952_s21   ;;  %s680_s20 = sphi %s725_s20, %s951_s20   ;;  %s676_s19 = sphi %s723_s19, %s950_s19   ;;  %s672_s18 = sphi %s721_s18, %s949_s18  }
   0xa   : > { %s746_s24 = sadd.s32 1, %s684_s21   ;;  %s32_s25 = sadd.s32 1, %s680_s20 }
   0xb   : > { %s29_s26 = ssub.s32 %s684_s21, %s746_s24  ;;  %p39_p0 = scmp.ne.s32.totalorder %s680_s20, %s676_s19 }
   0xc   : > { %p30_p1 = scmp.eq.s32.totalorder %s29_s26, 0  ;;  %p40_p2 = scmp.eq.s32.totalorder %s684_s21, 0 }
   0xd   : > { %p45_p3 = scmp.ne.s32.totalorder %s676_s19, %s672_s18  ;;  %p46_p4 = scmp.eq.s32.totalorder %s742_s22, 0 }
   0xe   : > { %s758_s27 = scalar_select %p30_p1, %s680_s20, %s32_s25  }
   0xf   : > { %p760_p5 = por %p40_p2, %p39_p0  ;;  %p764_p6 = por %p46_p4, %p45_p3 }
  0x10   : > { %p137_p7 = scmp.eq.s32.totalorder %s742_s22, 1  ;;  %p143_p8 = scmp.eq.s32.totalorder %s479_s23, 1 }
  0x11   : > { %p512_p10 = scmp.lt.s32.totalorder %s684_s21, 2  ;;  %s195_s7 = sand.u32 1, %s680_s20  }
  0x12   : > { %p771_p11 = por %p137_p7, %p39_p0  ;;  %p775_p12 = por %p143_p8, %p45_p3 }
  0x13   : > { %s483_s8 = sshll.u32 %s684_s21, 6  ;;  %s482_s9 = sshll.u32 %s195_s7, 2 }
  0x14   : > { %s940_s30 = scalar_select %p771_p11, 1, 0 }
  0x15   : > { %s941_s6 = scalar_select %p775_p12, 1, 0 }
  0x16   : > { %s942_s0 = sld [smem:[#allocation11_spill]]  ;;  %s199_s13 = scalar_lea.vmem [#allocation2], %s482_s9 }
  0x17   : > { %s206_s14 = sshll.u32 %s199_s13, 4  ;;  %p788_p13 = pnand %p512_p10, %p760_p5  ;;  %s792_s14 = int_to_ptr.vmem [resolvable:$true] %s206_s14 }
  0x18   : > { %s196_s16 = scalar_lea.sflag [#allocation3], %s195_s7 }
  0x19   : > { %p558_p3 = pneg %p788_p13 }
  0x1c   : > { %s784_s12 = scalar_lea.hbm %s942_s0, %s483_s8  ;;  %s561_s26 = scalar_lea.hbm %s942_s0, 128 }
  0x1d   : > { %s556_s17 = scalar_lea.hbm %s784_s12, 64  ;;  %p562_p5 = scmp.lt.u32.totalorder %s784_s12, %s942_s0 }
  0x1e   : > { %p557_p2 = scmp.ne.s32.totalorder %s784_s12, %s556_s17  ;;  %p563_p8 = scmp.lt.u32.totalorder %s561_s26, %s556_s17 }
  0x1f   : > { %p565_p9 = scmp.lt.u32.totalorder %s556_s17, %s784_s12 }
  0x20   : > { %p559_p4 = pnand %p558_p3, %p557_p2  ;;  %p564_p10 = por %p563_p8, %p562_p5 }
  0x22   : > { %p560_p7 = pneg %p559_p4  ;;  %p566_p0 = por %p565_p9, %p564_p10 }
  0x24   : > { %p567_p1 = pnand %p566_p0, %p560_p7 }
  0x26   : > { %570 = shalt.err (!%p567_p1)
}
  0x27   : > { %s571_s7 = scalar_lea.vmem %s792_s14, 64  ;;  %s686_s9 = smov [#allocation2]  }
  0x28   : > { %p572_p2 = scmp.ne.s32.totalorder %s792_s14, %s571_s7  ;;  %s576_s10 = sshll.u32 %s686_s9, 4  ;;  %s577_s10 = int_to_ptr.vmem [resolvable:$false] %s576_s10 }
  0x29   : > { %s578_s11 = scalar_lea.vmem %s577_s10, 128  ;;  %p579_p11 = scmp.lt.s32.totalorder %s792_s14, %s577_s10 }
  0x2a   : > { %p574_p4 = pnand %p572_p2, %p558_p3  ;;  %p580_p5 = scmp.lt.s32.totalorder %s578_s11, %s571_s7 }
  0x2c   : > { %p575_p12 = pneg %p574_p4  ;;  %p581_p8 = por %p580_p5, %p579_p11 }
  0x2e   : > { %p582_p9 = pnand %p581_p8, %p575_p12 }
  0x30   : > { %585 = shalt.err (!%p582_p9)
}
  0x31   : > { %504 = dma.hbm_to_vmem [thread:$0]  (!%p788_p13), %s784_s12, 64, %s792_s14, %s196_s16  }
  0x32   : > { %p944_p0 = scmp.lt.s32.totalorder %s684_s21, 3  ;;  %p945_p1 = scmp.ge.s32.totalorder %s684_s21, 1 }
  0x34   : > { %p212_p3 = pnand %p945_p1, %p944_p0 }
  0x35   : > { %s826_s13 = sand.u32 (!%p212_p3), 1, %s676_s19  }
  0x36   : > { %215 = sbr.rel (%p212_p3) target bundleno = 520 (0x208), region = 32  ;;  %s829_s17 = sshll.u32 (!%p212_p3), %s826_s13, 2 }
  0x37   : > { %s218_s23 = scalar_lea.sflag (!%p212_p3), [#allocation3], %s826_s13  ;;  %s221_s15 = scalar_lea.vmem (!%p212_p3), [#allocation2], %s829_s17 }
  0x3d   : > { %659 = dma.done.wait (%p764_p6), %s218_s23, 64  }
  0x3e   : > { %661 = vsyncadd (%p764_p6), %s218_s23, 4294967232  ;;  %vm262_vm0 = vcmask 519168   ;;  %v261_v0 = vld [vmem:[%s221_s15] sm:$0xf]  ;;  %v687_v3 = vmov 0   ;;  %v688_v10 = vmov 63  }
  0x3f   : > { %v263_v1 = vsel %vm262_vm0, %v261_v0, 0.0  ;;  %v282_v2 = vld [vmem:[%s931_s1] sm:$0xf]  ;;  %548 = vset.pattern.permute.xlu1 %v687_v3  ;;  %549 = vset.pattern.permute.xlu0 %v688_v10  ;;  %vm309_vm3 = vcmask 3072   ;;  %s249_s29 = scalar_lea.vmem [#allocation5], %s829_s17  ;;  %p257_p6 = scmp.lt.s32.totalorder %s742_s22, 1 }
  0x40   : > { %264 = vadd.xlane.f32.xlu0 %v263_v1  ;;  %288 = vperm.xlu1 %548, %v282_v2   ;;  %v283_v4 = vld [vmem:[%s932_s2] sm:$0xf]  ;;  %v306_v13 = vadd.f32 1e-10, %v282_v2  ;;  %s256_s26 = scalar_lea.vmem [#allocation6], %s829_s17  ;;  %s491_s11 = sshll.u32 %s742_s22, 6 }
  0x41   : > { %s258_s28 = scalar_select %p257_p6, %s742_s22, 1 }
  0x42   : > { %s340_s23 = sshll.u32 %s249_s29, 4  ;;  %s862_s14 = scalar_lea.hbm %s934_s4, %s491_s11  ;;  %s341_s23 = int_to_ptr.vmem [resolvable:$true] %s340_s23 }
  0x43   : > { %s488_s8 = sshll.u32 %s258_s28, 2  ;;  %s319_s16 = scalar_lea.sflag [#allocation4], %s826_s13 }
  0x44   : > { %294 = vperm.xlu1 %548, %v283_v4   ;;  %s854_s10 = scalar_lea.vmem %s933_s3, %s488_s8  ;;  %s586_s25 = scalar_lea.vmem %s341_s23, 64 }
  0x45   : > { %p587_p11 = scmp.ne.s32.totalorder %s341_s23, %s586_s25  ;;  %p946_p12 = scmp.ne.s32.totalorder %s940_s30, 0 }
  0x46   : > { %s689_s28 = smov [#allocation5]  }
  0x47   : > { %p588_p13 = pnand %p587_p11, %p946_p12  ;;  %s590_s8 = sshll.u32 %s689_s28, 4  ;;  %s591_s8 = int_to_ptr.vmem [resolvable:$false] %s590_s8 }
  0x48   : > { %p593_p10 = scmp.lt.s32.totalorder %s341_s23, %s591_s8 }
  0x49   : > { %p589_p7 = pneg %p588_p13 }
  0xbf   : > { %v289_v24 = vpop.permute.xlu1 %288 }
  0xc3   : > { %v295_v28 = vpop.permute.xlu1 %294 }
  0xcd   : > { %v265_v5 = vpop.xlane.xlu0 %264 }
  0xce   : > { %v267_v6 = vmul.f32 0.015625, %v265_v5 }
  0xd0   : > { %v268_v7 = vsub.f32 %v261_v0, %v267_v6 }
  0xd2   : > { %v269_v8 = vmul.f32 %v268_v7, %v268_v7 }
  0xd4   : > { %v270_v9 = vsel %vm262_vm0, %v269_v8, 0.0 }
  0xd5   : > { %271 = vadd.xlane.f32.xlu0 %v270_v9 }
 0x162   : > { %v272_v11 = vpop.xlane.xlu0 %271 }
 0x163   : > { %v273_v12 = vmul.f32 0.015625, %v272_v11 }
 0x165   : > { %v274_v14 = vadd.f32 1e-05, %v273_v12 }
 0x167   : > { %550 = vrsqrt.f32 %v274_v14  ;;  %vm277_vm1 = vcmp.eq.f32.partialorder %v274_v14, inf  ;;  %v280_v18 = vand.u32 2147483648, %v274_v14  ;;  %vm279_vm2 = vcmp.eq.f32.partialorder %v274_v14, 0.0 }
 0x168   : > { %552 = vrcp.f32 %v306_v13 }
 0x171   : > { %v551_v15 = vpop.eup %550 }
 0x172   : > { %v276_v16 = vmul.f32 %v551_v15, %v274_v14  ;;  %v553_v17 = vpop.eup %552 }
 0x174   : > { %v278_v19 = vsel %vm277_vm1, %v274_v14, %v276_v16 }
 0x175   : > { %v281_v20 = vsel %vm279_vm2, %v280_v18, %v278_v19 }
 0x176   : > { %554 = vrcp.f32 %v281_v20  ;;  %v308_v21 = vmul.f32 %v553_v17, %v281_v20 }
 0x178   : > { %310 = vst.msk [vmem:[%s249_s29] sm:$0xf] %vm309_vm3, %v308_v21  ;;  %v311_v22 = vmul.f32 %v308_v21, %v283_v4  ;;  %s592_s29 = scalar_lea.vmem %s591_s8, 128 }
 0x179   : > { %p594_p2 = scmp.lt.s32.totalorder %s592_s29, %s586_s25 }
 0x17a   : > { %v312_v23 = vsub.f32 %v267_v6, %v311_v22 }
 0x17b   : > { %p595_p4 = por %p594_p2, %p593_p10 }
 0x17c   : > { %313 = vst.msk [vmem:[%s256_s26] sm:$0xf] %vm309_vm3, %v312_v23 }
 0x17d   : > { %p596_p5 = pnand %p595_p4, %p589_p7 }
 0x180   : > { %v555_v25 = vpop.eup %554 }
 0x181   : > { %v285_v26 = vmul.f32 %v555_v25, %v268_v7 }
 0x183   : > { %v291_v27 = vmul.f32 %v289_v24, %v285_v26 }
 0x185   : > { %v297_v29 = vadd.f32 %v295_v28, %v291_v27 }
 0x187   : > { %298 = vst.msk [vmem:[%s854_s10] sm:$0xf] %vm262_vm0, %v297_v29  ;;  %301 = vperm.xlu0 %549, %v297_v29  }
 0x188   : > { %599 = shalt.err (!%p596_p5)
}
 0x189   : > { %s600_s7 = scalar_lea.hbm %s862_s14, 64  ;;  %s604_s12 = scalar_lea.hbm %s934_s4, 128 }
 0x18a   : > { %p601_p8 = scmp.ne.s32.totalorder %s862_s14, %s600_s7  ;;  %p605_p1 = scmp.lt.u32.totalorder %s862_s14, %s934_s4 }
 0x18b   : > { %p606_p3 = scmp.lt.u32.totalorder %s604_s12, %s600_s7  ;;  %p608_p11 = scmp.lt.u32.totalorder %s600_s7, %s862_s14 }
 0x18c   : > { %p602_p9 = pnand %p601_p8, %p946_p12 }
 0x18d   : > { %p607_p6 = por %p606_p3, %p605_p1 }
 0x18e   : > { %p603_p0 = pneg %p602_p9 }
 0x18f   : > { %p609_p13 = por %p608_p11, %p607_p6 }
 0x191   : > { %p610_p7 = pnand %p609_p13, %p603_p0 }
 0x193   : > { %613 = shalt.err (!%p610_p7)
}
 0x194   : > { %497 = dma.vmem_to_hbm [thread:$0]  (%p946_p12), %s341_s23, 64, %s862_s14, %s319_s16  }
 0x195   : > { %s889_s9 = scalar_lea.hbm %s935_s5, %s491_s11  ;;  %s353_s15 = sshll.u32 %s256_s26, 4  ;;  %s354_s15 = int_to_ptr.vmem [resolvable:$true] %s353_s15 }
 0x196   : > { %s324_s7 = scalar_lea.sflag [#allocation7], %s826_s13  ;;  %s614_s12 = scalar_lea.vmem %s354_s15, 64 }
 0x197   : > { %p615_p10 = scmp.ne.s32.totalorder %s354_s15, %s614_s12  ;;  %s690_s28 = smov [#allocation6]  }
 0x198   : > { %s618_s8 = sshll.u32 %s690_s28, 4  ;;  %s619_s8 = int_to_ptr.vmem [resolvable:$false] %s618_s8 }
 0x199   : > { %p616_p2 = pnand %p615_p10, %p946_p12  ;;  %s620_s0 = scalar_lea.vmem %s619_s8, 128 }
 0x19a   : > { %p621_p5 = scmp.lt.s32.totalorder %s354_s15, %s619_s8  ;;  %p622_p8 = scmp.lt.s32.totalorder %s620_s0, %s614_s12 }
 0x19b   : > { %p617_p4 = pneg %p616_p2 }
 0x19c   : > { %p623_p9 = por %p622_p8, %p621_p5 }
 0x19e   : > { %p624_p0 = pnand %p623_p9, %p617_p4 }
 0x1a0   : > { %627 = shalt.err (!%p624_p0)
}
 0x1a1   : > { %s628_s22 = scalar_lea.hbm %s889_s9, 64  ;;  %s632_s26 = scalar_lea.hbm %s935_s5, 128 }
 0x1a2   : > { %p629_p1 = scmp.ne.s32.totalorder %s889_s9, %s628_s22  ;;  %p633_p11 = scmp.lt.u32.totalorder %s889_s9, %s935_s5 }
 0x1a3   : > { %p634_p13 = scmp.lt.u32.totalorder %s632_s26, %s628_s22  ;;  %p636_p10 = scmp.lt.u32.totalorder %s628_s22, %s889_s9 }
 0x1a4   : > { %p630_p3 = pnand %p629_p1, %p946_p12 }
 0x1a5   : > { %p635_p7 = por %p634_p13, %p633_p11 }
 0x1a6   : > { %p631_p6 = pneg %p630_p3 }
 0x1a7   : > { %p637_p2 = por %p636_p10, %p635_p7 }
 0x1a9   : > { %p638_p4 = pnand %p637_p2, %p631_p6 }
 0x1ab   : > { %641 = shalt.err (!%p638_p4)
}
 0x1ac   : > { %498 = dma.vmem_to_hbm [thread:$0]  (%p946_p12), %s354_s15, 64, %s889_s9, %s324_s7   ;;  %vm304_vm4 = vcmask 585216  }
 0x206   : > { %v302_v30 = vpop.permute.xlu0 %301 }
 0x207   : > { %305 = vst.msk [vmem:[%s854_s10] sm:$0xf] %vm304_vm4, %v302_v30 }
 0x208 PF: > { %s372_s0 = sand.u32 1, %s672_s18   ;;  %p947_p5 = scmp.ne.s32.totalorder %s941_s6, 0 }
 0x209   : > { %p948_p8 = scmp.ge.s32.totalorder %s684_s21, 2  ;;  %s373_s14 = scalar_lea.sflag [#allocation4], %s372_s0 }
 0x20b   : > { %p506_p9 = pnand %p948_p8, %p947_p5 }
 0x20d   : > { %663 = dma.done.wait (!%p506_p9), %s373_s14, 64  }
 0x20e   : > { %665 = vsyncadd (!%p506_p9), %s373_s14, 4294967232  ;;  %s382_s16 = scalar_lea.sflag [#allocation7], %s372_s0 }
 0x20f   : > { %667 = dma.done.wait (!%p506_p9), %s382_s16, 64  }
 0x210   : > { %669 = vsyncadd (!%p506_p9), %s382_s16, 4294967232  ;;  %p22_p12 = scmp.ge.s32.totalorder %s746_s24, 4   ;;  %s949_s18 = smov %s676_s19 }
 0x211   : > { %s950_s19 = smov %s680_s20  ;;  %s951_s20 = smov %s758_s27 }
 0x212   : > { %s952_s21 = smov %s746_s24  ;;  %24 = sbr.rel (!%p22_p12) target bundleno = 9 (0x9), region = 106 }
 0x219   :  { %387 = vsyncpa [#allocation3], 1 }
 0x21a   :  { %389 = vsyncpa [#allocation3 + $0x1], 1 }
 0x21b   :  { %390 = vsyncpa [#allocation4], 1 }
 0x21c   :  { %392 = vsyncpa [#allocation4 + $0x1], 1 }
 0x21d   :  { %393 = vsyncpa [#allocation7], 1 }
 0x21e   :  { %395 = vsyncpa [#allocation7 + $0x1], 1 }

// kernel: _lambda_.3
= control target key start
LH: loop header
LB: loop body
LE: loop exit
PB: predicated region body
PF: predicated region fallthrough
CT: control target
= control target key end

     0   :  { %s8248_s6 = smov 1   ;;  %s8249_s10 = smov 2   ;;  %s9962_s0 = inlined_call_operand.smem [shape: u32[41], index: -1, kind: input, shape index: {}] }
   0x1   :  { %s8354_s5 = sld [smem:[%s9962_s0]]   ;;  %s8250_s14 = smov 3  }
   0x2   :  { %s8359_s9 = sld [smem:[%s9962_s0 + %s8248_s6]]   ;;  %s8251_s18 = smov 4  }
   0x3   :  { %s8364_s13 = sld [smem:[%s9962_s0 + %s8249_s10]]   ;;  %s8252_s22 = smov 5  }
   0x4   :  { %s8369_s17 = sld [smem:[%s9962_s0 + %s8250_s14]]   ;;  %s8253_s26 = smov 6  }
   0x5   :  { %s8374_s21 = sld [smem:[%s9962_s0 + %s8251_s18]]   ;;  %s8254_s30 = smov 7  }
   0x6   :  { %s8379_s25 = sld [smem:[%s9962_s0 + %s8252_s22]]   ;;  %s8255_s4 = smov 8  }
   0x7   :  { %10036 = sst [smem:[#allocation88_spill]] %s8354_s5  ;;  %s8256_s10 = smov 9  }
   0x8   :  { %10037 = sst [smem:[#allocation89_spill]] %s8359_s9  ;;  %s8257_s15 = smov 10  }
   0x9   :  { %10038 = sst [smem:[#allocation90_spill]] %s8364_s13  ;;  %s8258_s20 = smov 11  }
   0xa   :  { %10039 = sst [smem:[#allocation91_spill]] %s8369_s17  ;;  %s8260_s1 = smov 13  }
   0xb   :  { %10040 = sst [smem:[#allocation92_spill]] %s8374_s21  ;;  %s8261_s7 = smov 14  }
   0xc   :  { %s8384_s29 = sld [smem:[%s9962_s0 + %s8253_s26]]   ;;  %s8259_s26 = smov 12  }
   0xd   :  { %s8389_s3 = sld [smem:[%s9962_s0 + %s8254_s30]]   ;;  %s8263_s22 = smov 16  }
   0xe   :  { %s8394_s8 = sld [smem:[%s9962_s0 + %s8255_s4]]   ;;  %s8264_s28 = smov 17  }
   0xf   :  { %s8399_s14 = sld [smem:[%s9962_s0 + %s8256_s10]]  }
  0x10   :  { %s8404_s19 = sld [smem:[%s9962_s0 + %s8257_s15]]   ;;  %s8262_s15 = smov 15  }
  0x11   :  { %s8409_s24 = sld [smem:[%s9962_s0 + %s8258_s20]]  }
  0x12   :  { %10041 = sst [smem:[#allocation93_spill]] %s8384_s29 }
  0x13   :  { %10042 = sst [smem:[#allocation94_spill]] %s8389_s3 }
  0x14   :  { %10043 = sst [smem:[#allocation95_spill]] %s8394_s8 }
  0x15   :  { %10044 = sst [smem:[#allocation96_spill]] %s8399_s14 }
  0x16   :  { %10045 = sst [smem:[#allocation97_spill]] %s8404_s19 }
  0x17   :  { %s8414_s30 = sld [smem:[%s9962_s0 + %s8259_s26]]  }
  0x18   :  { %s8419_s6 = sld [smem:[%s9962_s0 + %s8260_s1]]  }
  0x19   :  { %s8424_s12 = sld [smem:[%s9962_s0 + %s8261_s7]]   ;;  %s8265_s7 = smov 18  }
  0x1a   :  { %s8429_s20 = sld [smem:[%s9962_s0 + %s8262_s15]]   ;;  %s8266_s15 = smov 19  }
  0x1b   :  { %s8434_s27 = sld [smem:[%s9962_s0 + %s8263_s22]]   ;;  %s8267_s22 = smov 20  }
  0x1c   :  { %s8439_s4 = sld [smem:[%s9962_s0 + %s8264_s28]]   ;;  %s8268_s28 = smov 21  }
  0x1d   :  { %10046 = sst [smem:[#allocation98_spill]] %s8414_s30 }
  0x1e   :  { %10047 = sst [smem:[#allocation99_spill]] %s8419_s6 }
  0x1f   :  { %10048 = sst [smem:[#allocation100_spill]] %s8424_s12 }
  0x20   :  { %10049 = sst [smem:[#allocation101_spill]] %s8429_s20 }
  0x21   :  { %10050 = sst [smem:[#allocation102_spill]] %s8434_s27 }
  0x22   :  { %10051 = sst [smem:[#allocation103_spill]] %s8439_s4 }
  0x23   :  { %s8444_s5 = sld [smem:[%s9962_s0 + %s8265_s7]]   ;;  %s8269_s7 = smov 22  }
  0x24   :  { %s8449_s13 = sld [smem:[%s9962_s0 + %s8266_s15]]   ;;  %s8270_s15 = smov 23  }
  0x25   :  { %s8454_s9 = sld [smem:[%s9962_s0 + %s8267_s22]]   ;;  %s8271_s22 = smov 24  }
  0x26   :  { %s8459_s27 = sld [smem:[%s9962_s0 + %s8268_s28]]   ;;  %s8272_s28 = smov 25  }
  0x27   :  { %s8469_s12 = sld [smem:[%s9962_s0 + %s8270_s15]]   ;;  %s8274_s15 = smov 27  }
  0x28   :  { %s8479_s30 = sld [smem:[%s9962_s0 + %s8272_s28]]   ;;  %s8276_s28 = smov 29  }
  0x29   :  { %10052 = sst [smem:[#allocation104_spill]] %s8444_s5 }
  0x2a   :  { %10053 = sst [smem:[#allocation105_spill]] %s8449_s13 }
  0x2b   :  { %10054 = sst [smem:[#allocation106_spill]] %s8454_s9 }
  0x2c   :  { %s8464_s5 = sld [smem:[%s9962_s0 + %s8269_s7]]   ;;  %s8273_s7 = smov 26  }
  0x2d   :  { %10056 = sst [smem:[#allocation108_spill]] %s8469_s12 }
  0x2e   :  { %s8474_s9 = sld [smem:[%s9962_s0 + %s8271_s22]]   ;;  %s8275_s22 = smov 28  }
  0x2f   :  { %s8489_s19 = sld [smem:[%s9962_s0 + %s8274_s15]]   ;;  %s8278_s15 = smov 31  }
  0x30   :  { %s8499_s8 = sld [smem:[%s9962_s0 + %s8276_s28]]   ;;  %s8280_s28 = smov 33  }
  0x31   :  { %s8509_s29 = sld [smem:[%s9962_s0 + %s8278_s15]]   ;;  %s8282_s15 = smov 35  }
  0x32   :  { %10055 = sst [smem:[#allocation107_spill]] %s8464_s5 }
  0x33   :  { %s8484_s5 = sld [smem:[%s9962_s0 + %s8273_s7]]   ;;  %s8277_s7 = smov 30  }
  0x34   :  { %10057 = sst [smem:[#allocation109_spill]] %s8474_s9 }
  0x35   :  { %10059 = sst [smem:[#allocation111_spill]] %s8489_s19 }
  0x36   :  { %s8494_s9 = sld [smem:[%s9962_s0 + %s8275_s22]]   ;;  %s8279_s22 = smov 32  }
  0x37   :  { %10061 = sst [smem:[#allocation113_spill]] %s8499_s8 }
  0x38   :  { %10063 = sst [smem:[#allocation115_spill]] %s8509_s29 }
  0x39   :  { %10058 = sst [smem:[#allocation110_spill]] %s8484_s5 }
  0x3a   :  { %s8504_s5 = sld [smem:[%s9962_s0 + %s8277_s7]]   ;;  %s8281_s7 = smov 34  }
  0x3b   :  { %s8519_s21 = sld [smem:[%s9962_s0 + %s8280_s28]]   ;;  %s8284_s28 = smov 37  }
  0x3c   :  { %10060 = sst [smem:[#allocation112_spill]] %s8494_s9 }
  0x3d   :  { %s8514_s9 = sld [smem:[%s9962_s0 + %s8279_s22]]   ;;  %s8283_s22 = smov 36  }
  0x3e   :  { %s8529_s29 = sld [smem:[%s9962_s0 + %s8282_s15]]   ;;  %s8286_s15 = smov 39  }
  0x40   :  { %10062 = sst [smem:[#allocation114_spill]] %s8504_s5 }
  0x41   :  { %10065 = sst [smem:[#allocation117_spill]] %s8519_s21 }
  0x42   :  { %s8524_s5 = sld [smem:[%s9962_s0 + %s8281_s7]]   ;;  %s8285_s7 = smov 38  }
  0x43   :  { %10064 = sst [smem:[#allocation116_spill]] %s8514_s9 }
  0x44   :  { %10067 = sst [smem:[#allocation119_spill]] %s8529_s29 }
  0x45   :  { %s8534_s9 = sld [smem:[%s9962_s0 + %s8283_s22]]   ;;  %s8287_s22 = smov 40  }
  0x46   :  { %s8539_s21 = sld [smem:[%s9962_s0 + %s8284_s28]]  }
  0x47   :  { %s8549_s29 = sld [smem:[%s9962_s0 + %s8286_s15]]  }
  0x48   :  { %10066 = sst [smem:[#allocation118_spill]] %s8524_s5 }
  0x49   :  { %s8544_s5 = sld [smem:[%s9962_s0 + %s8285_s7]]  }
  0x4b   :  { %10068 = sst [smem:[#allocation120_spill]] %s8534_s9 }
  0x4c   :  { %s8554_s9 = sld [smem:[%s9962_s0 + %s8287_s22]]  }
  0x4f   :  { %10069 = sst [smem:[#allocation121_spill]] %s8544_s5 }
  0x52   :  { %10070 = sst [smem:[#allocation122_spill]] %s8554_s9 }
  0x53   :  { %86 = vsyncpa [#allocation4], 0 }
  0x54   :  { %88 = vsyncpa [#allocation4 + $0x1], 0 }
  0x55   :  { %89 = vsyncpa [#allocation7], 0 }
  0x56   :  { %91 = vsyncpa [#allocation7 + $0x1], 0 }
  0x57   :  { %92 = vsyncpa [#allocation10], 0 }
  0x58   :  { %93 = vsyncpa [#allocation13], 0 }
  0x59   :  { %94 = vsyncpa [#allocation16], 0 }
  0x5a   :  { %95 = vsyncpa [#allocation19], 0 }
  0x5b   :  { %96 = vsyncpa [#allocation22], 0 }
  0x5c   :  { %97 = vsyncpa [#allocation25], 0 }
  0x5d   :  { %98 = vsyncpa [#allocation28], 0 }
  0x5e   :  { %99 = vsyncpa [#allocation31], 0 }
  0x5f   :  { %100 = vsyncpa [#allocation34], 0 }
  0x60   :  { %101 = vsyncpa [#allocation37], 0 }
  0x61   :  { %102 = vsyncpa [#allocation40], 0 }
  0x62   :  { %103 = vsyncpa [#allocation43], 0 }
  0x63   :  { %104 = vsyncpa [#allocation46], 0 }
  0x64   :  { %105 = vsyncpa [#allocation49], 0 }
  0x65   :  { %106 = vsyncpa [#allocation52], 0 }
  0x66   :  { %107 = vsyncpa [#allocation55], 0 }
  0x67   :  { %108 = vsyncpa [#allocation58], 0 }
  0x68   :  { %109 = vsyncpa [#allocation61], 0 }
  0x69   :  { %110 = vsyncpa [#allocation64], 0 }
  0x6a   :  { %111 = vsyncpa [#allocation5], 0 }
  0x6b   :  { %113 = vsyncpa [#allocation5 + $0x1], 0  ;;  %s8556_s0 = smov 0   ;;  %s8558_s28 = smov 0  }
  0x6c   :  { %s8560_s1 = smov 0   ;;  %s8562_s2 = smov 0  }
  0x6d LB: > { %s10071_s20 = sld [smem:[#allocation101_spill]]  ;;  %s10072_s19 = sld [smem:[#allocation111_spill]]  ;;  %s8242_s1 = sphi %s8560_s1, %s10179_s1   ;;  %s8238_s28 = sphi %s8558_s28, %s10178_s28   ;;  %s8234_s0 = sphi %s8556_s0, %s10176_s0   ;;  %s8246_s2 = sphi %s8562_s2, %s10175_s2  }
  0x6e   : > { %s10073_s17 = sld [smem:[#allocation91_spill]]  ;;  %s10074_s5 = sld [smem:[#allocation121_spill]] }
  0x6f   : > { %s10075_s14 = sld [smem:[#allocation96_spill]]  ;;  %s10076_s13 = sld [smem:[#allocation105_spill]] }
  0x70   : > { %s10077_s12 = sld [smem:[#allocation108_spill]]  ;;  %s10078_s8 = sld [smem:[#allocation113_spill]] }
  0x71   : > { %s10079_s6 = sld [smem:[#allocation99_spill]]  ;;  %s10080_s4 = sld [smem:[#allocation103_spill]] }
  0x72   : > { %s10081_s3 = sld [smem:[#allocation94_spill]]  ;;  %10083 = sst [smem:[#allocation124_spill]] %s8238_s28 }
  0x73   : > { %10082 = sst [smem:[#allocation123_spill]] %s8234_s0  ;;  %s8577_s7 = sadd.s32 4294967295, %s8246_s2  }
  0x74   : > { %s5841_s10 = sadd.s32 4294967294, %s8246_s2   ;;  %s8581_s11 = sadd.s32 1, %s8246_s2  }
  0x75   : > { %10084 = sst [smem:[#allocation125_spill]] %s8581_s11  ;;  %s126_s15 = sadd.s32 1, %s8242_s1 }
  0x76   : > { %s123_s16 = ssub.s32 %s8246_s2, %s8581_s11  ;;  %p133_p0 = scmp.ne.s32.totalorder %s8242_s1, %s8238_s28 }
  0x77   : > { %p124_p1 = scmp.eq.s32.totalorder %s123_s16, 0  ;;  %p134_p2 = scmp.eq.s32.totalorder %s8246_s2, 0 }
  0x78   : > { %p139_p3 = scmp.ne.s32.totalorder %s8238_s28, %s8234_s0  ;;  %p10026_p4 = scmp.eq.s32.totalorder %s8577_s7, 0 }
  0x79   : > { %s8593_s18 = scalar_select %p124_p1, %s8242_s1, %s126_s15  }
  0x7a   : > { %p8595_p5 = por %p134_p2, %p133_p0  ;;  %p8601_p6 = por %p10026_p4, %p139_p3 }
  0x7b   : > { %10085 = sst [smem:[#allocation126_spill]] %s8593_s18  ;;  %p992_p7 = scmp.eq.s32.totalorder %s8577_s7, 3 }
  0x7c   : > { %s10087_s23 = scalar_select %p8601_p6, 1, 0 }
  0x7d   : > { %p998_p8 = scmp.eq.s32.totalorder %s5841_s10, 3  ;;  %p5842_p9 = scmp.ge.s32.totalorder %s8246_s2, 1 }
  0x7e   : > { %10088 = sst [smem:[#allocation127_spill]] %s10087_s23  ;;  %p1005_p10 = scmp.lt.s32.totalorder %s8246_s2, 5 }
  0x7f   : > { %p8608_p11 = por %p992_p7, %p133_p0  ;;  %p8612_p12 = por %p998_p8, %p139_p3 }
  0x80   : > { %p8616_p13 = pnand %p5842_p9, %p1005_p10 }
  0x81   : > { %s10089_s26 = scalar_select %p8608_p11, 1, 0 }
  0x82   : > { %s10091_s15 = scalar_select %p8612_p12, 1, 0 }
  0x83   : > { %10090 = sst [smem:[#allocation128_spill]] %s10089_s26  ;;  %1009 = sbr.rel (%p8616_p13) target bundleno = 1031 (0x407), region = 12 }
  0x84   : > { %10092 = sst [smem:[#allocation129_spill]] %s10091_s15  ;;  %s8288_s18 = smov (!%p8616_p13), [#allocation9]  }
  0x85   : > { %s10093_s16 = scalar_select %p8616_p13, 1, 0 }
  0x86   : > { %s1017_s10 = sshll.u32 (!%p8616_p13), %s8288_s18, 4  ;;  %s7048_s11 = scalar_lea.hbm (!%p8616_p13), %s10073_s17, 128  ;;  %s1018_s10 = int_to_ptr.vmem [resolvable:$true] %s1017_s10 }
  0x87   : > { %p7049_p0 = scmp.ne.s32.totalorder (!%p8616_p13), %s10073_s17, %s7048_s11  ;;  %p7054_p3 = scmp.lt.u32.totalorder (!%p8616_p13), %s7048_s11, %s10073_s17 }
  0x89   : > { %p7050_p1 = pnand (!%p8616_p13), %p7049_p0, %p10026_p4 }
  0x8b   : > { %p7051_p2 = pneg %p7050_p1 }
  0x8d   : > { %p7056_p7 = pnand %p7054_p3, %p7051_p2 }
  0x8f   : > { %7059 = shalt.err (!%p7056_p7)
}
  0x90   : > { %s7060_s15 = scalar_lea.vmem %s1018_s10, 128  ;;  %p7067_p12 = scmp.lt.s32.totalorder %s1018_s10, %s1018_s10 }
  0x91   : > { %p7061_p8 = scmp.ne.s32.totalorder %s1018_s10, %s7060_s15  ;;  %p7068_p11 = scmp.lt.s32.totalorder %s7060_s15, %s7060_s15 }
  0x93   : > { %p7062_p9 = pnand %p7061_p8, %p10026_p4  ;;  %p7069_p6 = por %p7068_p11, %p7067_p12 }
  0x95   : > { %p7063_p10 = pneg %p7062_p9 }
  0x97   : > { %p7070_p13 = pnand %p7069_p6, %p7063_p10 }
  0x99   : > { %7073 = shalt.err (!%p7070_p13)
}
  0x9a   : > { %s9999_s18 = smov 64   ;;  %s10001_s11 = smov 4  }
  0x9b   : > { %6558 = dma.hbm_to_vmem [thread:$0]  (%p10026_p4), %s10073_s17, 128, %s1018_s10, [#allocation10], %s9999_s18, %s9999_s18, %s10001_s11  }
  0x9c   : > { %s8291_s0 = smov [#allocation12]   ;;  %s8292_s9 = smov [#allocation15]  }
  0x9d   : > { %s1042_s26 = sshll.u32 %s8291_s0, 4  ;;  %s1066_s15 = sshll.u32 %s8292_s9, 4  ;;  %s1043_s26 = int_to_ptr.vmem [resolvable:$true] %s1042_s26  ;;  %s8635_s15 = int_to_ptr.vmem [resolvable:$true] %s1066_s15 }
  0x9e   : > { %s7074_s23 = scalar_lea.hbm %s8379_s25, 128 }
  0x9f   : > { %p7075_p6 = scmp.ne.s32.totalorder %s8379_s25, %s7074_s23  ;;  %p7080_p13 = scmp.lt.u32.totalorder %s7074_s23, %s8379_s25 }
  0xa1   : > { %p7076_p11 = pnand %p7075_p6, %p10026_p4 }
  0xa3   : > { %p7077_p12 = pneg %p7076_p11 }
  0xa5   : > { %p7082_p0 = pnand %p7080_p13, %p7077_p12 }
  0xa7   : > { %7085 = shalt.err (!%p7082_p0)
}
  0xa8   : > { %s7086_s28 = scalar_lea.vmem %s1043_s26, 128  ;;  %p7093_p7 = scmp.lt.s32.totalorder %s1043_s26, %s1043_s26 }
  0xa9   : > { %p7087_p1 = scmp.ne.s32.totalorder %s1043_s26, %s7086_s28  ;;  %p7094_p8 = scmp.lt.s32.totalorder %s7086_s28, %s7086_s28 }
  0xab   : > { %p7088_p2 = pnand %p7087_p1, %p10026_p4  ;;  %p7095_p9 = por %p7094_p8, %p7093_p7 }
  0xad   : > { %p7089_p3 = pneg %p7088_p2 }
  0xaf   : > { %p7096_p10 = pnand %p7095_p9, %p7089_p3 }
  0xb1   : > { %7099 = shalt.err (!%p7096_p10)
}
  0xb2   : > { %6562 = dma.hbm_to_vmem [thread:$0]  (%p10026_p4), %s8379_s25, 128, %s1043_s26, [#allocation13]  }
  0xb3   : > { %s7100_s9 = scalar_lea.hbm %s10081_s3, 16 }
  0xb4   : > { %p7101_p6 = scmp.ne.s32.totalorder %s10081_s3, %s7100_s9  ;;  %p7106_p13 = scmp.lt.u32.totalorder %s7100_s9, %s10081_s3 }
  0xb6   : > { %p7102_p11 = pnand %p7101_p6, %p10026_p4 }
  0xb8   : > { %p7103_p12 = pneg %p7102_p11 }
  0xba   : > { %p7108_p0 = pnand %p7106_p13, %p7103_p12 }
  0xbc   : > { %7111 = shalt.err (!%p7108_p0)
}
  0xbd   : > { %s7112_s0 = scalar_lea.vmem %s8635_s15, 16  ;;  %s7118_s28 = scalar_lea.vmem %s8635_s15, 32 }
  0xbe   : > { %p7113_p1 = scmp.ne.s32.totalorder %s8635_s15, %s7112_s0  ;;  %p7119_p7 = scmp.lt.s32.totalorder %s8635_s15, %s8635_s15 }
  0xbf   : > { %p7120_p8 = scmp.lt.s32.totalorder %s7118_s28, %s7112_s0 }
  0xc0   : > { %p7114_p2 = pnand %p7113_p1, %p10026_p4 }
  0xc1   : > { %p7121_p9 = por %p7120_p8, %p7119_p7 }
  0xc2   : > { %p7115_p3 = pneg %p7114_p2 }
  0xc4   : > { %p7122_p10 = pnand %p7121_p9, %p7115_p3 }
  0xc6   : > { %7125 = shalt.err (!%p7122_p10)
}
  0xc7   : > { %6566 = dma.hbm_to_vmem [thread:$0]  (%p10026_p4), %s10081_s3, 16, %s8635_s15, [#allocation16]  }
  0xc8   : > { %s8293_s23 = smov [#allocation18]   ;;  %s8294_s10 = smov [#allocation21]  }
  0xc9   : > { %s1090_s26 = sshll.u32 %s8293_s23, 4  ;;  %s1114_s9 = sshll.u32 %s8294_s10, 4  ;;  %s1091_s26 = int_to_ptr.vmem [resolvable:$true] %s1090_s26  ;;  %s8663_s9 = int_to_ptr.vmem [resolvable:$true] %s1114_s9 }
  0xca   : > { %s7126_s0 = scalar_lea.hbm %s10075_s14, 16 }
  0xcb   : > { %p7127_p6 = scmp.ne.s32.totalorder %s10075_s14, %s7126_s0  ;;  %p7132_p13 = scmp.lt.u32.totalorder %s7126_s0, %s10075_s14 }
  0xcd   : > { %p7128_p11 = pnand %p7127_p6, %p10026_p4 }
  0xcf   : > { %p7129_p12 = pneg %p7128_p11 }
  0xd1   : > { %p7134_p0 = pnand %p7132_p13, %p7129_p12 }
  0xd3   : > { %7137 = shalt.err (!%p7134_p0)
}
  0xd4   : > { %s7138_s28 = scalar_lea.vmem %s1091_s26, 16  ;;  %s7144_s15 = scalar_lea.vmem %s1091_s26, 32 }
  0xd5   : > { %p7139_p1 = scmp.ne.s32.totalorder %s1091_s26, %s7138_s28  ;;  %p7145_p7 = scmp.lt.s32.totalorder %s1091_s26, %s1091_s26 }
  0xd6   : > { %p7146_p8 = scmp.lt.s32.totalorder %s7144_s15, %s7138_s28 }
  0xd7   : > { %p7140_p2 = pnand %p7139_p1, %p10026_p4 }
  0xd8   : > { %p7147_p9 = por %p7146_p8, %p7145_p7 }
  0xd9   : > { %p7141_p3 = pneg %p7140_p2 }
  0xdb   : > { %p7148_p10 = pnand %p7147_p9, %p7141_p3 }
  0xdd   : > { %7151 = shalt.err (!%p7148_p10)
}
  0xde   : > { %6570 = dma.hbm_to_vmem [thread:$0]  (%p10026_p4), %s10075_s14, 16, %s1091_s26, [#allocation19]  }
  0xdf   : > { %s7152_s23 = scalar_lea.hbm %s8409_s24, 16 }
  0xe0   : > { %p7153_p6 = scmp.ne.s32.totalorder %s8409_s24, %s7152_s23  ;;  %p7158_p13 = scmp.lt.u32.totalorder %s7152_s23, %s8409_s24 }
  0xe2   : > { %p7154_p11 = pnand %p7153_p6, %p10026_p4 }
  0xe4   : > { %p7155_p12 = pneg %p7154_p11 }
  0xe6   : > { %p7160_p0 = pnand %p7158_p13, %p7155_p12 }
  0xe8   : > { %7163 = shalt.err (!%p7160_p0)
}
  0xe9   : > { %s7164_s10 = scalar_lea.vmem %s8663_s9, 16  ;;  %s7170_s0 = scalar_lea.vmem %s8663_s9, 32 }
  0xea   : > { %p7165_p1 = scmp.ne.s32.totalorder %s8663_s9, %s7164_s10  ;;  %p7171_p7 = scmp.lt.s32.totalorder %s8663_s9, %s8663_s9 }
  0xeb   : > { %p7172_p8 = scmp.lt.s32.totalorder %s7170_s0, %s7164_s10 }
  0xec   : > { %p7166_p2 = pnand %p7165_p1, %p10026_p4 }
  0xed   : > { %p7173_p9 = por %p7172_p8, %p7171_p7 }
  0xee   : > { %p7167_p3 = pneg %p7166_p2 }
  0xf0   : > { %p7174_p10 = pnand %p7173_p9, %p7167_p3 }
  0xf2   : > { %7177 = shalt.err (!%p7174_p10)
}
  0xf3   : > { %6574 = dma.hbm_to_vmem [thread:$0]  (%p10026_p4), %s8409_s24, 16, %s8663_s9, [#allocation22]  }
  0xf4   : > { %s8295_s26 = smov [#allocation24]   ;;  %s8296_s15 = smov [#allocation27]  }
  0xf5   : > { %s1138_s28 = sshll.u32 %s8295_s26, 4  ;;  %s1160_s23 = sshll.u32 %s8296_s15, 4  ;;  %s1139_s28 = int_to_ptr.vmem [resolvable:$true] %s1138_s28  ;;  %s8691_s23 = int_to_ptr.vmem [resolvable:$true] %s1160_s23 }
  0xf6   : > { %s7178_s10 = scalar_lea.hbm %s10079_s6, 16 }
  0xf7   : > { %p7179_p6 = scmp.ne.s32.totalorder %s10079_s6, %s7178_s10  ;;  %p7184_p13 = scmp.lt.u32.totalorder %s7178_s10, %s10079_s6 }
  0xf9   : > { %p7180_p11 = pnand %p7179_p6, %p10026_p4 }
  0xfb   : > { %p7181_p12 = pneg %p7180_p11 }
  0xfd   : > { %p7186_p0 = pnand %p7184_p13, %p7181_p12 }
  0xff   : > { %7189 = shalt.err (!%p7186_p0)
}
 0x100   : > { %s7190_s0 = scalar_lea.vmem %s1139_s28, 16  ;;  %s7196_s9 = scalar_lea.vmem %s1139_s28, 32 }
 0x101   : > { %p7191_p1 = scmp.ne.s32.totalorder %s1139_s28, %s7190_s0  ;;  %p7197_p7 = scmp.lt.s32.totalorder %s1139_s28, %s1139_s28 }
 0x102   : > { %p7198_p8 = scmp.lt.s32.totalorder %s7196_s9, %s7190_s0 }
 0x103   : > { %p7192_p2 = pnand %p7191_p1, %p10026_p4 }
 0x104   : > { %p7199_p9 = por %p7198_p8, %p7197_p7 }
 0x105   : > { %p7193_p3 = pneg %p7192_p2 }
 0x107   : > { %p7200_p10 = pnand %p7199_p9, %p7193_p3 }
 0x109   : > { %7203 = shalt.err (!%p7200_p10)
}
 0x10a   : > { %6578 = dma.hbm_to_vmem [thread:$0]  (%p10026_p4), %s10079_s6, 16, %s1139_s28, [#allocation25]  }
 0x10b   : > { %s7204_s26 = scalar_lea.hbm %s10071_s20, 16 }
 0x10c   : > { %p7205_p6 = scmp.ne.s32.totalorder %s10071_s20, %s7204_s26  ;;  %p7210_p13 = scmp.lt.u32.totalorder %s7204_s26, %s10071_s20 }
 0x10e   : > { %p7206_p11 = pnand %p7205_p6, %p10026_p4 }
 0x110   : > { %p7207_p12 = pneg %p7206_p11 }
 0x112   : > { %p7212_p0 = pnand %p7210_p13, %p7207_p12 }
 0x114   : > { %7215 = shalt.err (!%p7212_p0)
}
 0x115   : > { %s7216_s15 = scalar_lea.vmem %s8691_s23, 16  ;;  %s7222_s10 = scalar_lea.vmem %s8691_s23, 32 }
 0x116   : > { %p7217_p1 = scmp.ne.s32.totalorder %s8691_s23, %s7216_s15  ;;  %p7223_p7 = scmp.lt.s32.totalorder %s8691_s23, %s8691_s23 }
 0x117   : > { %p7224_p8 = scmp.lt.s32.totalorder %s7222_s10, %s7216_s15 }
 0x118   : > { %p7218_p2 = pnand %p7217_p1, %p10026_p4 }
 0x119   : > { %p7225_p9 = por %p7224_p8, %p7223_p7 }
 0x11a   : > { %p7219_p3 = pneg %p7218_p2 }
 0x11c   : > { %p7226_p10 = pnand %p7225_p9, %p7219_p3 }
 0x11e   : > { %7229 = shalt.err (!%p7226_p10)
}
 0x11f   : > { %6582 = dma.hbm_to_vmem [thread:$0]  (%p10026_p4), %s10071_s20, 16, %s8691_s23, [#allocation28]  }
 0x120   : > { %s8297_s28 = smov [#allocation30]   ;;  %s8298_s9 = smov [#allocation33]  }
 0x121   : > { %s1184_s0 = sshll.u32 %s8297_s28, 4  ;;  %s1208_s26 = sshll.u32 %s8298_s9, 4  ;;  %s1185_s0 = int_to_ptr.vmem [resolvable:$true] %s1184_s0  ;;  %s8719_s26 = int_to_ptr.vmem [resolvable:$true] %s1208_s26 }
 0x122   : > { %s7230_s15 = scalar_lea.hbm %s10080_s4, 16 }
 0x123   : > { %p7231_p6 = scmp.ne.s32.totalorder %s10080_s4, %s7230_s15  ;;  %p7236_p13 = scmp.lt.u32.totalorder %s7230_s15, %s10080_s4 }
 0x125   : > { %p7232_p11 = pnand %p7231_p6, %p10026_p4 }
 0x127   : > { %p7233_p12 = pneg %p7232_p11 }
 0x129   : > { %p7238_p0 = pnand %p7236_p13, %p7233_p12 }
 0x12b   : > { %7241 = shalt.err (!%p7238_p0)
}
 0x12c   : > { %s7242_s10 = scalar_lea.vmem %s1185_s0, 16  ;;  %s7248_s23 = scalar_lea.vmem %s1185_s0, 32 }
 0x12d   : > { %p7243_p1 = scmp.ne.s32.totalorder %s1185_s0, %s7242_s10  ;;  %p7249_p7 = scmp.lt.s32.totalorder %s1185_s0, %s1185_s0 }
 0x12e   : > { %p7250_p8 = scmp.lt.s32.totalorder %s7248_s23, %s7242_s10 }
 0x12f   : > { %p7244_p2 = pnand %p7243_p1, %p10026_p4 }
 0x130   : > { %p7251_p9 = por %p7250_p8, %p7249_p7 }
 0x131   : > { %p7245_p3 = pneg %p7244_p2 }
 0x133   : > { %p7252_p10 = pnand %p7251_p9, %p7245_p3 }
 0x135   : > { %7255 = shalt.err (!%p7252_p10)
}
 0x136   : > { %6586 = dma.hbm_to_vmem [thread:$0]  (%p10026_p4), %s10080_s4, 16, %s1185_s0, [#allocation31]  }
 0x137   : > { %s7256_s28 = scalar_lea.hbm %s10076_s13, 16 }
 0x138   : > { %p7257_p6 = scmp.ne.s32.totalorder %s10076_s13, %s7256_s28  ;;  %p7262_p13 = scmp.lt.u32.totalorder %s7256_s28, %s10076_s13 }
 0x13a   : > { %p7258_p11 = pnand %p7257_p6, %p10026_p4 }
 0x13c   : > { %p7259_p12 = pneg %p7258_p11 }
 0x13e   : > { %p7264_p0 = pnand %p7262_p13, %p7259_p12 }
 0x140   : > { %7267 = shalt.err (!%p7264_p0)
}
 0x141   : > { %s7268_s9 = scalar_lea.vmem %s8719_s26, 16  ;;  %s7274_s15 = scalar_lea.vmem %s8719_s26, 32 }
 0x142   : > { %p7269_p1 = scmp.ne.s32.totalorder %s8719_s26, %s7268_s9  ;;  %p7275_p7 = scmp.lt.s32.totalorder %s8719_s26, %s8719_s26 }
 0x143   : > { %p7276_p8 = scmp.lt.s32.totalorder %s7274_s15, %s7268_s9 }
 0x144   : > { %p7270_p2 = pnand %p7269_p1, %p10026_p4 }
 0x145   : > { %p7277_p9 = por %p7276_p8, %p7275_p7 }
 0x146   : > { %p7271_p3 = pneg %p7270_p2 }
 0x148   : > { %p7278_p10 = pnand %p7277_p9, %p7271_p3 }
 0x14a   : > { %7281 = shalt.err (!%p7278_p10)
}
 0x14b   : > { %6590 = dma.hbm_to_vmem [thread:$0]  (%p10026_p4), %s10076_s13, 16, %s8719_s26, [#allocation34]  }
 0x14c   : > { %s8299_s0 = smov [#allocation36]   ;;  %s8300_s23 = smov [#allocation39]  }
 0x14d   : > { %s1230_s10 = sshll.u32 %s8299_s0, 4  ;;  %s1254_s28 = sshll.u32 %s8300_s23, 4  ;;  %s1231_s10 = int_to_ptr.vmem [resolvable:$true] %s1230_s10  ;;  %s8747_s28 = int_to_ptr.vmem [resolvable:$true] %s1254_s28 }
 0x14e   : > { %s7282_s9 = scalar_lea.hbm %s8459_s27, 16 }
 0x14f   : > { %p7283_p6 = scmp.ne.s32.totalorder %s8459_s27, %s7282_s9  ;;  %p7288_p13 = scmp.lt.u32.totalorder %s7282_s9, %s8459_s27 }
 0x151   : > { %p7284_p11 = pnand %p7283_p6, %p10026_p4 }
 0x153   : > { %p7285_p12 = pneg %p7284_p11 }
 0x155   : > { %p7290_p0 = pnand %p7288_p13, %p7285_p12 }
 0x157   : > { %7293 = shalt.err (!%p7290_p0)
}
 0x158   : > { %s7294_s15 = scalar_lea.vmem %s1231_s10, 16  ;;  %s7300_s26 = scalar_lea.vmem %s1231_s10, 32 }
 0x159   : > { %p7295_p1 = scmp.ne.s32.totalorder %s1231_s10, %s7294_s15  ;;  %p7301_p7 = scmp.lt.s32.totalorder %s1231_s10, %s1231_s10 }
 0x15a   : > { %p7302_p8 = scmp.lt.s32.totalorder %s7300_s26, %s7294_s15 }
 0x15b   : > { %p7296_p2 = pnand %p7295_p1, %p10026_p4 }
 0x15c   : > { %p7303_p9 = por %p7302_p8, %p7301_p7 }
 0x15d   : > { %p7297_p3 = pneg %p7296_p2 }
 0x15f   : > { %p7304_p10 = pnand %p7303_p9, %p7297_p3 }
 0x161   : > { %7307 = shalt.err (!%p7304_p10)
}
 0x162   : > { %6594 = dma.hbm_to_vmem [thread:$0]  (%p10026_p4), %s8459_s27, 16, %s1231_s10, [#allocation37]  }
 0x163   : > { %s7308_s0 = scalar_lea.hbm %s10077_s12, 16 }
 0x164   : > { %p7309_p6 = scmp.ne.s32.totalorder %s10077_s12, %s7308_s0  ;;  %p7314_p13 = scmp.lt.u32.totalorder %s7308_s0, %s10077_s12 }
 0x166   : > { %p7310_p11 = pnand %p7309_p6, %p10026_p4 }
 0x168   : > { %p7311_p12 = pneg %p7310_p11 }
 0x16a   : > { %p7316_p0 = pnand %p7314_p13, %p7311_p12 }
 0x16c   : > { %7319 = shalt.err (!%p7316_p0)
}
 0x16d   : > { %s7320_s23 = scalar_lea.vmem %s8747_s28, 16  ;;  %s7326_s9 = scalar_lea.vmem %s8747_s28, 32 }
 0x16e   : > { %p7321_p1 = scmp.ne.s32.totalorder %s8747_s28, %s7320_s23  ;;  %p7327_p7 = scmp.lt.s32.totalorder %s8747_s28, %s8747_s28 }
 0x16f   : > { %p7328_p8 = scmp.lt.s32.totalorder %s7326_s9, %s7320_s23 }
 0x170   : > { %p7322_p2 = pnand %p7321_p1, %p10026_p4 }
 0x171   : > { %p7329_p9 = por %p7328_p8, %p7327_p7 }
 0x172   : > { %p7323_p3 = pneg %p7322_p2 }
 0x174   : > { %p7330_p10 = pnand %p7329_p9, %p7323_p3 }
 0x176   : > { %7333 = shalt.err (!%p7330_p10)
}
 0x177   : > { %6598 = dma.hbm_to_vmem [thread:$0]  (%p10026_p4), %s10077_s12, 16, %s8747_s28, [#allocation40]  }
 0x178   : > { %s8301_s10 = smov [#allocation42]   ;;  %s8302_s26 = smov [#allocation45]  }
 0x179   : > { %s1278_s15 = sshll.u32 %s8301_s10, 4  ;;  %s1302_s0 = sshll.u32 %s8302_s26, 4  ;;  %s1279_s15 = int_to_ptr.vmem [resolvable:$true] %s1278_s15  ;;  %s8775_s0 = int_to_ptr.vmem [resolvable:$true] %s1302_s0 }
 0x17a   : > { %s7334_s23 = scalar_lea.hbm %s8479_s30, 16 }
 0x17b   : > { %p7335_p6 = scmp.ne.s32.totalorder %s8479_s30, %s7334_s23  ;;  %p7340_p13 = scmp.lt.u32.totalorder %s7334_s23, %s8479_s30 }
 0x17d   : > { %p7336_p11 = pnand %p7335_p6, %p10026_p4 }
 0x17f   : > { %p7337_p12 = pneg %p7336_p11 }
 0x181   : > { %p7342_p0 = pnand %p7340_p13, %p7337_p12 }
 0x183   : > { %7345 = shalt.err (!%p7342_p0)
}
 0x184   : > { %s7346_s9 = scalar_lea.vmem %s1279_s15, 16  ;;  %s7352_s28 = scalar_lea.vmem %s1279_s15, 32 }
 0x185   : > { %p7347_p1 = scmp.ne.s32.totalorder %s1279_s15, %s7346_s9  ;;  %p7353_p7 = scmp.lt.s32.totalorder %s1279_s15, %s1279_s15 }
 0x186   : > { %p7354_p8 = scmp.lt.s32.totalorder %s7352_s28, %s7346_s9 }
 0x187   : > { %p7348_p2 = pnand %p7347_p1, %p10026_p4 }
 0x188   : > { %p7355_p9 = por %p7354_p8, %p7353_p7 }
 0x189   : > { %p7349_p3 = pneg %p7348_p2 }
 0x18b   : > { %p7356_p10 = pnand %p7355_p9, %p7349_p3 }
 0x18d   : > { %7359 = shalt.err (!%p7356_p10)
}
 0x18e   : > { %6602 = dma.hbm_to_vmem [thread:$0]  (%p10026_p4), %s8479_s30, 16, %s1279_s15, [#allocation43]  }
 0x18f   : > { %s7360_s10 = scalar_lea.hbm %s10072_s19, 16 }
 0x190   : > { %p7361_p6 = scmp.ne.s32.totalorder %s10072_s19, %s7360_s10  ;;  %p7366_p13 = scmp.lt.u32.totalorder %s7360_s10, %s10072_s19 }
 0x192   : > { %p7362_p11 = pnand %p7361_p6, %p10026_p4 }
 0x194   : > { %p7363_p12 = pneg %p7362_p11 }
 0x196   : > { %p7368_p0 = pnand %p7366_p13, %p7363_p12 }
 0x198   : > { %7371 = shalt.err (!%p7368_p0)
}
 0x199   : > { %s7372_s26 = scalar_lea.vmem %s8775_s0, 16  ;;  %s7378_s23 = scalar_lea.vmem %s8775_s0, 32 }
 0x19a   : > { %p7373_p1 = scmp.ne.s32.totalorder %s8775_s0, %s7372_s26  ;;  %p7379_p7 = scmp.lt.s32.totalorder %s8775_s0, %s8775_s0 }
 0x19b   : > { %p7380_p8 = scmp.lt.s32.totalorder %s7378_s23, %s7372_s26 }
 0x19c   : > { %p7374_p2 = pnand %p7373_p1, %p10026_p4 }
 0x19d   : > { %p7381_p9 = por %p7380_p8, %p7379_p7 }
 0x19e   : > { %p7375_p3 = pneg %p7374_p2 }
 0x1a0   : > { %p7382_p10 = pnand %p7381_p9, %p7375_p3 }
 0x1a2   : > { %7385 = shalt.err (!%p7382_p10)
}
 0x1a3   : > { %6606 = dma.hbm_to_vmem [thread:$0]  (%p10026_p4), %s10072_s19, 16, %s8775_s0, [#allocation46]  }
 0x1a4   : > { %s8303_s15 = smov [#allocation48]   ;;  %s8304_s28 = smov [#allocation51]  }
 0x1a5   : > { %s1326_s9 = sshll.u32 %s8303_s15, 4  ;;  %s1348_s10 = sshll.u32 %s8304_s28, 4  ;;  %s1327_s9 = int_to_ptr.vmem [resolvable:$true] %s1326_s9  ;;  %s8803_s10 = int_to_ptr.vmem [resolvable:$true] %s1348_s10 }
 0x1a6   : > { %s7386_s26 = scalar_lea.hbm %s10078_s8, 16 }
 0x1a7   : > { %p7387_p6 = scmp.ne.s32.totalorder %s10078_s8, %s7386_s26  ;;  %p7392_p13 = scmp.lt.u32.totalorder %s7386_s26, %s10078_s8 }
 0x1a9   : > { %p7388_p11 = pnand %p7387_p6, %p10026_p4 }
 0x1ab   : > { %p7389_p12 = pneg %p7388_p11 }
 0x1ad   : > { %p7394_p0 = pnand %p7392_p13, %p7389_p12 }
 0x1af   : > { %7397 = shalt.err (!%p7394_p0)
}
 0x1b0   : > { %s7398_s23 = scalar_lea.vmem %s1327_s9, 16  ;;  %s7404_s0 = scalar_lea.vmem %s1327_s9, 32 }
 0x1b1   : > { %p7399_p1 = scmp.ne.s32.totalorder %s1327_s9, %s7398_s23  ;;  %p7405_p7 = scmp.lt.s32.totalorder %s1327_s9, %s1327_s9 }
 0x1b2   : > { %p7406_p8 = scmp.lt.s32.totalorder %s7404_s0, %s7398_s23 }
 0x1b3   : > { %p7400_p2 = pnand %p7399_p1, %p10026_p4 }
 0x1b4   : > { %p7407_p9 = por %p7406_p8, %p7405_p7 }
 0x1b5   : > { %p7401_p3 = pneg %p7400_p2 }
 0x1b7   : > { %p7408_p10 = pnand %p7407_p9, %p7401_p3 }
 0x1b9   : > { %7411 = shalt.err (!%p7408_p10)
}
 0x1ba   : > { %s10094_s15 = sld [smem:[#allocation115_spill]] }
 0x1bb   : > { %6610 = dma.hbm_to_vmem [thread:$0]  (%p10026_p4), %s10078_s8, 16, %s1327_s9, [#allocation49]  }
 0x1c0   : > { %s7412_s28 = scalar_lea.hbm %s10094_s15, 16 }
 0x1c1   : > { %p7413_p6 = scmp.ne.s32.totalorder %s10094_s15, %s7412_s28  ;;  %p7418_p13 = scmp.lt.u32.totalorder %s7412_s28, %s10094_s15 }
 0x1c3   : > { %p7414_p11 = pnand %p7413_p6, %p10026_p4 }
 0x1c5   : > { %p7415_p12 = pneg %p7414_p11 }
 0x1c7   : > { %p7420_p0 = pnand %p7418_p13, %p7415_p12 }
 0x1c9   : > { %7423 = shalt.err (!%p7420_p0)
}
 0x1ca   : > { %s7424_s26 = scalar_lea.vmem %s8803_s10, 16  ;;  %s7430_s23 = scalar_lea.vmem %s8803_s10, 32 }
 0x1cb   : > { %p7425_p1 = scmp.ne.s32.totalorder %s8803_s10, %s7424_s26  ;;  %p7431_p7 = scmp.lt.s32.totalorder %s8803_s10, %s8803_s10 }
 0x1cc   : > { %p7432_p8 = scmp.lt.s32.totalorder %s7430_s23, %s7424_s26 }
 0x1cd   : > { %p7426_p2 = pnand %p7425_p1, %p10026_p4 }
 0x1ce   : > { %p7433_p9 = por %p7432_p8, %p7431_p7 }
 0x1cf   : > { %p7427_p3 = pneg %p7426_p2 }
 0x1d1   : > { %p7434_p10 = pnand %p7433_p9, %p7427_p3 }
 0x1d3   : > { %7437 = shalt.err (!%p7434_p10)
}
 0x1d4   : > { %s10095_s9 = sld [smem:[#allocation117_spill]]  ;;  %s8305_s0 = smov [#allocation54]  }
 0x1d5   : > { %6614 = dma.hbm_to_vmem [thread:$0]  (%p10026_p4), %s10094_s15, 16, %s8803_s10, [#allocation52]  }
 0x1d6   : > { %s1372_s28 = sshll.u32 %s8305_s0, 4  ;;  %s8306_s18 = smov [#allocation57]   ;;  %s1373_s28 = int_to_ptr.vmem [resolvable:$true] %s1372_s28 }
 0x1d7   : > { %s1396_s11 = sshll.u32 %s8306_s18, 4  ;;  %s8831_s11 = int_to_ptr.vmem [resolvable:$true] %s1396_s11 }
 0x1da   : > { %s7438_s26 = scalar_lea.hbm %s10095_s9, 16 }
 0x1db   : > { %p7439_p6 = scmp.ne.s32.totalorder %s10095_s9, %s7438_s26  ;;  %p7444_p13 = scmp.lt.u32.totalorder %s7438_s26, %s10095_s9 }
 0x1dd   : > { %p7440_p11 = pnand %p7439_p6, %p10026_p4 }
 0x1df   : > { %p7441_p12 = pneg %p7440_p11 }
 0x1e1   : > { %p7446_p0 = pnand %p7444_p13, %p7441_p12 }
 0x1e3   : > { %7449 = shalt.err (!%p7446_p0)
}
 0x1e4   : > { %s7450_s23 = scalar_lea.vmem %s1373_s28, 16  ;;  %s7456_s10 = scalar_lea.vmem %s1373_s28, 32 }
 0x1e5   : > { %p7451_p1 = scmp.ne.s32.totalorder %s1373_s28, %s7450_s23  ;;  %p7457_p7 = scmp.lt.s32.totalorder %s1373_s28, %s1373_s28 }
 0x1e6   : > { %p7458_p8 = scmp.lt.s32.totalorder %s7456_s10, %s7450_s23 }
 0x1e7   : > { %p7452_p2 = pnand %p7451_p1, %p10026_p4 }
 0x1e8   : > { %p7459_p9 = por %p7458_p8, %p7457_p7 }
 0x1e9   : > { %p7453_p3 = pneg %p7452_p2 }
 0x1eb   : > { %p7460_p10 = pnand %p7459_p9, %p7453_p3 }
 0x1ed   : > { %7463 = shalt.err (!%p7460_p10)
}
 0x1ee   : > { %s10096_s18 = sld [smem:[#allocation119_spill]] }
 0x1ef   : > { %6618 = dma.hbm_to_vmem [thread:$0]  (%p10026_p4), %s10095_s9, 16, %s1373_s28, [#allocation55]  }
 0x1f4   : > { %s7464_s0 = scalar_lea.hbm %s10096_s18, 16 }
 0x1f5   : > { %p7465_p6 = scmp.ne.s32.totalorder %s10096_s18, %s7464_s0  ;;  %p7470_p13 = scmp.lt.u32.totalorder %s7464_s0, %s10096_s18 }
 0x1f7   : > { %p7466_p11 = pnand %p7465_p6, %p10026_p4 }
 0x1f9   : > { %p7467_p12 = pneg %p7466_p11 }
 0x1fb   : > { %p7472_p0 = pnand %p7470_p13, %p7467_p12 }
 0x1fd   : > { %7475 = shalt.err (!%p7472_p0)
}
 0x1fe   : > { %s7476_s26 = scalar_lea.vmem %s8831_s11, 16  ;;  %s7482_s23 = scalar_lea.vmem %s8831_s11, 32 }
 0x1ff   : > { %p7477_p1 = scmp.ne.s32.totalorder %s8831_s11, %s7476_s26  ;;  %p7483_p7 = scmp.lt.s32.totalorder %s8831_s11, %s8831_s11 }
 0x200   : > { %p7484_p8 = scmp.lt.s32.totalorder %s7482_s23, %s7476_s26 }
 0x201   : > { %p7478_p2 = pnand %p7477_p1, %p10026_p4 }
 0x202   : > { %p7485_p9 = por %p7484_p8, %p7483_p7 }
 0x203   : > { %p7479_p3 = pneg %p7478_p2 }
 0x205   : > { %p7486_p10 = pnand %p7485_p9, %p7479_p3 }
 0x207   : > { %7489 = shalt.err (!%p7486_p10)
}
 0x208   : > { %6622 = dma.hbm_to_vmem [thread:$0]  (%p10026_p4), %s10096_s18, 16, %s8831_s11, [#allocation58]  }
 0x209   : > { %s8307_s28 = smov [#allocation60]   ;;  %s8308_s0 = smov [#allocation11]  }
 0x20a   : > { %s1418_s10 = sshll.u32 %s8307_s28, 4  ;;  %s1031_s3 = sshll.u32 %s8308_s0, 4  ;;  %s1419_s10 = int_to_ptr.vmem [resolvable:$true] %s1418_s10  ;;  %s8859_s3 = int_to_ptr.vmem [resolvable:$true] %s1031_s3 }
 0x20b   : > { %s7490_s26 = scalar_lea.hbm %s8539_s21, 16 }
 0x20c   : > { %p7491_p6 = scmp.ne.s32.totalorder %s8539_s21, %s7490_s26  ;;  %p7496_p13 = scmp.lt.u32.totalorder %s7490_s26, %s8539_s21 }
 0x20e   : > { %p7492_p11 = pnand %p7491_p6, %p10026_p4 }
 0x210   : > { %p7493_p12 = pneg %p7492_p11 }
 0x212   : > { %p7498_p0 = pnand %p7496_p13, %p7493_p12 }
 0x214   : > { %7501 = shalt.err (!%p7498_p0)
}
 0x215   : > { %s7502_s23 = scalar_lea.vmem %s1419_s10, 16  ;;  %s7508_s11 = scalar_lea.vmem %s1419_s10, 32 }
 0x216   : > { %p7503_p1 = scmp.ne.s32.totalorder %s1419_s10, %s7502_s23  ;;  %p7509_p7 = scmp.lt.s32.totalorder %s1419_s10, %s1419_s10 }
 0x217   : > { %p7510_p8 = scmp.lt.s32.totalorder %s7508_s11, %s7502_s23 }
 0x218   : > { %p7504_p2 = pnand %p7503_p1, %p10026_p4 }
 0x219   : > { %p7511_p9 = por %p7510_p8, %p7509_p7 }
 0x21a   : > { %p7505_p3 = pneg %p7504_p2 }
 0x21c   : > { %p7512_p10 = pnand %p7511_p9, %p7505_p3 }
 0x21e   : > { %7515 = shalt.err (!%p7512_p10)
}
 0x21f   : > { %s10097_s28 = sld [smem:[#allocation92_spill]] }
 0x220   : > { %6626 = dma.hbm_to_vmem [thread:$0]  (%p10026_p4), %s8539_s21, 16, %s1419_s10, [#allocation61]  }
 0x225   : > { %s10098_s4 = smov %s10097_s28  ;;  %s7516_s0 = scalar_lea.hbm %s10097_s28, 16 }
 0x226   : > { %p7517_p6 = scmp.ne.s32.totalorder %s10098_s4, %s7516_s0  ;;  %p7522_p13 = scmp.lt.u32.totalorder %s7516_s0, %s10098_s4 }
 0x228   : > { %p7518_p11 = pnand %p7517_p6, %p10026_p4 }
 0x22a   : > { %p7519_p12 = pneg %p7518_p11 }
 0x22c   : > { %p7524_p0 = pnand %p7522_p13, %p7519_p12 }
 0x22e   : > { %7527 = shalt.err (!%p7524_p0)
}
 0x22f   : > { %s7528_s26 = scalar_lea.vmem %s8859_s3, 16  ;;  %s7534_s23 = scalar_lea.vmem %s8859_s3, 32 }
 0x230   : > { %p7529_p1 = scmp.ne.s32.totalorder %s8859_s3, %s7528_s26  ;;  %p7535_p7 = scmp.lt.s32.totalorder %s8859_s3, %s8859_s3 }
 0x231   : > { %p7536_p8 = scmp.lt.s32.totalorder %s7534_s23, %s7528_s26 }
 0x232   : > { %p7530_p2 = pnand %p7529_p1, %p10026_p4 }
 0x233   : > { %p7537_p9 = por %p7536_p8, %p7535_p7 }
 0x234   : > { %p7531_p3 = pneg %p7530_p2 }
 0x236   : > { %p7538_p10 = pnand %p7537_p9, %p7531_p3 }
 0x238   : > { %7541 = shalt.err (!%p7538_p10)
}
 0x239   : > { %s10099_s10 = sld [smem:[#allocation93_spill]]  ;;  %s8309_s11 = smov [#allocation14]  }
 0x23a   : > { %6560 = dma.hbm_to_vmem [thread:$0]  (%p10026_p4), %s10098_s4, 16, %s8859_s3, [#allocation10]  }
 0x23b   : > { %s1052_s28 = sshll.u32 %s8309_s11, 4  ;;  %s8310_s0 = smov [#allocation17]   ;;  %s1053_s28 = int_to_ptr.vmem [resolvable:$true] %s1052_s28 }
 0x23c   : > { %s1076_s6 = sshll.u32 %s8310_s0, 4  ;;  %s8887_s6 = int_to_ptr.vmem [resolvable:$true] %s1076_s6 }
 0x23f   : > { %s7542_s26 = scalar_lea.hbm %s10099_s10, 256 }
 0x240   : > { %p7543_p6 = scmp.ne.s32.totalorder %s10099_s10, %s7542_s26  ;;  %p7548_p13 = scmp.lt.u32.totalorder %s7542_s26, %s10099_s10 }
 0x242   : > { %p7544_p11 = pnand %p7543_p6, %p10026_p4 }
 0x244   : > { %p7545_p12 = pneg %p7544_p11 }
 0x246   : > { %p7550_p0 = pnand %p7548_p13, %p7545_p12 }
 0x248   : > { %7553 = shalt.err (!%p7550_p0)
}
 0x249   : > { %s7554_s23 = scalar_lea.vmem %s1053_s28, 256  ;;  %p7561_p7 = scmp.lt.s32.totalorder %s1053_s28, %s1053_s28 }
 0x24a   : > { %p7555_p1 = scmp.ne.s32.totalorder %s1053_s28, %s7554_s23  ;;  %p7562_p8 = scmp.lt.s32.totalorder %s7554_s23, %s7554_s23 }
 0x24c   : > { %p7556_p2 = pnand %p7555_p1, %p10026_p4  ;;  %p7563_p9 = por %p7562_p8, %p7561_p7 }
 0x24e   : > { %p7557_p3 = pneg %p7556_p2 }
 0x250   : > { %p7564_p10 = pnand %p7563_p9, %p7557_p3 }
 0x252   : > { %7567 = shalt.err (!%p7564_p10)
}
 0x253   : > { %s10100_s3 = smov 4   ;;  %s10101_s11 = smov 64  }
 0x254   : > { %s10102_s0 = sld [smem:[#allocation95_spill]] }
 0x255   : > { %6564 = dma.hbm_to_vmem [thread:$0]  (%p10026_p4), %s10099_s10, 256, %s1053_s28, [#allocation13], %s10101_s11, %s10101_s11, %s10100_s3  }
 0x25a   : > { %s10103_s26 = smov %s10102_s0  ;;  %s7568_s4 = scalar_lea.hbm %s10102_s0, 256 }
 0x25b   : > { %p7569_p6 = scmp.ne.s32.totalorder %s10103_s26, %s7568_s4  ;;  %p7574_p13 = scmp.lt.u32.totalorder %s7568_s4, %s10103_s26 }
 0x25d   : > { %p7570_p11 = pnand %p7569_p6, %p10026_p4 }
 0x25f   : > { %p7571_p12 = pneg %p7570_p11 }
 0x261   : > { %p7576_p0 = pnand %p7574_p13, %p7571_p12 }
 0x263   : > { %7579 = shalt.err (!%p7576_p0)
}
 0x264   : > { %s7580_s23 = scalar_lea.vmem %s8887_s6, 256  ;;  %p7587_p7 = scmp.lt.s32.totalorder %s8887_s6, %s8887_s6 }
 0x265   : > { %p7581_p1 = scmp.ne.s32.totalorder %s8887_s6, %s7580_s23  ;;  %p7588_p8 = scmp.lt.s32.totalorder %s7580_s23, %s7580_s23 }
 0x267   : > { %p7582_p2 = pnand %p7581_p1, %p10026_p4  ;;  %p7589_p9 = por %p7588_p8, %p7587_p7 }
 0x269   : > { %p7583_p3 = pneg %p7582_p2 }
 0x26b   : > { %p7590_p10 = pnand %p7589_p9, %p7583_p3 }
 0x26d   : > { %7593 = shalt.err (!%p7590_p10)
}
 0x26e   : > { %s10104_s4 = sld [smem:[#allocation97_spill]]  ;;  %s8311_s28 = smov [#allocation20]  }
 0x26f   : > { %6568 = dma.hbm_to_vmem [thread:$0]  (%p10026_p4), %s10103_s26, 256, %s8887_s6, [#allocation16], %s10101_s11, %s10101_s11, %s10100_s3  }
 0x270   : > { %s1100_s0 = sshll.u32 %s8311_s28, 4  ;;  %s8312_s8 = smov [#allocation23]   ;;  %s1101_s0 = int_to_ptr.vmem [resolvable:$true] %s1100_s0 }
 0x271   : > { %s1124_s9 = sshll.u32 %s8312_s8, 4  ;;  %s8920_s9 = int_to_ptr.vmem [resolvable:$true] %s1124_s9 }
 0x274   : > { %s7594_s23 = scalar_lea.hbm %s10104_s4, 256 }
 0x275   : > { %p7595_p6 = scmp.ne.s32.totalorder %s10104_s4, %s7594_s23  ;;  %p7600_p13 = scmp.lt.u32.totalorder %s7594_s23, %s10104_s4 }
 0x277   : > { %p7596_p11 = pnand %p7595_p6, %p10026_p4 }
 0x279   : > { %p7597_p12 = pneg %p7596_p11 }
 0x27b   : > { %p7602_p0 = pnand %p7600_p13, %p7597_p12 }
 0x27d   : > { %7605 = shalt.err (!%p7602_p0)
}
 0x27e   : > { %s7606_s10 = scalar_lea.vmem %s1101_s0, 256  ;;  %p7613_p7 = scmp.lt.s32.totalorder %s1101_s0, %s1101_s0 }
 0x27f   : > { %p7607_p1 = scmp.ne.s32.totalorder %s1101_s0, %s7606_s10  ;;  %p7614_p8 = scmp.lt.s32.totalorder %s7606_s10, %s7606_s10 }
 0x281   : > { %p7608_p2 = pnand %p7607_p1, %p10026_p4  ;;  %p7615_p9 = por %p7614_p8, %p7613_p7 }
 0x283   : > { %p7609_p3 = pneg %p7608_p2 }
 0x285   : > { %p7616_p10 = pnand %p7615_p9, %p7609_p3 }
 0x287   : > { %7619 = shalt.err (!%p7616_p10)
}
 0x288   : > { %s10105_s8 = sld [smem:[#allocation98_spill]] }
 0x289   : > { %6572 = dma.hbm_to_vmem [thread:$0]  (%p10026_p4), %s10104_s4, 256, %s1101_s0, [#allocation19], %s10101_s11, %s10101_s11, %s10100_s3  }
 0x28e   : > { %s7620_s6 = scalar_lea.hbm %s10105_s8, 256 }
 0x28f   : > { %p7621_p6 = scmp.ne.s32.totalorder %s10105_s8, %s7620_s6  ;;  %p7626_p13 = scmp.lt.u32.totalorder %s7620_s6, %s10105_s8 }
 0x291   : > { %p7622_p11 = pnand %p7621_p6, %p10026_p4 }
 0x293   : > { %p7623_p12 = pneg %p7622_p11 }
 0x295   : > { %p7628_p0 = pnand %p7626_p13, %p7623_p12 }
 0x297   : > { %7631 = shalt.err (!%p7628_p0)
}
 0x298   : > { %s7632_s10 = scalar_lea.vmem %s8920_s9, 256  ;;  %p7639_p7 = scmp.lt.s32.totalorder %s8920_s9, %s8920_s9 }
 0x299   : > { %p7633_p1 = scmp.ne.s32.totalorder %s8920_s9, %s7632_s10  ;;  %p7640_p8 = scmp.lt.s32.totalorder %s7632_s10, %s7632_s10 }
 0x29b   : > { %p7634_p2 = pnand %p7633_p1, %p10026_p4  ;;  %p7641_p9 = por %p7640_p8, %p7639_p7 }
 0x29d   : > { %p7635_p3 = pneg %p7634_p2 }
 0x29f   : > { %p7642_p10 = pnand %p7641_p9, %p7635_p3 }
 0x2a1   : > { %7645 = shalt.err (!%p7642_p10)
}
 0x2a2   : > { %s10106_s28 = sld [smem:[#allocation100_spill]]  ;;  %s8313_s0 = smov [#allocation26]  }
 0x2a3   : > { %6576 = dma.hbm_to_vmem [thread:$0]  (%p10026_p4), %s10105_s8, 256, %s8920_s9, [#allocation22], %s10101_s11, %s10101_s11, %s10100_s3  }
 0x2a4   : > { %s1149_s6 = sshll.u32 %s8313_s0, 4  ;;  %s8314_s4 = smov [#allocation29]   ;;  %s1150_s6 = int_to_ptr.vmem [resolvable:$true] %s1149_s6 }
 0x2a5   : > { %s1170_s12 = sshll.u32 %s8314_s4, 4  ;;  %s8953_s12 = int_to_ptr.vmem [resolvable:$true] %s1170_s12 }
 0x2a8   : > { %s10107_s23 = smov %s10106_s28  ;;  %s7646_s10 = scalar_lea.hbm %s10106_s28, 16 }
 0x2a9   : > { %p7647_p6 = scmp.ne.s32.totalorder %s10107_s23, %s7646_s10  ;;  %p7652_p13 = scmp.lt.u32.totalorder %s7646_s10, %s10107_s23 }
 0x2ab   : > { %p7648_p11 = pnand %p7647_p6, %p10026_p4 }
 0x2ad   : > { %p7649_p12 = pneg %p7648_p11 }
 0x2af   : > { %p7654_p0 = pnand %p7652_p13, %p7649_p12 }
 0x2b1   : > { %7657 = shalt.err (!%p7654_p0)
}
 0x2b2   : > { %s7658_s13 = scalar_lea.vmem %s1150_s6, 16  ;;  %s7664_s9 = scalar_lea.vmem %s1150_s6, 32 }
 0x2b3   : > { %p7659_p1 = scmp.ne.s32.totalorder %s1150_s6, %s7658_s13  ;;  %p7665_p7 = scmp.lt.s32.totalorder %s1150_s6, %s1150_s6 }
 0x2b4   : > { %p7666_p8 = scmp.lt.s32.totalorder %s7664_s9, %s7658_s13 }
 0x2b5   : > { %p7660_p2 = pnand %p7659_p1, %p10026_p4 }
 0x2b6   : > { %p7667_p9 = por %p7666_p8, %p7665_p7 }
 0x2b7   : > { %p7661_p3 = pneg %p7660_p2 }
 0x2b9   : > { %p7668_p10 = pnand %p7667_p9, %p7661_p3 }
 0x2bb   : > { %7671 = shalt.err (!%p7668_p10)
}
 0x2bc   : > { %s10108_s4 = sld [smem:[#allocation102_spill]] }
 0x2bd   : > { %6580 = dma.hbm_to_vmem [thread:$0]  (%p10026_p4), %s10107_s23, 16, %s1150_s6, [#allocation25]  }
 0x2c2   : > { %s7672_s28 = scalar_lea.hbm %s10108_s4, 256 }
 0x2c3   : > { %p7673_p6 = scmp.ne.s32.totalorder %s10108_s4, %s7672_s28  ;;  %p7678_p13 = scmp.lt.u32.totalorder %s7672_s28, %s10108_s4 }
 0x2c5   : > { %p7674_p11 = pnand %p7673_p6, %p10026_p4 }
 0x2c7   : > { %p7675_p12 = pneg %p7674_p11 }
 0x2c9   : > { %p7680_p0 = pnand %p7678_p13, %p7675_p12 }
 0x2cb   : > { %7683 = shalt.err (!%p7680_p0)
}
 0x2cc   : > { %s7684_s13 = scalar_lea.vmem %s8953_s12, 256  ;;  %p7691_p7 = scmp.lt.s32.totalorder %s8953_s12, %s8953_s12 }
 0x2cd   : > { %p7685_p1 = scmp.ne.s32.totalorder %s8953_s12, %s7684_s13  ;;  %p7692_p8 = scmp.lt.s32.totalorder %s7684_s13, %s7684_s13 }
 0x2cf   : > { %p7686_p2 = pnand %p7685_p1, %p10026_p4  ;;  %p7693_p9 = por %p7692_p8, %p7691_p7 }
 0x2d1   : > { %p7687_p3 = pneg %p7686_p2 }
 0x2d3   : > { %p7694_p10 = pnand %p7693_p9, %p7687_p3 }
 0x2d5   : > { %7697 = shalt.err (!%p7694_p10)
}
 0x2d6   : > { %s10109_s0 = sld [smem:[#allocation104_spill]]  ;;  %s8315_s10 = smov [#allocation32]  }
 0x2d7   : > { %6584 = dma.hbm_to_vmem [thread:$0]  (%p10026_p4), %s10108_s4, 256, %s8953_s12, [#allocation28], %s10101_s11, %s10101_s11, %s10100_s3  }
 0x2d8   : > { %s1194_s9 = sshll.u32 %s8315_s10, 4  ;;  %s8316_s28 = smov [#allocation35]   ;;  %s1195_s9 = int_to_ptr.vmem [resolvable:$true] %s1194_s9 }
 0x2d9   : > { %s1219_s8 = sshll.u32 %s8316_s28, 4  ;;  %s8983_s8 = int_to_ptr.vmem [resolvable:$true] %s1219_s8 }
 0x2dc   : > { %s10110_s6 = smov %s10109_s0  ;;  %s7698_s13 = scalar_lea.hbm %s10109_s0, 512 }
 0x2dd   : > { %p7699_p6 = scmp.ne.s32.totalorder %s10110_s6, %s7698_s13  ;;  %p7704_p13 = scmp.lt.u32.totalorder %s7698_s13, %s10110_s6 }
 0x2df   : > { %p7700_p11 = pnand %p7699_p6, %p10026_p4 }
 0x2e1   : > { %p7701_p12 = pneg %p7700_p11 }
 0x2e3   : > { %p7706_p0 = pnand %p7704_p13, %p7701_p12 }
 0x2e5   : > { %7709 = shalt.err (!%p7706_p0)
}
 0x2e6   : > { %s7710_s14 = scalar_lea.vmem %s1195_s9, 512  ;;  %p7717_p7 = scmp.lt.s32.totalorder %s1195_s9, %s1195_s9 }
 0x2e7   : > { %p7711_p1 = scmp.ne.s32.totalorder %s1195_s9, %s7710_s14  ;;  %p7718_p8 = scmp.lt.s32.totalorder %s7710_s14, %s7710_s14 }
 0x2e9   : > { %p7712_p2 = pnand %p7711_p1, %p10026_p4  ;;  %p7719_p9 = por %p7718_p8, %p7717_p7 }
 0x2eb   : > { %p7713_p3 = pneg %p7712_p2 }
 0x2ed   : > { %p7720_p10 = pnand %p7719_p9, %p7713_p3 }
 0x2ef   : > { %7723 = shalt.err (!%p7720_p10)
}
 0x2f0   : > { %s10111_s12 = sld [smem:[#allocation106_spill]] }
 0x2f1   : > { %6588 = dma.hbm_to_vmem [thread:$0]  (%p10026_p4), %s10110_s6, 512, %s1195_s9, [#allocation31], %s10101_s11, %s10101_s11, %s10100_s3  }
 0x2f6   : > { %s7724_s0 = scalar_lea.hbm %s10111_s12, 16 }
 0x2f7   : > { %p7725_p6 = scmp.ne.s32.totalorder %s10111_s12, %s7724_s0  ;;  %p7730_p13 = scmp.lt.u32.totalorder %s7724_s0, %s10111_s12 }
 0x2f9   : > { %p7726_p11 = pnand %p7725_p6, %p10026_p4 }
 0x2fb   : > { %p7727_p12 = pneg %p7726_p11 }
 0x2fd   : > { %p7732_p0 = pnand %p7730_p13, %p7727_p12 }
 0x2ff   : > { %7735 = shalt.err (!%p7732_p0)
}
 0x300   : > { %s7736_s14 = scalar_lea.vmem %s8983_s8, 16  ;;  %s7742_s10 = scalar_lea.vmem %s8983_s8, 32 }
 0x301   : > { %p7737_p1 = scmp.ne.s32.totalorder %s8983_s8, %s7736_s14  ;;  %p7743_p7 = scmp.lt.s32.totalorder %s8983_s8, %s8983_s8 }
 0x302   : > { %p7744_p8 = scmp.lt.s32.totalorder %s7742_s10, %s7736_s14 }
 0x303   : > { %p7738_p2 = pnand %p7737_p1, %p10026_p4 }
 0x304   : > { %p7745_p9 = por %p7744_p8, %p7743_p7 }
 0x305   : > { %p7739_p3 = pneg %p7738_p2 }
 0x307   : > { %p7746_p10 = pnand %p7745_p9, %p7739_p3 }
 0x309   : > { %7749 = shalt.err (!%p7746_p10)
}
 0x30a   : > { %s10112_s9 = sld [smem:[#allocation107_spill]]  ;;  %s8317_s28 = smov [#allocation38]  }
 0x30b   : > { %6592 = dma.hbm_to_vmem [thread:$0]  (%p10026_p4), %s10111_s12, 16, %s8983_s8, [#allocation34]  }
 0x30c   : > { %s1240_s13 = sshll.u32 %s8317_s28, 4  ;;  %s8318_s0 = smov [#allocation41]   ;;  %s1241_s13 = int_to_ptr.vmem [resolvable:$true] %s1240_s13 }
 0x30d   : > { %s1264_s4 = sshll.u32 %s8318_s0, 4  ;;  %s9014_s4 = int_to_ptr.vmem [resolvable:$true] %s1264_s4 }
 0x310   : > { %s7750_s14 = scalar_lea.hbm %s10112_s9, 256 }
 0x311   : > { %p7751_p6 = scmp.ne.s32.totalorder %s10112_s9, %s7750_s14  ;;  %p7756_p13 = scmp.lt.u32.totalorder %s7750_s14, %s10112_s9 }
 0x313   : > { %p7752_p11 = pnand %p7751_p6, %p10026_p4 }
 0x315   : > { %p7753_p12 = pneg %p7752_p11 }
 0x317   : > { %p7758_p0 = pnand %p7756_p13, %p7753_p12 }
 0x319   : > { %7761 = shalt.err (!%p7758_p0)
}
 0x31a   : > { %s7762_s10 = scalar_lea.vmem %s1241_s13, 256  ;;  %p7769_p7 = scmp.lt.s32.totalorder %s1241_s13, %s1241_s13 }
 0x31b   : > { %p7763_p1 = scmp.ne.s32.totalorder %s1241_s13, %s7762_s10  ;;  %p7770_p8 = scmp.lt.s32.totalorder %s7762_s10, %s7762_s10 }
 0x31d   : > { %p7764_p2 = pnand %p7763_p1, %p10026_p4  ;;  %p7771_p9 = por %p7770_p8, %p7769_p7 }
 0x31f   : > { %p7765_p3 = pneg %p7764_p2 }
 0x321   : > { %p7772_p10 = pnand %p7771_p9, %p7765_p3 }
 0x323   : > { %7775 = shalt.err (!%p7772_p10)
}
 0x324   : > { %s10113_s8 = sld [smem:[#allocation109_spill]] }
 0x325   : > { %6596 = dma.hbm_to_vmem [thread:$0]  (%p10026_p4), %s10112_s9, 256, %s1241_s13, [#allocation37], %s10101_s11, %s10101_s11, %s10100_s3  }
 0x32a   : > { %s7776_s28 = scalar_lea.hbm %s10113_s8, 256 }
 0x32b   : > { %p7777_p6 = scmp.ne.s32.totalorder %s10113_s8, %s7776_s28  ;;  %p7782_p13 = scmp.lt.u32.totalorder %s7776_s28, %s10113_s8 }
 0x32d   : > { %p7778_p11 = pnand %p7777_p6, %p10026_p4 }
 0x32f   : > { %p7779_p12 = pneg %p7778_p11 }
 0x331   : > { %p7784_p0 = pnand %p7782_p13, %p7779_p12 }
 0x333   : > { %7787 = shalt.err (!%p7784_p0)
}
 0x334   : > { %s7788_s0 = scalar_lea.vmem %s9014_s4, 256  ;;  %p7795_p7 = scmp.lt.s32.totalorder %s9014_s4, %s9014_s4 }
 0x335   : > { %p7789_p1 = scmp.ne.s32.totalorder %s9014_s4, %s7788_s0  ;;  %p7796_p8 = scmp.lt.s32.totalorder %s7788_s0, %s7788_s0 }
 0x337   : > { %p7790_p2 = pnand %p7789_p1, %p10026_p4  ;;  %p7797_p9 = por %p7796_p8, %p7795_p7 }
 0x339   : > { %p7791_p3 = pneg %p7790_p2 }
 0x33b   : > { %p7798_p10 = pnand %p7797_p9, %p7791_p3 }
 0x33d   : > { %7801 = shalt.err (!%p7798_p10)
}
 0x33e   : > { %s10114_s13 = sld [smem:[#allocation110_spill]]  ;;  %s8319_s14 = smov [#allocation44]  }
 0x33f   : > { %6600 = dma.hbm_to_vmem [thread:$0]  (%p10026_p4), %s10113_s8, 256, %s9014_s4, [#allocation40], %s10101_s11, %s10101_s11, %s10100_s3  }
 0x340   : > { %s1288_s10 = sshll.u32 %s8319_s14, 4  ;;  %s8320_s28 = smov [#allocation47]   ;;  %s1289_s10 = int_to_ptr.vmem [resolvable:$true] %s1288_s10 }
 0x341   : > { %s1312_s6 = sshll.u32 %s8320_s28, 4  ;;  %s9047_s6 = int_to_ptr.vmem [resolvable:$true] %s1312_s6 }
 0x344   : > { %s7802_s0 = scalar_lea.hbm %s10114_s13, 256 }
 0x345   : > { %p7803_p6 = scmp.ne.s32.totalorder %s10114_s13, %s7802_s0  ;;  %p7808_p13 = scmp.lt.u32.totalorder %s7802_s0, %s10114_s13 }
 0x347   : > { %p7804_p11 = pnand %p7803_p6, %p10026_p4 }
 0x349   : > { %p7805_p12 = pneg %p7804_p11 }
 0x34b   : > { %p7810_p0 = pnand %p7808_p13, %p7805_p12 }
 0x34d   : > { %7813 = shalt.err (!%p7810_p0)
}
 0x34e   : > { %s7814_s9 = scalar_lea.vmem %s1289_s10, 256  ;;  %p7821_p7 = scmp.lt.s32.totalorder %s1289_s10, %s1289_s10 }
 0x34f   : > { %p7815_p1 = scmp.ne.s32.totalorder %s1289_s10, %s7814_s9  ;;  %p7822_p8 = scmp.lt.s32.totalorder %s7814_s9, %s7814_s9 }
 0x351   : > { %p7816_p2 = pnand %p7815_p1, %p10026_p4  ;;  %p7823_p9 = por %p7822_p8, %p7821_p7 }
 0x353   : > { %p7817_p3 = pneg %p7816_p2 }
 0x355   : > { %p7824_p10 = pnand %p7823_p9, %p7817_p3 }
 0x357   : > { %7827 = shalt.err (!%p7824_p10)
}
 0x358   : > { %s10115_s4 = sld [smem:[#allocation112_spill]] }
 0x359   : > { %6604 = dma.hbm_to_vmem [thread:$0]  (%p10026_p4), %s10114_s13, 256, %s1289_s10, [#allocation43], %s10101_s11, %s10101_s11, %s10100_s3  }
 0x35e   : > { %s7828_s14 = scalar_lea.hbm %s10115_s4, 256 }
 0x35f   : > { %p7829_p6 = scmp.ne.s32.totalorder %s10115_s4, %s7828_s14  ;;  %p7834_p13 = scmp.lt.u32.totalorder %s7828_s14, %s10115_s4 }
 0x361   : > { %p7830_p11 = pnand %p7829_p6, %p10026_p4 }
 0x363   : > { %p7831_p12 = pneg %p7830_p11 }
 0x365   : > { %p7836_p0 = pnand %p7834_p13, %p7831_p12 }
 0x367   : > { %7839 = shalt.err (!%p7836_p0)
}
 0x368   : > { %s7840_s9 = scalar_lea.vmem %s9047_s6, 256  ;;  %p7847_p7 = scmp.lt.s32.totalorder %s9047_s6, %s9047_s6 }
 0x369   : > { %p7841_p1 = scmp.ne.s32.totalorder %s9047_s6, %s7840_s9  ;;  %p7848_p8 = scmp.lt.s32.totalorder %s7840_s9, %s7840_s9 }
 0x36b   : > { %p7842_p2 = pnand %p7841_p1, %p10026_p4  ;;  %p7849_p9 = por %p7848_p8, %p7847_p7 }
 0x36d   : > { %p7843_p3 = pneg %p7842_p2 }
 0x36f   : > { %p7850_p10 = pnand %p7849_p9, %p7843_p3 }
 0x371   : > { %7853 = shalt.err (!%p7850_p10)
}
 0x372   : > { %s10116_s10 = sld [smem:[#allocation114_spill]]  ;;  %s8321_s28 = smov [#allocation50]  }
 0x373   : > { %6608 = dma.hbm_to_vmem [thread:$0]  (%p10026_p4), %s10115_s4, 256, %s9047_s6, [#allocation46], %s10101_s11, %s10101_s11, %s10100_s3  }
 0x374   : > { %s1337_s0 = sshll.u32 %s8321_s28, 4  ;;  %s8322_s14 = smov [#allocation53]   ;;  %s1338_s0 = int_to_ptr.vmem [resolvable:$true] %s1337_s0 }
 0x375   : > { %s1358_s8 = sshll.u32 %s8322_s14, 4  ;;  %s9080_s8 = int_to_ptr.vmem [resolvable:$true] %s1358_s8 }
 0x378   : > { %s7854_s9 = scalar_lea.hbm %s10116_s10, 16 }
 0x379   : > { %p7855_p6 = scmp.ne.s32.totalorder %s10116_s10, %s7854_s9  ;;  %p7860_p13 = scmp.lt.u32.totalorder %s7854_s9, %s10116_s10 }
 0x37b   : > { %p7856_p11 = pnand %p7855_p6, %p10026_p4 }
 0x37d   : > { %p7857_p12 = pneg %p7856_p11 }
 0x37f   : > { %p7862_p0 = pnand %p7860_p13, %p7857_p12 }
 0x381   : > { %7865 = shalt.err (!%p7862_p0)
}
 0x382   : > { %s7866_s12 = scalar_lea.vmem %s1338_s0, 16  ;;  %s7872_s6 = scalar_lea.vmem %s1338_s0, 32 }
 0x383   : > { %p7867_p1 = scmp.ne.s32.totalorder %s1338_s0, %s7866_s12  ;;  %p7873_p7 = scmp.lt.s32.totalorder %s1338_s0, %s1338_s0 }
 0x384   : > { %p7874_p8 = scmp.lt.s32.totalorder %s7872_s6, %s7866_s12 }
 0x385   : > { %p7868_p2 = pnand %p7867_p1, %p10026_p4 }
 0x386   : > { %p7875_p9 = por %p7874_p8, %p7873_p7 }
 0x387   : > { %p7869_p3 = pneg %p7868_p2 }
 0x389   : > { %p7876_p10 = pnand %p7875_p9, %p7869_p3 }
 0x38b   : > { %7879 = shalt.err (!%p7876_p10)
}
 0x38c   : > { %s10117_s28 = sld [smem:[#allocation116_spill]] }
 0x38d   : > { %6612 = dma.hbm_to_vmem [thread:$0]  (%p10026_p4), %s10116_s10, 16, %s1338_s0, [#allocation49]  }
 0x392   : > { %s10118_s14 = smov %s10117_s28  ;;  %s7880_s9 = scalar_lea.hbm %s10117_s28, 256 }
 0x393   : > { %p7881_p6 = scmp.ne.s32.totalorder %s10118_s14, %s7880_s9  ;;  %p7886_p13 = scmp.lt.u32.totalorder %s7880_s9, %s10118_s14 }
 0x395   : > { %p7882_p11 = pnand %p7881_p6, %p10026_p4 }
 0x397   : > { %p7883_p12 = pneg %p7882_p11 }
 0x399   : > { %p7888_p0 = pnand %p7886_p13, %p7883_p12 }
 0x39b   : > { %7891 = shalt.err (!%p7888_p0)
}
 0x39c   : > { %s7892_s12 = scalar_lea.vmem %s9080_s8, 256  ;;  %p7899_p7 = scmp.lt.s32.totalorder %s9080_s8, %s9080_s8 }
 0x39d   : > { %p7893_p1 = scmp.ne.s32.totalorder %s9080_s8, %s7892_s12  ;;  %p7900_p8 = scmp.lt.s32.totalorder %s7892_s12, %s7892_s12 }
 0x39f   : > { %p7894_p2 = pnand %p7893_p1, %p10026_p4  ;;  %p7901_p9 = por %p7900_p8, %p7899_p7 }
 0x3a1   : > { %p7895_p3 = pneg %p7894_p2 }
 0x3a3   : > { %p7902_p10 = pnand %p7901_p9, %p7895_p3 }
 0x3a5   : > { %7905 = shalt.err (!%p7902_p10)
}
 0x3a6   : > { %s10119_s0 = sld [smem:[#allocation118_spill]]  ;;  %s8323_s28 = smov [#allocation56]  }
 0x3a7   : > { %6616 = dma.hbm_to_vmem [thread:$0]  (%p10026_p4), %s10118_s14, 256, %s9080_s8, [#allocation52], %s10101_s11, %s10101_s11, %s10100_s3  }
 0x3a8   : > { %s1382_s9 = sshll.u32 %s8323_s28, 4  ;;  %s8324_s4 = smov [#allocation59]   ;;  %s1383_s9 = int_to_ptr.vmem [resolvable:$true] %s1382_s9 }
 0x3a9   : > { %s1407_s10 = sshll.u32 %s8324_s4, 4  ;;  %s9110_s10 = int_to_ptr.vmem [resolvable:$true] %s1407_s10 }
 0x3ac   : > { %s10120_s6 = smov %s10119_s0  ;;  %s7906_s12 = scalar_lea.hbm %s10119_s0, 512 }
 0x3ad   : > { %p7907_p6 = scmp.ne.s32.totalorder %s10120_s6, %s7906_s12  ;;  %p7912_p13 = scmp.lt.u32.totalorder %s7906_s12, %s10120_s6 }
 0x3af   : > { %p7908_p11 = pnand %p7907_p6, %p10026_p4 }
 0x3b1   : > { %p7909_p12 = pneg %p7908_p11 }
 0x3b3   : > { %p7914_p0 = pnand %p7912_p13, %p7909_p12 }
 0x3b5   : > { %7917 = shalt.err (!%p7914_p0)
}
 0x3b6   : > { %s7918_s13 = scalar_lea.vmem %s1383_s9, 512  ;;  %p7925_p7 = scmp.lt.s32.totalorder %s1383_s9, %s1383_s9 }
 0x3b7   : > { %p7919_p1 = scmp.ne.s32.totalorder %s1383_s9, %s7918_s13  ;;  %p7926_p8 = scmp.lt.s32.totalorder %s7918_s13, %s7918_s13 }
 0x3b9   : > { %p7920_p2 = pnand %p7919_p1, %p10026_p4  ;;  %p7927_p9 = por %p7926_p8, %p7925_p7 }
 0x3bb   : > { %p7921_p3 = pneg %p7920_p2 }
 0x3bd   : > { %p7928_p10 = pnand %p7927_p9, %p7921_p3 }
 0x3bf   : > { %7931 = shalt.err (!%p7928_p10)
}
 0x3c0   : > { %s10121_s8 = sld [smem:[#allocation120_spill]] }
 0x3c1   : > { %6620 = dma.hbm_to_vmem [thread:$0]  (%p10026_p4), %s10120_s6, 512, %s1383_s9, [#allocation55], %s10101_s11, %s10101_s11, %s10100_s3  }
 0x3c6   : > { %s7932_s4 = scalar_lea.hbm %s10121_s8, 16 }
 0x3c7   : > { %p7933_p6 = scmp.ne.s32.totalorder %s10121_s8, %s7932_s4  ;;  %p7938_p13 = scmp.lt.u32.totalorder %s7932_s4, %s10121_s8 }
 0x3c9   : > { %p7934_p11 = pnand %p7933_p6, %p10026_p4 }
 0x3cb   : > { %p7935_p12 = pneg %p7934_p11 }
 0x3cd   : > { %p7940_p0 = pnand %p7938_p13, %p7935_p12 }
 0x3cf   : > { %7943 = shalt.err (!%p7940_p0)
}
 0x3d0   : > { %s7944_s13 = scalar_lea.vmem %s9110_s10, 16  ;;  %s7950_s0 = scalar_lea.vmem %s9110_s10, 32 }
 0x3d1   : > { %p7945_p1 = scmp.ne.s32.totalorder %s9110_s10, %s7944_s13  ;;  %p7951_p7 = scmp.lt.s32.totalorder %s9110_s10, %s9110_s10 }
 0x3d2   : > { %p7952_p8 = scmp.lt.s32.totalorder %s7950_s0, %s7944_s13 }
 0x3d3   : > { %p7946_p2 = pnand %p7945_p1, %p10026_p4 }
 0x3d4   : > { %p7953_p9 = por %p7952_p8, %p7951_p7 }
 0x3d5   : > { %p7947_p3 = pneg %p7946_p2 }
 0x3d7   : > { %p7954_p10 = pnand %p7953_p9, %p7947_p3 }
 0x3d9   : > { %7957 = shalt.err (!%p7954_p10)
}
 0x3da   : > { %6624 = dma.hbm_to_vmem [thread:$0]  (%p10026_p4), %s10121_s8, 16, %s9110_s10, [#allocation58]  }
 0x3db   : > { %s8325_s28 = smov [#allocation62]   ;;  %s8326_s12 = smov [#allocation63]  }
 0x3dc   : > { %s1428_s9 = sshll.u32 %s8325_s28, 4  ;;  %s1442_s4 = sshll.u32 %s8326_s12, 4  ;;  %s1429_s9 = int_to_ptr.vmem [resolvable:$true] %s1428_s9  ;;  %s9141_s4 = int_to_ptr.vmem [resolvable:$true] %s1442_s4 }
 0x3dd   : > { %s7958_s13 = scalar_lea.hbm %s10074_s5, 2048 }
 0x3de   : > { %p7959_p6 = scmp.ne.s32.totalorder %s10074_s5, %s7958_s13  ;;  %p7964_p13 = scmp.lt.u32.totalorder %s7958_s13, %s10074_s5 }
 0x3e0   : > { %p7960_p11 = pnand %p7959_p6, %p10026_p4 }
 0x3e2   : > { %p7961_p12 = pneg %p7960_p11 }
 0x3e4   : > { %p7966_p0 = pnand %p7964_p13, %p7961_p12 }
 0x3e6   : > { %7969 = shalt.err (!%p7966_p0)
}
 0x3e7   : > { %s7970_s0 = scalar_lea.vmem %s1429_s9, 2048  ;;  %p7977_p7 = scmp.lt.s32.totalorder %s1429_s9, %s1429_s9 }
 0x3e8   : > { %p7971_p1 = scmp.ne.s32.totalorder %s1429_s9, %s7970_s0  ;;  %p7978_p8 = scmp.lt.s32.totalorder %s7970_s0, %s7970_s0 }
 0x3ea   : > { %p7972_p2 = pnand %p7971_p1, %p10026_p4  ;;  %p7979_p9 = por %p7978_p8, %p7977_p7 }
 0x3ec   : > { %p7973_p3 = pneg %p7972_p2 }
 0x3ee   : > { %p7980_p10 = pnand %p7979_p9, %p7973_p3 }
 0x3f0   : > { %7983 = shalt.err (!%p7980_p10)
}
 0x3f1   : > { %6628 = dma.hbm_to_vmem [thread:$0]  (%p10026_p4), %s10074_s5, 2048, %s1429_s9, [#allocation61], %s10101_s11, %s10101_s11, %s10100_s3  }
 0x3f2   : > { %s7984_s10 = scalar_lea.hbm %s8549_s29, 16 }
 0x3f3   : > { %p7985_p6 = scmp.ne.s32.totalorder %s8549_s29, %s7984_s10  ;;  %p7990_p13 = scmp.lt.u32.totalorder %s7984_s10, %s8549_s29 }
 0x3f5   : > { %p7986_p11 = pnand %p7985_p6, %p10026_p4 }
 0x3f7   : > { %p7987_p12 = pneg %p7986_p11 }
 0x3f9   : > { %p7992_p0 = pnand %p7990_p13, %p7987_p12 }
 0x3fb   : > { %7995 = shalt.err (!%p7992_p0)
}
 0x3fc   : > { %s7996_s28 = scalar_lea.vmem %s9141_s4, 16  ;;  %s8002_s12 = scalar_lea.vmem %s9141_s4, 32 }
 0x3fd   : > { %p7997_p1 = scmp.ne.s32.totalorder %s9141_s4, %s7996_s28  ;;  %p8003_p7 = scmp.lt.s32.totalorder %s9141_s4, %s9141_s4 }
 0x3fe   : > { %p8004_p8 = scmp.lt.s32.totalorder %s8002_s12, %s7996_s28 }
 0x3ff   : > { %p7998_p2 = pnand %p7997_p1, %p10026_p4 }
 0x400   : > { %p8005_p9 = por %p8004_p8, %p8003_p7 }
 0x401   : > { %p7999_p3 = pneg %p7998_p2 }
 0x403   : > { %p8006_p10 = pnand %p8005_p9, %p7999_p3 }
 0x405   : > { %8009 = shalt.err (!%p8006_p10)
}
 0x406   : > { %6630 = dma.hbm_to_vmem [thread:$0]  (%p10026_p4), %s8549_s29, 16, %s9141_s4, [#allocation64]  }
 0x407 PF: > { %s10122_s3 = sld [smem:[#allocation89_spill]]  ;;  %p6764_p6 = scmp.lt.s32.totalorder %s8246_s2, 4 }
 0x408   : > { %s9174_s11 = sand.u32 1, %s8242_s1   ;;  %s1474_s9 = sand.u32 1, %s8246_s2  }
 0x409   : > { %s10027_s13 = sshll.u32 %s9174_s11, 1  ;;  %p9180_p11 = pnand %p6764_p6, %p8595_p5 }
 0x40a   : > { %s10025_s0 = sshll.u32 %s8246_s2, 5  ;;  %s1478_s28 = scalar_lea.vmem [#allocation6], %s10027_s13 }
 0x40b   : > { %s1485_s12 = sshll.u32 %s1478_s28, 4  ;;  %s9194_s5 = scalar_lea.sflag [#allocation7], %s1474_s9  ;;  %s9192_s12 = int_to_ptr.vmem [resolvable:$true] %s1485_s12 }
 0x40c   : > { %p9200_p12 = pneg %p9180_p11 }
 0x40d   : > { %s9188_s10 = scalar_lea.hbm %s10122_s3, %s10025_s0  ;;  %s8015_s0 = scalar_lea.hbm %s10122_s3, 128 }
 0x40e   : > { %s8010_s22 = scalar_lea.hbm %s9188_s10, 32  ;;  %p8016_p1 = scmp.lt.u32.totalorder %s9188_s10, %s10122_s3 }
 0x40f   : > { %p8011_p5 = scmp.ne.s32.totalorder %s9188_s10, %s8010_s22  ;;  %p8017_p2 = scmp.lt.u32.totalorder %s8015_s0, %s8010_s22 }
 0x410   : > { %p8019_p7 = scmp.lt.u32.totalorder %s8010_s22, %s9188_s10 }
 0x411   : > { %p8013_p13 = pnand %p9200_p12, %p8011_p5  ;;  %p8018_p3 = por %p8017_p2, %p8016_p1 }
 0x413   : > { %p8014_p0 = pneg %p8013_p13  ;;  %p8020_p8 = por %p8019_p7, %p8018_p3 }
 0x415   : > { %p8021_p9 = pnand %p8020_p8, %p8014_p0 }
 0x417   : > { %8024 = shalt.err (!%p8021_p9)
}
 0x418   : > { %s8025_s9 = scalar_lea.vmem %s9192_s12, 32  ;;  %s8327_s28 = smov [#allocation6]  }
 0x419   : > { %p8026_p10 = scmp.ne.s32.totalorder %s9192_s12, %s8025_s9  ;;  %s8030_s13 = sshll.u32 %s8327_s28, 4  ;;  %s8031_s13 = int_to_ptr.vmem [resolvable:$false] %s8030_s13 }
 0x41a   : > { %s8032_s8 = scalar_lea.vmem %s8031_s13, 64  ;;  %p8033_p5 = scmp.lt.s32.totalorder %s9192_s12, %s8031_s13 }
 0x41b   : > { %p8028_p6 = pnand %p8026_p10, %p9200_p12  ;;  %p8034_p13 = scmp.lt.s32.totalorder %s8032_s8, %s8025_s9 }
 0x41d   : > { %p8029_p4 = pneg %p8028_p6  ;;  %p8035_p1 = por %p8034_p13, %p8033_p5 }
 0x41f   : > { %p8036_p2 = pnand %p8035_p1, %p8029_p4 }
 0x421   : > { %8039 = shalt.err (!%p8036_p2)
}
 0x422   : > { %s8328_s0 = smov 16   ;;  %s10125_s22 = sld [smem:[#allocation90_spill]] }
 0x423   : > { %s10126_s3 = sld [smem:[#allocation88_spill]]  ;;  %s8329_s28 = smov 1  }
 0x424   : > { %6719 = dma.hbm_to_vmem [thread:$0]  (!%p9180_p11), %s9188_s10, 32, %s9192_s12, %s9194_s5, %s8328_s0, %s8328_s0, %s8329_s28  }
 0x425   : > { %s10127_s8 = sshll.u32 %s8246_s2, 5  ;;  %s10128_s9 = sshll.u32 %s9174_s11, 1 }
 0x426   : > { %s1499_s14 = scalar_lea.vmem [#allocation8], %s10128_s9  ;;  %s5881_s17 = sshll.u32 %s9174_s11, 4 }
 0x427   : > { %s1506_s15 = sshll.u32 %s1499_s14, 4  ;;  %s6057_s18 = sshll.u32 %s8246_s2, 8  ;;  %s9230_s15 = int_to_ptr.vmem [resolvable:$true] %s1506_s15 }
 0x428   : > { %s9226_s13 = scalar_lea.hbm %s10125_s22, %s10127_s8  ;;  %s1457_s20 = scalar_lea.vmem [#allocation3], %s5881_s17 }
 0x429   : > { %s9235_s19 = scalar_lea.hbm %s10126_s3, %s6057_s18  ;;  %s1464_s10 = sshll.u32 %s1457_s20, 4  ;;  %s9237_s10 = int_to_ptr.vmem [resolvable:$true] %s1464_s10 }
 0x42a   : > { %s1454_s12 = scalar_lea.sflag [#allocation4], %s9174_s11  ;;  %s8040_s8 = scalar_lea.hbm %s9235_s19, 256 }
 0x42b   : > { %p8041_p4 = scmp.ne.s32.totalorder %s9235_s19, %s8040_s8  ;;  %s8045_s14 = scalar_lea.hbm %s10126_s3, 1024 }
 0x42c   : > { %p8046_p7 = scmp.lt.u32.totalorder %s9235_s19, %s10126_s3  ;;  %p8047_p8 = scmp.lt.u32.totalorder %s8045_s14, %s8040_s8 }
 0x42d   : > { %p8043_p0 = pnand %p8041_p4, %p9200_p12  ;;  %p8049_p10 = scmp.lt.u32.totalorder %s8040_s8, %s9235_s19 }
 0x42e   : > { %p8048_p9 = por %p8047_p8, %p8046_p7 }
 0x42f   : > { %p8044_p3 = pneg %p8043_p0 }
 0x430   : > { %p8050_p6 = por %p8049_p10, %p8048_p9 }
 0x432   : > { %p8051_p5 = pnand %p8050_p6, %p8044_p3 }
 0x434   : > { %8054 = shalt.err (!%p8051_p5)
}
 0x435   : > { %s8055_s17 = scalar_lea.vmem %s9237_s10, 256  ;;  %s8330_s20 = smov [#allocation3]  }
 0x436   : > { %p8056_p13 = scmp.ne.s32.totalorder %s9237_s10, %s8055_s17  ;;  %s8060_s18 = sshll.u32 %s8330_s20, 4  ;;  %s8061_s18 = int_to_ptr.vmem [resolvable:$false] %s8060_s18 }
 0x437   : > { %s8062_s9 = scalar_lea.vmem %s8061_s18, 512  ;;  %p8063_p4 = scmp.lt.s32.totalorder %s9237_s10, %s8061_s18 }
 0x438   : > { %p8058_p1 = pnand %p8056_p13, %p9200_p12  ;;  %p8064_p0 = scmp.lt.s32.totalorder %s8062_s9, %s8055_s17 }
 0x43a   : > { %p8059_p2 = pneg %p8058_p1  ;;  %p8065_p7 = por %p8064_p0, %p8063_p4 }
 0x43c   : > { %p8066_p8 = pnand %p8065_p7, %p8059_p2 }
 0x43e   : > { %8069 = shalt.err (!%p8066_p8)
}
 0x43f   : > { %s8331_s8 = smov 128   ;;  %s8332_s14 = smov 8  }
 0x440   : > { %6716 = dma.hbm_to_vmem [thread:$0]  (!%p9180_p11), %s9235_s19, 256, %s9237_s10, %s1454_s12, %s8331_s8, %s8331_s8, %s8332_s14  }
 0x441   : > { %s8070_s17 = scalar_lea.hbm %s9226_s13, 32  ;;  %s8075_s20 = scalar_lea.hbm %s10125_s22, 128 }
 0x442   : > { %p8071_p3 = scmp.ne.s32.totalorder %s9226_s13, %s8070_s17  ;;  %p8076_p6 = scmp.lt.u32.totalorder %s9226_s13, %s10125_s22 }
 0x443   : > { %p8077_p5 = scmp.lt.u32.totalorder %s8075_s20, %s8070_s17  ;;  %p8079_p1 = scmp.lt.u32.totalorder %s8070_s17, %s9226_s13 }
 0x444   : > { %p8073_p9 = pnand %p8071_p3, %p9200_p12 }
 0x445   : > { %p8078_p13 = por %p8077_p5, %p8076_p6 }
 0x446   : > { %p8074_p10 = pneg %p8073_p9 }
 0x447   : > { %p8080_p2 = por %p8079_p1, %p8078_p13 }
 0x449   : > { %p8081_p4 = pnand %p8080_p2, %p8074_p10 }
 0x44b   : > { %8084 = shalt.err (!%p8081_p4)
}
 0x44c   : > { %s8085_s18 = scalar_lea.vmem %s9230_s15, 32  ;;  %s8333_s19 = smov [#allocation8]  }
 0x44d   : > { %p8086_p0 = scmp.ne.s32.totalorder %s9230_s15, %s8085_s18  ;;  %s8090_s11 = sshll.u32 %s8333_s19, 4  ;;  %s8091_s11 = int_to_ptr.vmem [resolvable:$false] %s8090_s11 }
 0x44e   : > { %s8092_s10 = scalar_lea.vmem %s8091_s11, 64  ;;  %p8093_p3 = scmp.lt.s32.totalorder %s9230_s15, %s8091_s11 }
 0x44f   : > { %p8088_p7 = pnand %p8086_p0, %p9200_p12  ;;  %p8094_p9 = scmp.lt.s32.totalorder %s8092_s10, %s8085_s18 }
 0x451   : > { %p8089_p8 = pneg %p8088_p7  ;;  %p8095_p6 = por %p8094_p9, %p8093_p3 }
 0x453   : > { %p8096_p5 = pnand %p8095_p6, %p8089_p8 }
 0x455   : > { %8099 = shalt.err (!%p8096_p5)
}
 0x456   : > { %6722 = dma.hbm_to_vmem [thread:$0]  (!%p9180_p11), %s9226_s13, 32, %s9230_s15, %s9194_s5, %s8328_s0, %s8328_s0, %s8329_s28  }
 0x457   : > { %p10129_p12 = scmp.ne.s32.totalorder %s10093_s16, 0 }
 0x458   : > { %s10130_s6 = sld [smem:[#allocation124_spill]] (!%p10129_p12)  ;;  %s10131_s12 = sld [smem:[#allocation127_spill]] (!%p10129_p12) }
 0x459   : > { %1518 = sbr.rel (%p10129_p12) target bundleno = 8502 (0x2136), region = 180 }
 0x45e   : > { %s9283_s9 = sand.u32 (!%p10129_p12), 1, %s10130_s6   ;;  %p10132_p10 = scmp.ne.s32.totalorder (!%p10129_p12), %s10131_s12, 0 }
 0x45f   : > { %s5891_s8 = sshll.u32 (!%p10129_p12), %s9283_s9, 4  ;;  %s1521_s14 = scalar_lea.sflag (!%p10129_p12), [#allocation4], %s9283_s9 }
 0x460   : > { %s9287_s17 = scalar_lea.vmem [#allocation3], %s5891_s8 }
 0x461   : > { %8145 = dma.done.wait (%p10132_p10), %s1521_s14, 256  }
 0x462   : > { %8147 = vsyncadd (%p10132_p10), %s1521_s14, 4294967040  ;;  %s1529_s5 = sand.u32 1, %s8577_s7   ;;  %s9295_s16 = sshll.u32 %s9283_s9, 1 }
 0x463   : > { %s1530_s15 = scalar_lea.sflag [#allocation7], %s1529_s5  ;;  %s1533_s4 = scalar_lea.vmem [#allocation6], %s9295_s16 }
 0x464   : > { %8149 = dma.done.wait (%p10132_p10), %s1530_s15, 64  }
 0x465   : > { %8151 = vsyncadd (%p10132_p10), %s1530_s15, 4294967232  ;;  %s1542_s0 = scalar_lea.vmem [#allocation8], %s9295_s16  ;;  %p10133_p11 = scmp.eq.s32.totalorder %s8577_s7, 0 }
 0x467   : > { %8153 = dma.done.wait (%p10133_p11), [#allocation10], 144   ;;  %p10134_p13 = pmov %p10133_p11 }
 0x468   : > { %p10135_p1 = pmov %p10133_p11 }
 0x469   : > { %8155 = vsyncadd (%p10134_p13), [#allocation10], 4294967152 }
 0x46a   : > { %8157 = dma.done.wait (%p10135_p1), [#allocation13], 384   ;;  %p10136_p2 = pmov %p10135_p1 }
 0x46b   : > { %p10137_p4 = pmov %p10135_p1 }
 0x46c   : > { %8159 = vsyncadd (%p10136_p2), [#allocation13], 4294966912 }
 0x46d   : > { %8161 = dma.done.wait (%p10137_p4), [#allocation16], 272   ;;  %p10138_p0 = pmov %p10135_p1 }
 0x46f   : > { %8163 = vsyncadd (%p10138_p0), [#allocation16], 4294967024  ;;  %p10139_p7 = pmov %p10138_p0 }
 0x470   : > { %p10140_p8 = pmov %p10138_p0 }
 0x471   : > { %8165 = dma.done.wait (%p10139_p7), [#allocation19], 272  }
 0x472   : > { %8167 = vsyncadd (%p10140_p8), [#allocation19], 4294967024  ;;  %p10141_p3 = pmov %p10138_p0 }
 0x473   : > { %p10142_p9 = pmov %p10138_p0 }
 0x474   : > { %8169 = dma.done.wait (%p10141_p3), [#allocation22], 272  }
 0x475   : > { %8171 = vsyncadd (%p10142_p9), [#allocation22], 4294967024  ;;  %p10143_p6 = pmov %p10138_p0 }
 0x476   : > { %p10144_p5 = pmov %p10138_p0 }
 0x477   : > { %8173 = dma.done.wait (%p10143_p6), [#allocation25], 32  }
 0x478   : > { %8175 = vsyncadd (%p10144_p5), [#allocation25], 4294967264  ;;  %p10145_p12 = pmov %p10138_p0 }
 0x479   : > { %p10146_p10 = pmov %p10138_p0 }
 0x47a   : > { %8177 = dma.done.wait (%p10145_p12), [#allocation28], 272  }
 0x47b   : > { %8179 = vsyncadd (%p10146_p10), [#allocation28], 4294967024  ;;  %p10147_p11 = pmov %p10138_p0 }
 0x47c   : > { %p10148_p13 = pmov %p10138_p0 }
 0x47d   : > { %8181 = dma.done.wait (%p10147_p11), [#allocation31], 528  }
 0x47e   : > { %8183 = vsyncadd (%p10148_p13), [#allocation31], 4294966768  ;;  %p10149_p1 = pmov %p10138_p0 }
 0x47f   : > { %p10150_p2 = pmov %p10138_p0 }
 0x480   : > { %8185 = dma.done.wait (%p10149_p1), [#allocation34], 32  }
 0x481   : > { %8187 = vsyncadd (%p10150_p2), [#allocation34], 4294967264  ;;  %p10151_p4 = pmov %p10138_p0 }
 0x483   : > { %8189 = dma.done.wait (%p10151_p4), [#allocation37], 272  }
 0x484   : > { %8191 = vsyncadd (%p10138_p0), [#allocation37], 4294967024  ;;  %p10152_p7 = pmov %p10138_p0 }
 0x485   : > { %p10153_p8 = pmov %p10138_p0 }
 0x486   : > { %8193 = dma.done.wait (%p10152_p7), [#allocation40], 272  }
 0x487   : > { %8195 = vsyncadd (%p10153_p8), [#allocation40], 4294967024  ;;  %p10154_p3 = pmov %p10138_p0 }
 0x488   : > { %p10155_p9 = pmov %p10138_p0 }
 0x489   : > { %8197 = dma.done.wait (%p10154_p3), [#allocation43], 272  }
 0x48a   : > { %8199 = vsyncadd (%p10155_p9), [#allocation43], 4294967024  ;;  %p10156_p6 = pmov %p10138_p0 }
 0x48b   : > { %p10157_p5 = pmov %p10138_p0 }
 0x48c   : > { %8201 = dma.done.wait (%p10156_p6), [#allocation46], 272  }
 0x48d   : > { %8203 = vsyncadd (%p10157_p5), [#allocation46], 4294967024  ;;  %p10158_p12 = pmov %p10138_p0 }
 0x48e   : > { %p10159_p10 = pmov %p10138_p0 }
 0x48f   : > { %8205 = dma.done.wait (%p10158_p12), [#allocation49], 32  }
 0x490   : > { %8207 = vsyncadd (%p10159_p10), [#allocation49], 4294967264  ;;  %p10160_p11 = pmov %p10138_p0 }
 0x491   : > { %p10161_p13 = pmov %p10138_p0 }
 0x492   : > { %8209 = dma.done.wait (%p10160_p11), [#allocation52], 272  }
 0x493   : > { %8211 = vsyncadd (%p10161_p13), [#allocation52], 4294967024  ;;  %p10162_p1 = pmov %p10138_p0 }
 0x494   : > { %p10163_p2 = pmov %p10138_p0 }
 0x495   : > { %8213 = dma.done.wait (%p10162_p1), [#allocation55], 528  }
 0x496   : > { %8215 = vsyncadd (%p10163_p2), [#allocation55], 4294966768  ;;  %p10164_p4 = pmov %p10138_p0 }
 0x498   : > { %8217 = dma.done.wait (%p10164_p4), [#allocation58], 32  }
 0x499   : > { %8219 = vsyncadd (%p10138_p0), [#allocation58], 4294967264  ;;  %p10165_p7 = pmov %p10138_p0 }
 0x49a   : > { %p10166_p8 = pmov %p10138_p0 }
 0x49b   : > { %8221 = dma.done.wait (%p10165_p7), [#allocation61], 2064  }
 0x49c   : > { %8223 = vsyncadd (%p10166_p8), [#allocation61], 4294965232  ;;  %p10167_p3 = pmov %p10138_p0 }
 0x49d   : > { %p10168_p9 = pmov %p10138_p0 }
 0x49e   : > { %8225 = dma.done.wait (%p10167_p3), [#allocation64], 16  }
 0x49f   : > { %8227 = vsyncadd (%p10168_p9), [#allocation64], 4294967280  ;;  %v8334_v0 = vmov 0.0   ;;  %vm8335_vm0 = vmmov 0   ;;  %v8336_v1 = vmov 0   ;;  %v6931_v2 = vld [vmem:[#allocation9] sm:$0xff]  }
 0x4a0   : > { %6191 = vmatprep.subr.bf16.mxu0 %v8334_v0  ;;  %6193 = vmatprep.mubr.msk.bf16.mxu0 %vm8335_vm0, %v8334_v0  ;;  %v1802_v3 = vld [vmem:[%s9287_s17] sm:$0xff]  ;;  %v1803_v4 = vld [vmem:[%s9287_s17 + $0x8] sm:$0xff]  ;;  %vm1813_vm1 = vcmask 130048   ;;  %vm1899_vm2 = vcmask 261120   ;;  %vm2078_vm3 = vcmask 64512   ;;  %vm2200_vm4 = vcmask 1043456  }
 0x4a1   : > { %6929 = vset.pattern.permute.xlu0 %v8336_v1  ;;  %6197 = vmatprep.subr.bf16.mxu1 %v8334_v0  ;;  %v1867_v5 = vld [vmem:[#allocation12] sm:$0xff]  ;;  %v1806_v6 = vpack.c.bf16 %v1803_v4, %v1802_v3  ;;  %v6932_v7 = vld [vmem:[#allocation14] sm:$0xff]   ;;  %v6934_v9 = vld [vmem:[#allocation14 + $0x8] sm:$0xff]   ;;  %s8337_s28 = smov 120   ;;  %s8338_s13 = smov 112   ;;  %vm2528_vm5 = vcmask 130112  }
 0x4a2   : > { %6201 = vmatprep.mubr.msk.bf16.mxu1 %vm8335_vm0, %v8334_v0  ;;  %6930 = vset.pattern.permute.xlu1 %v8336_v1  ;;  %v6933_v8 = vld [vmem:[#allocation17] sm:$0xff]   ;;  %v6935_v10 = vld [vmem:[#allocation17 + $0x8] sm:$0xff]   ;;  %v6936_v21 = vld [vmem:[#allocation20] sm:$0xff]   ;;  %s8339_s20 = smov 104   ;;  %s8340_s18 = smov 8   ;;  %vm2761_vm6 = vcmask 195712  }
 0x4a3   : > { %6192 = vmatpush3.bf16.msra.mxu0 %v6931_v2  ;;  %1870 = vperm.xlu0 %6929, %v1867_v5   ;;  %v5934_v11 = vld [vmem:[#allocation11] ss:$0 sm:$0xff]  ;;  %v6937_v23 = vld [vmem:[#allocation20 + $0x8] sm:$0xff]   ;;  %v5939_v24 = vld [vmem:[#allocation18] ss:$0 sm:$0xff]  ;;  %s8341_s19 = smov 16  }
 0x4a4   : > { %6205 = vmatprep.subr.bf16.mxu0 %v8334_v0  ;;  %6198 = vmatpush3.bf16.msra.mxu1 %v6932_v7  ;;  %v5935_v36 = vld [vmem:[#allocation15] ss:$0 sm:$0xff]  ;;  %v5943_v39 = vld [vmem:[#allocation21] ss:$0 sm:$0xff]  ;;  %s8342_s11 = smov 24   ;;  %vm2994_vm7 = vcmask 261312  }
 0x4a5   : > { %6199 = vmatprep.subr.bf16.mxu1 %v8334_v0  ;;  %vm3208_vm8 = vcmask 523264   ;;  %vm4729_vm9 = vcmask 1041409   ;;  %s10169_s10 = sld [smem:[#allocation122_spill]]  ;;  %s10170_s6 = sld [smem:[#allocation128_spill]]  ;;  %vm5316_vm10 = vcmask 122880  }
 0x4a6   : > { %6194 = vmatmul.mubr.msk.bf16.vlgmr.msra.gmra.mrb[0].mxu0 %vm1813_vm1, %v1806_v6  ;;  %s6060_s12 = sshll.u32 %s8577_s7, 5  ;;  %s1796_s8 = scalar_lea.vmem [#allocation65], %s9295_s16 }
 0x4a7   : > { %6209 = vmatprep.mubr.msk.bf16.mxu0 %vm8335_vm0, %v8334_v0  ;;  %6206 = vmatpush3.bf16.msra.mxu0 %v6933_v8  ;;  %s5333_s14 = sshll.u32 %s1796_s8, 4  ;;  %s5320_s5 = scalar_lea.sflag [#allocation5], %s9283_s9  ;;  %s9921_s14 = int_to_ptr.vmem [resolvable:$true] %s5333_s14 }
 0x4a8   : > { %6207 = vmatprep.subr.bf16.mxu0 %v8334_v0  ;;  %6200 = vmatpush3.bf16.msra.mxu1 %v6934_v9  ;;  %s8100_s15 = scalar_lea.vmem %s9921_s14, 32  ;;  %s8344_s7 = smov [#allocation65]  }
 0x4a9   : > { %6213 = vmatprep.subr.bf16.mxu1 %v8334_v0  ;;  %p8101_p6 = scmp.ne.s32.totalorder %s9921_s14, %s8100_s15  ;;  %s8104_s16 = sshll.u32 %s8344_s7, 4  ;;  %s8105_s16 = int_to_ptr.vmem [resolvable:$false] %s8104_s16 }
 0x4aa   : > { %p8107_p11 = scmp.lt.s32.totalorder %s9921_s14, %s8105_s16 }
 0x4ab   : > { %6208 = vmatpush3.bf16.msra.mxu0 %v6935_v10  ;;  %s9919_s17 = scalar_lea.hbm %s10169_s10, %s6060_s12  ;;  %p10171_p5 = scmp.ne.s32.totalorder %s10170_s6, 0 }
 0x4ac   : > { %6221 = vmatprep.subr.bf16.mxu0 %v8334_v0 }
 0x4ad   : > { %p8102_p12 = pnand %p8101_p6, %p10171_p5 }
 0x4af   : > { %p8103_p10 = pneg %p8102_p12 }
 0x522   : > { %v1871_v15 = vpop.permute.xlu0 %1870 }
 0x579   : > { %v1851_v12 = vpop.f32.mrb[0].mxu0 }
 0x57a   : > { %v1865_v13 = vadd.f32 %v5934_v11, %v1851_v12  ;;  %v6195_v14 = vpop.f32.mrb[1].mxu0 }
 0x57b   : > { %v1854_v16 = vpop.f32.mrb[2].mxu0 }
 0x57c   : > { %v1866_v17 = vadd.f32 %v5934_v11, %v1854_v16  ;;  %v6196_v18 = vpop.f32.mrb[3].mxu0  ;;  %v9394_v19 = vadd.f32 %v1871_v15, %v1865_v13 }
 0x57e   : > { %v9396_v20 = vadd.f32 %v1871_v15, %v1866_v17 }
 0x580   : > { %v1879_v22 = vpack.c.bf16 %v9396_v20, %v9394_v19 }
 0x582   : > { %6202 = vmatmul.mubr.msk.bf16.vlgmr.msra.gmra.mrb[0].mxu1 %vm1899_vm2, %v1879_v22  ;;  %6210 = vmatmul.mubr.msk.bf16.vlgmr.msra.gmra.mrb[4].mxu0 %vm1899_vm2, %v1879_v22 }
 0x583   : > { %6214 = vmatpush3.bf16.msra.mxu1 %v6936_v21  ;;  %6217 = vmatprep.mubr.msk.bf16.mxu1 %vm8335_vm0, %v8334_v0 }
 0x584   : > { %6215 = vmatprep.subr.bf16.mxu1 %v8334_v0  ;;  %6223 = vmatprep.mubr.msk.bf16.mxu0 %vm8335_vm0, %v8334_v0 }
 0x587   : > { %6216 = vmatpush3.bf16.msra.mxu1 %v6937_v23 }
 0x588   : > { %6227 = vmatprep.subr.bf16.mxu1 %v8334_v0 }
 0x58a   : > { %6218 = vmatmul.mubr.msk.bf16.vlgmr.msra.gmra.mrb[4].mxu1 %vm1899_vm2, %v1879_v22 }
 0x58b   : > { %6229 = vmatprep.mubr.msk.bf16.mxu1 %vm8335_vm0, %v8334_v0 }
 0x655   : > { %v1937_v25 = vpop.f32.mrb[0].mxu1  ;;  %v2001_v26 = vpop.f32.mrb[4].mxu0 }
 0x656   : > { %v2002_v27 = vadd.f32 %v5939_v24, %v2001_v26  ;;  %v6203_v28 = vpop.f32.mrb[1].mxu1  ;;  %v6211_v29 = vpop.f32.mrb[5].mxu0  ;;  %v1938_v40 = vadd.f32 %v5935_v36, %v1937_v25 }
 0x657   : > { %v1940_v30 = vpop.f32.mrb[2].mxu1  ;;  %v2004_v31 = vpop.f32.mrb[6].mxu0 }
 0x658   : > { %v9411_v32 = vpack.c.bf16 %v2002_v27, %v2002_v27  ;;  %v2005_v33 = vadd.f32 %v5939_v24, %v2004_v31  ;;  %v6204_v34 = vpop.f32.mrb[3].mxu1  ;;  %v6212_v35 = vpop.f32.mrb[7].mxu0  ;;  %v1941_v43 = vadd.f32 %v5935_v36, %v1940_v30  ;;  %v9421_v47 = vpack.c.bf16 %v1938_v40, %v1938_v40 }
 0x65a   : > { %v9413_v37 = vpack.c.bf16 %v2005_v33, %v2005_v33  ;;  %v2083_v38 = vsel %vm2078_vm3, %v9411_v32, 0  ;;  %v9425_v51 = vpack.c.bf16 %v1941_v43, %v1941_v43 }
 0x65b   : > { %6222 = vmatpush3.bf16.xpose.msra.mxu0 %v2083_v38 }
 0x65c   : > { %v2129_v41 = vsel %vm2078_vm3, %v9413_v37, 0  ;;  %6233 = vmatprep.subr.bf16.mxu0 %v8334_v0 }
 0x65d   : > { %v2065_v42 = vpop.f32.mrb[4].mxu1  ;;  %6228 = vmatpush3.bf16.xpose.msra.mxu1 %v2129_v41 }
 0x65e   : > { %v2066_v44 = vadd.f32 %v5943_v39, %v2065_v42  ;;  %v6219_v45 = vpop.f32.mrb[5].mxu1  ;;  %6239 = vmatprep.subr.bf16.mxu1 %v8334_v0 }
 0x65f   : > { %v2068_v46 = vpop.f32.mrb[6].mxu1 }
 0x660   : > { %v9423_v48 = vpack.c.bf16 %v2066_v44, %v2066_v44  ;;  %v2069_v49 = vadd.f32 %v5943_v39, %v2068_v46  ;;  %v6220_v50 = vpop.f32.mrb[7].mxu1 }
 0x662   : > { %v9427_v52 = vpack.c.bf16 %v2069_v49, %v2069_v49  ;;  %6224 = vmatmul.mubr.msk.bf16.vlgmr.msra.gmra.mrb[8].mxu0 %vm2078_vm3, %v9421_v47  ;;  %v2202_v53 = vsel %vm2200_vm4, %v9423_v48, 0 }
 0x663   : > { %6234 = vmatpush3.bf16.msra.mxu0 %v2202_v53  ;;  %6235 = vmatprep.mubr.msk.bf16.mxu0 %vm8335_vm0, %v8334_v0 }
 0x664   : > { %6230 = vmatmul.mubr.msk.bf16.vlgmr.msra.gmra.mrb[8].mxu1 %vm2078_vm3, %v9425_v51  ;;  %v2248_v54 = vsel %vm2200_vm4, %v9427_v52, 0  ;;  %6245 = vmatprep.subr.bf16.mxu0 %v8334_v0 }
 0x665   : > { %6240 = vmatpush3.bf16.msra.mxu1 %v2248_v54  ;;  %6241 = vmatprep.mubr.msk.bf16.mxu1 %vm8335_vm0, %v8334_v0 }
 0x666   : > { %6251 = vmatprep.subr.bf16.mxu1 %v8334_v0 }
 0x735   : > { %v2119_v55 = vpop.f32.mrb[8].mxu0 }
 0x736   : > { %v9443_v56 = vmul.f32 0.35355338, %v2119_v55  ;;  %v6225_v57 = vpop.f32.mrb[9].mxu0 }
 0x737   : > { %v2122_v58 = vpop.f32.mrb[10].mxu0  ;;  %v2165_v59 = vpop.f32.mrb[8].mxu1 }
 0x738   : > { %v9445_v60 = vmul.f32 0.35355338, %v2165_v59  ;;  %v6226_v61 = vpop.f32.mrb[11].mxu0  ;;  %v6231_v62 = vpop.f32.mrb[9].mxu1  ;;  %v2173_v63 = vsel %vm2078_vm3, %v9443_v56, -inf }
 0x739   : > { %v2168_v1 = vpop.f32.mrb[10].mxu1  ;;  %2174 = vmax.xlane.f32.xlu0 %v2173_v63 }
 0x73a   : > { %v6232_v2 = vpop.f32.mrb[11].mxu1  ;;  %v2176_v3 = vsel %vm2078_vm3, %v9445_v60, -inf }
 0x73b   : > { %2177 = vmax.xlane.f32.xlu1 %v2176_v3 }
 0x74c   : > { %2296 = vrot.lane.b32.xlu1 %v9411_v32, %s8337_s28 }
 0x74f   : > { %2345 = vrot.lane.b32.xlu0 %v9425_v51, %s8337_s28 }
 0x7c6   : > { %v2175_v4 = vpop.xlane.xlu0 %2174 }
 0x7c7   : > { %v2179_v5 = vsub.f32 %v9443_v56, %v2175_v4 }
 0x7c8   : > { %v2178_v6 = vpop.xlane.xlu1 %2177 }
 0x7c9   : > { %v2181_v7 = vmul.f32 1.442695, %v2179_v5  ;;  %v2180_v8 = vsub.f32 %v9445_v60, %v2178_v6 }
 0x7ca   : > { %v2346_v29 = vpop.permute.xlu0 %2345 }
 0x7cb   : > { %6976 = vpow2.f32 %v2181_v7  ;;  %v2183_v9 = vmul.f32 1.442695, %v2180_v8 }
 0x7cc   : > { %v2297_v14 = vpop.permute.xlu1 %2296 }
 0x7cd   : > { %6978 = vpow2.f32 %v2183_v9  ;;  %v2302_v23 = vsel %vm2078_vm3, %v2297_v14, 0 }
 0x7d5   : > { %v6977_v10 = vpop.eup %6976 }
 0x7d6   : > { %v2185_v11 = vsel %vm2078_vm3, %v6977_v10, 0.0 }
 0x7d7   : > { %v6979_v12 = vpop.eup %6978  ;;  %2186 = vadd.xlane.f32.xlu1 %v2185_v11 }
 0x7d8   : > { %v2188_v13 = vsel %vm2078_vm3, %v6979_v12, 0.0 }
 0x7db   : > { %2189 = vadd.xlane.f32.xlu1 %v2188_v13 }
 0x7ec   : > { %2348 = vrot.lane.b32.xlu1 %v9413_v37, %s8337_s28 }
 0x7f0   : > { %2293 = vrot.lane.b32.xlu1 %v9421_v47, %s8337_s28 }
 0x864   : > { %v2187_v15 = vpop.xlane.xlu1 %2186 }
 0x865   : > { %6980 = vrcp.f32 %v2187_v15 }
 0x868   : > { %v2190_v16 = vpop.xlane.xlu1 %2189 }
 0x869   : > { %6982 = vrcp.f32 %v2190_v16 }
 0x86c   : > { %v2349_v25 = vpop.permute.xlu1 %2348 }
 0x86d   : > { %v2354_v27 = vsel %vm2078_vm3, %v2349_v25, 0 }
 0x86f   : > { %v6981_v17 = vpop.eup %6980 }
 0x870   : > { %v2193_v18 = vmul.f32 %v6981_v17, %v6977_v10  ;;  %v2294_v28 = vpop.permute.xlu1 %2293 }
 0x872   : > { %v2195_v21 = vpack.c.bf16 %v2193_v18, %v2193_v18 }
 0x873   : > { %v6983_v22 = vpop.eup %6982 }
 0x874   : > { %v2194_v24 = vmul.f32 %v6983_v22, %v6979_v12  ;;  %6236 = vmatmul.mubr.msk.bf16.vlgmr.msra.gmra.mrb[12].mxu0 %vm2078_vm3, %v2195_v21 }
 0x875   : > { %6246 = vmatpush3.bf16.xpose.msra.mxu0 %v2302_v23  ;;  %6247 = vmatprep.mubr.msk.bf16.mxu0 %vm8335_vm0, %v8334_v0 }
 0x876   : > { %v2196_v26 = vpack.c.bf16 %v2194_v24, %v2194_v24  ;;  %6257 = vmatprep.subr.bf16.mxu0 %v8334_v0 }
 0x878   : > { %6242 = vmatmul.mubr.msk.bf16.vlgmr.msra.gmra.mrb[12].mxu1 %vm2078_vm3, %v2196_v26 }
 0x879   : > { %6252 = vmatpush3.bf16.xpose.msra.mxu1 %v2354_v27  ;;  %6253 = vmatprep.mubr.msk.bf16.mxu1 %vm8335_vm0, %v8334_v0 }
 0x87a   : > { %6263 = vmatprep.subr.bf16.mxu1 %v8334_v0 }
 0x87c   : > { %6248 = vmatmul.mubr.msk.bf16.vlgmr.msra.gmra.mrb[16].mxu0 %vm2078_vm3, %v2294_v28 }
 0x87d   : > { %6259 = vmatprep.mubr.msk.bf16.mxu0 %vm8335_vm0, %v8334_v0 }
 0x880   : > { %6254 = vmatmul.mubr.msk.bf16.vlgmr.msra.gmra.mrb[16].mxu1 %vm2078_vm3, %v2346_v29 }
 0x881   : > { %6265 = vmatprep.mubr.msk.bf16.mxu1 %vm8335_vm0, %v8334_v0 }
 0x947   : > { %v2238_v30 = vpop.f32.mrb[12].mxu0 }
 0x948   : > { %2290 = vst.msk [vmem:[#allocation2] sm:$0xff] %vm2078_vm3, %v2238_v30  ;;  %v6237_v31 = vpop.f32.mrb[13].mxu0 }
 0x949   : > { %v2241_v33 = vpop.f32.mrb[14].mxu0 }
 0x94a   : > { %v6238_v34 = vpop.f32.mrb[15].mxu0 }
 0x94b   : > { %v2284_v35 = vpop.f32.mrb[12].mxu1 }
 0x94c   : > { %2291 = vst.msk [vmem:[#allocation2 + $0x8] sm:$0xff] %vm2078_vm3, %v2284_v35  ;;  %v6243_v36 = vpop.f32.mrb[13].mxu1 }
 0x94d   : > { %v2287_v38 = vpop.f32.mrb[14].mxu1 }
 0x94e   : > { %v6244_v39 = vpop.f32.mrb[15].mxu1 }
 0x94f   : > { %v2338_v40 = vpop.f32.mrb[16].mxu0 }
 0x950   : > { %v9481_v41 = vmul.f32 0.35355338, %v2338_v40  ;;  %v6249_v42 = vpop.f32.mrb[17].mxu0 }
 0x951   : > { %v2341_v43 = vpop.f32.mrb[18].mxu0 }
 0x952   : > { %v6250_v44 = vpop.f32.mrb[19].mxu0  ;;  %v2398_v45 = vsel %vm2078_vm3, %v9481_v41, -inf }
 0x953   : > { %v2390_v46 = vpop.f32.mrb[16].mxu1  ;;  %2399 = vmax.xlane.f32.xlu1 %v2398_v45 }
 0x954   : > { %v9485_v49 = vmul.f32 0.35355338, %v2390_v46  ;;  %v6255_v50 = vpop.f32.mrb[17].mxu1 }
 0x955   : > { %v2393_v53 = vpop.f32.mrb[18].mxu1 }
 0x956   : > { %v6256_v54 = vpop.f32.mrb[19].mxu1  ;;  %v2401_v55 = vsel %vm2078_vm3, %v9485_v49, -inf }
 0x957   : > { %2402 = vmax.xlane.f32.xlu0 %v2401_v55 }
 0x964   : > { %2423 = vrot.lane.b32.xlu1 %v9423_v48, %s8337_s28 }
 0x968   : > { %2533 = vrot.lane.b32.xlu1 %v9411_v32, %s8338_s13 }
 0x96d   : > { %2472 = vrot.lane.b32.xlu0 %v9427_v52, %s8337_s28 }
 0x971   : > { %2581 = vrot.lane.b32.xlu0 %v9425_v51, %s8338_s13 }
 0x9e0   : > { %v2400_v57 = vpop.xlane.xlu1 %2399 }
 0x9e1   : > { %v2404_v58 = vsub.f32 %v9481_v41, %v2400_v57 }
 0x9e3   : > { %v2406_v59 = vmul.f32 1.442695, %v2404_v58 }
 0x9e4   : > { %v2403_v61 = vpop.xlane.xlu0 %2402  ;;  %v2424_v62 = vpop.permute.xlu1 %2423 }
 0x9e5   : > { %6984 = vpow2.f32 %v2406_v59  ;;  %v2405_v63 = vsub.f32 %v9485_v49, %v2403_v61  ;;  %v2429_v1 = vsel %vm2200_vm4, %v2424_v62, 0 }
 0x9e6   : > { %6258 = vmatpush3.bf16.msra.mxu0 %v2429_v1 }
 0x9e7   : > { %v2408_v2 = vmul.f32 1.442695, %v2405_v63  ;;  %6269 = vmatprep.subr.bf16.mxu0 %v8334_v0 }
 0x9e8   : > { %v2473_v3 = vpop.permute.xlu0 %2472  ;;  %v2534_v9 = vpop.permute.xlu1 %2533 }
 0x9e9   : > { %6986 = vpow2.f32 %v2408_v2  ;;  %v2478_v4 = vsel %vm2200_vm4, %v2473_v3, 0  ;;  %v2539_v16 = vsel %vm2078_vm3, %v2534_v9, 0 }
 0x9ea   : > { %6264 = vmatpush3.bf16.msra.mxu1 %v2478_v4 }
 0x9eb   : > { %6275 = vmatprep.subr.bf16.mxu1 %v8334_v0 }
 0x9ec   : > { %v2582_v24 = vpop.permute.xlu0 %2581 }
 0x9ef   : > { %v6985_v5 = vpop.eup %6984 }
 0x9f0   : > { %v2410_v6 = vsel %vm2078_vm3, %v6985_v5, 0.0 }
 0x9f1   : > { %2411 = vadd.xlane.f32.xlu1 %v2410_v6 }
 0x9f3   : > { %v6987_v7 = vpop.eup %6986 }
 0x9f4   : > { %v2413_v8 = vsel %vm2078_vm3, %v6987_v7, 0.0 }
 0x9f5   : > { %2414 = vadd.xlane.f32.xlu1 %v2413_v8 }
 0xa06   : > { %2583 = vrot.lane.b32.xlu1 %v9413_v37, %s8338_s13 }
 0xa0a   : > { %2531 = vrot.lane.b32.xlu1 %v9421_v47, %s8338_s13 }
 0xa7e   : > { %v2412_v10 = vpop.xlane.xlu1 %2411 }
 0xa7f   : > { %6988 = vrcp.f32 %v2412_v10 }
 0xa82   : > { %v2415_v11 = vpop.xlane.xlu1 %2414 }
 0xa83   : > { %6990 = vrcp.f32 %v2415_v11 }
 0xa86   : > { %v2584_v18 = vpop.permute.xlu1 %2583 }
 0xa87   : > { %v2589_v22 = vsel %vm2078_vm3, %v2584_v18, 0 }
 0xa89   : > { %v6989_v12 = vpop.eup %6988 }
 0xa8a   : > { %v2418_v13 = vmul.f32 %v6989_v12, %v6985_v5  ;;  %v2532_v23 = vpop.permute.xlu1 %2531 }
 0xa8c   : > { %v2420_v14 = vpack.c.bf16 %v2418_v13, %v2418_v13 }
 0xa8d   : > { %v6991_v15 = vpop.eup %6990 }
 0xa8e   : > { %v2419_v17 = vmul.f32 %v6991_v15, %v6987_v7  ;;  %6260 = vmatmul.mubr.msk.bf16.vlgmr.msra.gmra.mrb[20].mxu0 %vm2078_vm3, %v2420_v14 }
 0xa8f   : > { %6270 = vmatpush3.bf16.xpose.msra.mxu0 %v2539_v16  ;;  %6271 = vmatprep.mubr.msk.bf16.mxu0 %vm8335_vm0, %v8334_v0 }
 0xa90   : > { %v2421_v21 = vpack.c.bf16 %v2419_v17, %v2419_v17  ;;  %6281 = vmatprep.subr.bf16.mxu0 %v8334_v0 }
 0xa92   : > { %6266 = vmatmul.mubr.msk.bf16.vlgmr.msra.gmra.mrb[20].mxu1 %vm2078_vm3, %v2421_v21 }
 0xa93   : > { %6276 = vmatpush3.bf16.xpose.msra.mxu1 %v2589_v22  ;;  %6277 = vmatprep.mubr.msk.bf16.mxu1 %vm8335_vm0, %v8334_v0 }
 0xa94   : > { %6287 = vmatprep.subr.bf16.mxu1 %v8334_v0 }
 0xa96   : > { %6272 = vmatmul.mubr.msk.bf16.vlgmr.msra.gmra.mrb[24].mxu0 %vm2078_vm3, %v2532_v23 }
 0xa97   : > { %6283 = vmatprep.mubr.msk.bf16.mxu0 %vm8335_vm0, %v8334_v0 }
 0xa9a   : > { %6278 = vmatmul.mubr.msk.bf16.vlgmr.msra.gmra.mrb[24].mxu1 %vm2078_vm3, %v2582_v24 }
 0xa9b   : > { %6289 = vmatprep.mubr.msk.bf16.mxu1 %vm8335_vm0, %v8334_v0 }
 0xb61   : > { %v9525_v25 = vpop.f32.mrb[20].mxu0 }
 0xb62   : > { %v6261_v26 = vpop.f32.mrb[21].mxu0 }
 0xb63   : > { %v2468_v27 = vpop.f32.mrb[22].mxu0 }
 0xb64   : > { %v6262_v28 = vpop.f32.mrb[23].mxu0 }
 0xb65   : > { %v9527_v29 = vpop.f32.mrb[20].mxu1 }
 0xb66   : > { %v6267_v30 = vpop.f32.mrb[21].mxu1 }
 0xb67   : > { %v2517_v31 = vpop.f32.mrb[22].mxu1 }
 0xb68   : > { %v6268_v33 = vpop.f32.mrb[23].mxu1 }
 0xb69   : > { %v2575_v34 = vpop.f32.mrb[24].mxu0 }
 0xb6a   : > { %v9529_v35 = vmul.f32 0.35355338, %v2575_v34  ;;  %v6273_v36 = vpop.f32.mrb[25].mxu0 }
 0xb6b   : > { %v2578_v38 = vpop.f32.mrb[26].mxu0 }
 0xb6c   : > { %v6274_v39 = vpop.f32.mrb[27].mxu0  ;;  %v2633_v40 = vsel %vm2078_vm3, %v9529_v35, -inf }
 0xb6d   : > { %v2625_v42 = vpop.f32.mrb[24].mxu1  ;;  %2634 = vmax.xlane.f32.xlu1 %v2633_v40 }
 0xb6e   : > { %v9533_v43 = vmul.f32 0.35355338, %v2625_v42  ;;  %v6279_v44 = vpop.f32.mrb[25].mxu1 }
 0xb6f   : > { %v2628_v45 = vpop.f32.mrb[26].mxu1 }
 0xb70   : > { %v6280_v46 = vpop.f32.mrb[27].mxu1  ;;  %v2636_v50 = vsel %vm2078_vm3, %v9533_v43, -inf }
 0xb71   : > { %2637 = vmax.xlane.f32.xlu0 %v2636_v50 }
 0xb7e   : > { %2705 = vrot.lane.b32.xlu1 %v9427_v52, %s8338_s13 }
 0xb87   : > { %2657 = vrot.lane.b32.xlu0 %v9423_v48, %s8338_s13 }
 0xbfa   : > { %v2635_v53 = vpop.xlane.xlu1 %2634 }
 0xbfb   : > { %v2639_v54 = vsub.f32 %v9529_v35, %v2635_v53 }
 0xbfd   : > { %v2641_v55 = vmul.f32 1.442695, %v2639_v54 }
 0xbfe   : > { %v2638_v57 = vpop.xlane.xlu0 %2637  ;;  %v2706_v58 = vpop.permute.xlu1 %2705 }
 0xbff   : > { %6992 = vpow2.f32 %v2641_v55  ;;  %v2640_v59 = vsub.f32 %v9533_v43, %v2638_v57  ;;  %v2711_v61 = vsel %vm2200_vm4, %v2706_v58, 0 }
 0xc00   : > { %6288 = vmatpush3.bf16.msra.mxu1 %v2711_v61 }
 0xc01   : > { %v2643_v62 = vmul.f32 1.442695, %v2640_v59  ;;  %6299 = vmatprep.subr.bf16.mxu1 %v8334_v0 }
 0xc02   : > { %v2658_v63 = vpop.permute.xlu0 %2657 }
 0xc03   : > { %6994 = vpow2.f32 %v2643_v62  ;;  %v2663_v1 = vsel %vm2200_vm4, %v2658_v63, 0 }
 0xc04   : > { %6282 = vmatpush3.bf16.msra.mxu0 %v2663_v1 }
 0xc05   : > { %6293 = vmatprep.subr.bf16.mxu0 %v8334_v0 }
 0xc09   : > { %v6993_v2 = vpop.eup %6992 }
 0xc0a   : > { %v2645_v3 = vsel %vm2078_vm3, %v6993_v2, 0.0 }
 0xc0b   : > { %2646 = vadd.xlane.f32.xlu0 %v2645_v3 }
 0xc0d   : > { %v6995_v4 = vpop.eup %6994 }
 0xc0e   : > { %v2648_v5 = vsel %vm2078_vm3, %v6995_v4, 0.0 }
 0xc0f   : > { %2649 = vadd.xlane.f32.xlu1 %v2648_v5 }
 0xc20   : > { %2766 = vrot.lane.b32.xlu1 %v9411_v32, %s8339_s20 }
 0xc21   : > { %2816 = vrot.lane.b32.xlu0 %v9413_v37, %s8339_s20 }
 0xc24   : > { %2764 = vrot.lane.b32.xlu1 %v9421_v47, %s8339_s20 }
 0xc25   : > { %2814 = vrot.lane.b32.xlu0 %v9425_v51, %s8339_s20 }
 0xc98   : > { %v2647_v6 = vpop.xlane.xlu0 %2646 }
 0xc99   : > { %6996 = vrcp.f32 %v2647_v6 }
 0xc9c   : > { %v2650_v7 = vpop.xlane.xlu1 %2649  ;;  %v2817_v37 = vpop.permute.xlu0 %2816 }
 0xc9d   : > { %6998 = vrcp.f32 %v2650_v7  ;;  %v2822_v51 = vsel %vm2078_vm3, %v2817_v37, 0 }
 0xca0   : > { %v2767_v10 = vpop.permute.xlu1 %2766  ;;  %v2815_v15 = vpop.permute.xlu0 %2814 }
 0xca1   : > { %v2772_v32 = vsel %vm2078_vm3, %v2767_v10, 0 }
 0xca3   : > { %v6997_v8 = vpop.eup %6996 }
 0xca4   : > { %v2653_v9 = vmul.f32 %v6997_v8, %v6993_v2  ;;  %v2765_v14 = vpop.permute.xlu1 %2764 }
 0xca6   : > { %v2655_v11 = vpack.c.bf16 %v2653_v9, %v2653_v9 }
 0xca7   : > { %v6999_v12 = vpop.eup %6998 }
 0xca8   : > { %v2654_v13 = vmul.f32 %v6999_v12, %v6995_v4  ;;  %6284 = vmatmul.mubr.msk.bf16.vlgmr.msra.gmra.mrb[28].mxu0 %vm2078_vm3, %v2655_v11  ;;  %v6938_v11 = vld [vmem:[#allocation23] sm:$0xff]   ;;  %v6939_v12 = vld [vmem:[#allocation23 + $0x8] sm:$0xff]  }
 0xca9   : > { %6294 = vmatpush3.bf16.xpose.msra.mxu0 %v2772_v32  ;;  %6295 = vmatprep.mubr.msk.bf16.mxu0 %vm8335_vm0, %v8334_v0 }
 0xcaa   : > { %v2656_v47 = vpack.c.bf16 %v2654_v13, %v2654_v13  ;;  %6305 = vmatprep.subr.bf16.mxu0 %v8334_v0 }
 0xcac   : > { %6290 = vmatmul.mubr.msk.bf16.vlgmr.msra.gmra.mrb[28].mxu1 %vm2078_vm3, %v2656_v47 }
 0xcad   : > { %6300 = vmatpush3.bf16.xpose.msra.mxu1 %v2822_v51  ;;  %6301 = vmatprep.mubr.msk.bf16.mxu1 %vm8335_vm0, %v8334_v0 }
 0xcae   : > { %6311 = vmatprep.subr.bf16.mxu1 %v8334_v0 }
 0xcb0   : > { %6296 = vmatmul.mubr.msk.bf16.vlgmr.msra.gmra.mrb[32].mxu0 %vm2078_vm3, %v2765_v14 }
 0xcb1   : > { %6307 = vmatprep.mubr.msk.bf16.mxu0 %vm8335_vm0, %v8334_v0 }
 0xcb4   : > { %6302 = vmatmul.mubr.msk.bf16.vlgmr.msra.gmra.mrb[32].mxu1 %vm2078_vm3, %v2815_v15 }
 0xcb5   : > { %6313 = vmatprep.mubr.msk.bf16.mxu1 %vm8335_vm0, %v8334_v0 }
 0xd7b   : > { %v2699_v16 = vpop.f32.mrb[28].mxu0 }
 0xd7c   : > { %v6285_v17 = vpop.f32.mrb[29].mxu0 }
 0xd7d   : > { %v2702_v18 = vpop.f32.mrb[30].mxu0 }
 0xd7e   : > { %v6286_v21 = vpop.f32.mrb[31].mxu0 }
 0xd7f   : > { %v2747_v22 = vpop.f32.mrb[28].mxu1 }
 0xd80   : > { %v6291_v23 = vpop.f32.mrb[29].mxu1 }
 0xd81   : > { %v2750_v24 = vpop.f32.mrb[30].mxu1 }
 0xd82   : > { %v6292_v26 = vpop.f32.mrb[31].mxu1  ;;  %v6940_v24 = vld [vmem:[#allocation29] sm:$0xff]  }
 0xd83   : > { %v2808_v27 = vpop.f32.mrb[32].mxu0  ;;  %v6941_v26 = vld [vmem:[#allocation29 + $0x8] sm:$0xff]  }
 0xd84   : > { %v9573_v28 = vmul.f32 0.35355338, %v2808_v27  ;;  %v6297_v30 = vpop.f32.mrb[33].mxu0 }
 0xd85   : > { %v2811_v31 = vpop.f32.mrb[34].mxu0  ;;  %v5966_v30 = vld [vmem:[#allocation24] ss:$0 sm:$0xff] }
 0xd86   : > { %v6298_v33 = vpop.f32.mrb[35].mxu0  ;;  %v2866_v34 = vsel %vm2078_vm3, %v9573_v28, -inf }
 0xd87   : > { %v2858_v36 = vpop.f32.mrb[32].mxu1  ;;  %2867 = vmax.xlane.f32.xlu1 %v2866_v34  ;;  %v5967_v34 = vld [vmem:[#allocation26] ss:$0 sm:$0xff] }
 0xd88   : > { %v9577_v38 = vmul.f32 0.35355338, %v2858_v36  ;;  %v6303_v39 = vpop.f32.mrb[33].mxu1 }
 0xd89   : > { %v2861_v40 = vpop.f32.mrb[34].mxu1 }
 0xd8a   : > { %v6304_v42 = vpop.f32.mrb[35].mxu1  ;;  %v2869_v44 = vsel %vm2078_vm3, %v9577_v38, -inf }
 0xd8b   : > { %2870 = vmax.xlane.f32.xlu0 %v2869_v44 }
 0xe14   : > { %v2868_v45 = vpop.xlane.xlu1 %2867 }
 0xe15   : > { %v2872_v46 = vsub.f32 %v9573_v28, %v2868_v45 }
 0xe17   : > { %v2874_v50 = vmul.f32 1.442695, %v2872_v46  ;;  %v5968_v46 = vld [vmem:[#allocation27] ss:$0 sm:$0xff] }
 0xe18   : > { %v2871_v53 = vpop.xlane.xlu0 %2870 }
 0xe19   : > { %7000 = vpow2.f32 %v2874_v50  ;;  %v2873_v54 = vsub.f32 %v9577_v38, %v2871_v53 }
 0xe1b   : > { %v2876_v55 = vmul.f32 1.442695, %v2873_v54 }
 0xe1d   : > { %7002 = vpow2.f32 %v2876_v55 }
 0xe23   : > { %v7001_v57 = vpop.eup %7000 }
 0xe24   : > { %v2878_v58 = vsel %vm2078_vm3, %v7001_v57, 0.0 }
 0xe25   : > { %2879 = vadd.xlane.f32.xlu0 %v2878_v58  ;;  %v6945_v58 = vld [vmem:[#allocation32 + $0x18] sm:$0xff]  }
 0xe27   : > { %v7003_v59 = vpop.eup %7002 }
 0xe28   : > { %v2881_v61 = vsel %vm2078_vm3, %v7003_v59, 0.0 }
 0xe29   : > { %2882 = vadd.xlane.f32.xlu1 %v2881_v61 }
 0xe3a   : > { %2938 = vrot.lane.b32.xlu1 %v9427_v52, %s8339_s20 }
 0xe3b   : > { %2890 = vrot.lane.b32.xlu0 %v9423_v48, %s8339_s20 }
 0xe3e   : > { %2522 = vrot.lane.b32.xlu1 %v9525_v25, %s8340_s18 }
 0xe3f   : > { %2524 = vrot.lane.b32.xlu0 %v9527_v29, %s8340_s18 }
 0xe42   : > { %2755 = vrot.lane.b32.xlu1 %v2699_v16, %s8341_s19 }
 0xe43   : > { %2757 = vrot.lane.b32.xlu0 %v2747_v22, %s8341_s19 }
 0xeb2   : > { %v2880_v62 = vpop.xlane.xlu0 %2879 }
 0xeb3   : > { %7004 = vrcp.f32 %v2880_v62 }
 0xeb6   : > { %v2891_v63 = vpop.permute.xlu0 %2890  ;;  %v2883_v1 = vpop.xlane.xlu1 %2882 }
 0xeb7   : > { %v2896_v52 = vsel %vm2200_vm4, %v2891_v63, 0  ;;  %7006 = vrcp.f32 %v2883_v1 }
 0xeb8   : > { %6306 = vmatpush3.bf16.msra.mxu0 %v2896_v52 }
 0xeb9   : > { %6317 = vmatprep.subr.bf16.mxu0 %v8334_v0 }
 0xeba   : > { %v2525_v48 = vpop.permute.xlu0 %2524  ;;  %v2939_v25 = vpop.permute.xlu1 %2938 }
 0xebb   : > { %2530 = vst.msk [vmem:[#allocation2 + $0x8] sm:$0xff] %vm2528_vm5, %v2525_v48  ;;  %v2944_v29 = vsel %vm2200_vm4, %v2939_v25, 0 }
 0xebc   : > { %6312 = vmatpush3.bf16.msra.mxu1 %v2944_v29 }
 0xebd   : > { %v7005_v2 = vpop.eup %7004  ;;  %6325 = vmatprep.subr.bf16.mxu1 %v8334_v0 }
 0xebe   : > { %v2886_v3 = vmul.f32 %v7005_v2, %v7001_v57  ;;  %v2758_v4 = vpop.permute.xlu0 %2757  ;;  %v2523_v5 = vpop.permute.xlu1 %2522  ;;  %v6944_v57 = vld [vmem:[#allocation32 + $0x10] sm:$0xff]  }
 0xebf   : > { %2763 = vst.msk [vmem:[#allocation2 + $0x8] sm:$0xff] %vm2761_vm6, %v2758_v4 }
 0xec0   : > { %2529 = vst.msk [vmem:[#allocation2] sm:$0xff] %vm2528_vm5, %v2523_v5  ;;  %v2888_v6 = vpack.c.bf16 %v2886_v3, %v2886_v3 }
 0xec1   : > { %v7007_v7 = vpop.eup %7006 }
 0xec2   : > { %v2887_v8 = vmul.f32 %v7007_v7, %v7003_v59  ;;  %6308 = vmatmul.mubr.msk.bf16.vlgmr.msra.gmra.mrb[36].mxu0 %vm2078_vm3, %v2888_v6  ;;  %v2756_v9 = vpop.permute.xlu1 %2755  ;;  %v5969_v59 = vld [vmem:[#allocation30] ss:$0 sm:$0xff] }
 0xec3   : > { %2762 = vst.msk [vmem:[#allocation2] sm:$0xff] %vm2761_vm6, %v2756_v9  ;;  %6321 = vmatprep.mubr.msk.bf16.mxu0 %vm8335_vm0, %v8334_v0  ;;  %6318 = vmatpush3.bf16.msra.mxu0 %v6938_v11 }
 0xec4   : > { %v2889_v10 = vpack.c.bf16 %v2887_v8, %v2887_v8  ;;  %6319 = vmatprep.subr.bf16.mxu0 %v8334_v0 }
 0xec6   : > { %6314 = vmatmul.mubr.msk.bf16.vlgmr.msra.gmra.mrb[36].mxu1 %vm2078_vm3, %v2889_v10 }
 0xec7   : > { %6329 = vmatprep.mubr.msk.bf16.mxu1 %vm8335_vm0, %v8334_v0  ;;  %6320 = vmatpush3.bf16.msra.mxu0 %v6939_v12 }
 0xec8   : > { %6333 = vmatprep.subr.bf16.mxu0 %v8334_v0  ;;  %6326 = vmatpush3.bf16.msra.mxu1 %v6940_v24 }
 0xec9   : > { %6327 = vmatprep.subr.bf16.mxu1 %v8334_v0 }
 0xecc   : > { %6328 = vmatpush3.bf16.msra.mxu1 %v6941_v26  ;;  %v5979_v26 = vld [vmem:[#allocation35] ss:$0 sm:$0xff] }
 0xecd   : > { %6345 = vmatprep.subr.bf16.mxu1 %v8334_v0 }
 0xf95   : > { %v2932_v13 = vpop.f32.mrb[36].mxu0 }
 0xf96   : > { %2988 = vrot.lane.b32.xlu1 %v2932_v13, %s8342_s11  ;;  %v6309_v32 = vpop.f32.mrb[37].mxu0 }
 0xf97   : > { %v2935_v37 = vpop.f32.mrb[38].mxu0 }
 0xf98   : > { %v6310_v47 = vpop.f32.mrb[39].mxu0 }
 0xf99   : > { %v2980_v51 = vpop.f32.mrb[36].mxu1 }
 0xf9a   : > { %2990 = vrot.lane.b32.xlu0 %v2980_v51, %s8342_s11  ;;  %v6315_v14 = vpop.f32.mrb[37].mxu1 }
 0xf9b   : > { %v2983_v15 = vpop.f32.mrb[38].mxu1 }
 0xf9c   : > { %v6316_v16 = vpop.f32.mrb[39].mxu1  ;;  %v6946_v15 = vld [vmem:[#allocation38] sm:$0xff]  }
 0xf9d   : > { %v6947_v16 = vld [vmem:[#allocation44] sm:$0xff]  }
0x1008   : > { %v2989_v17 = vpop.permute.xlu1 %2988 }
0x1009   : > { %2995 = vst.msk [vmem:[#allocation2] sm:$0xff] %vm2994_vm7, %v2989_v17  ;;  %v6948_v17 = vld [vmem:[#allocation38 + $0x8] sm:$0xff]  }
0x100c   : > { %v2991_v18 = vpop.permute.xlu0 %2990 }
0x100d   : > { %2996 = vst.msk [vmem:[#allocation2 + $0x8] sm:$0xff] %vm2994_vm7, %v2991_v18  ;;  %v6949_v18 = vld [vmem:[#allocation44 + $0x8] sm:$0xff]  }
0x1010   : > { %v2997_v21 = vld [vmem:[#allocation2] sm:$0xff] }
0x1014   : > { %v2998_v22 = vld [vmem:[#allocation2 + $0x8] sm:$0xff] }
0x1015   : > { %v3003_v23 = vpack.c.bf16 %v2998_v22, %v2997_v21  ;;  %v5978_v21 = vld [vmem:[#allocation33] ss:$0 sm:$0xff] }
0x1017   : > { %6322 = vmatmul.mubr.msk.bf16.vlgmr.msra.gmra.mrb[40].mxu0 %vm1899_vm2, %v3003_v23 }
0x1018   : > { %6341 = vmatprep.mubr.msk.bf16.mxu0 %vm8335_vm0, %v8334_v0 }
0x10ea   : > { %v3053_v27 = vpop.f32.mrb[40].mxu0 }
0x10eb   : > { %v3060_v31 = vadd.f32 %v3053_v27, %v9394_v19  ;;  %v6323_v33 = vpop.f32.mrb[41].mxu0  ;;  %v6942_v19 = vld [vmem:[#allocation32] sm:$0xff]  }
0x10ec   : > { %v3056_v36 = vpop.f32.mrb[42].mxu0  ;;  %6334 = vmatpush3.bf16.msra.mxu0 %v6942_v19 }
0x10ed   : > { %v3069_v39 = vadd.f32 %v5966_v30, %v3060_v31  ;;  %v3061_v40 = vadd.f32 %v3056_v36, %v9396_v20  ;;  %v6324_v42 = vpop.f32.mrb[43].mxu0  ;;  %v6943_v20 = vld [vmem:[#allocation32 + $0x8] sm:$0xff]   ;;  %6335 = vmatprep.subr.bf16.mxu0 %v8334_v0 }
0x10ef   : > { %v3078_v44 = vmul.f32 %v5967_v34, %v3069_v39  ;;  %v3070_v45 = vadd.f32 %v5966_v30, %v3061_v40  ;;  %v5980_v39 = vld [vmem:[#allocation36] ss:$0 sm:$0xff] }
0x10f0   : > { %6336 = vmatpush3.bf16.msra.mxu0 %v6943_v20 }
0x10f1   : > { %v3079_v50 = vmul.f32 %v5967_v34, %v3070_v45  ;;  %v9622_v53 = vadd.f32 %v5968_v46, %v3078_v44  ;;  %6337 = vmatprep.subr.bf16.mxu0 %v8334_v0  ;;  %v6950_v45 = vld [vmem:[#allocation41] sm:$0xff]  }
0x10f3   : > { %v9624_v54 = vadd.f32 %v5968_v46, %v3079_v50  ;;  %v6951_v50 = vld [vmem:[#allocation41 + $0x8] sm:$0xff]  }
0x10f4   : > { %6338 = vmatpush3.bf16.msra.mxu0 %v6944_v57 }
0x10f5   : > { %v3093_v55 = vpack.c.bf16 %v9624_v54, %v9622_v53  ;;  %6339 = vmatprep.subr.bf16.mxu0 %v8334_v0 }
0x10f7   : > { %6330 = vmatmul.mubr.msk.bf16.vlgmr.msra.gmra.mrb[40].mxu1 %vm1899_vm2, %v3093_v55 }
0x10f8   : > { %6349 = vmatprep.mubr.msk.bf16.mxu1 %vm8335_vm0, %v8334_v0  ;;  %6340 = vmatpush3.bf16.msra.mxu0 %v6945_v58 }
0x10f9   : > { %6361 = vmatprep.subr.bf16.mxu0 %v8334_v0  ;;  %6346 = vmatpush3.bf16.msra.mxu1 %v6946_v15 }
0x10fa   : > { %6347 = vmatprep.subr.bf16.mxu1 %v8334_v0 }
0x10fd   : > { %6348 = vmatpush3.bf16.msra.mxu1 %v6948_v17 }
0x10fe   : > { %6353 = vmatprep.subr.bf16.mxu1 %v8334_v0 }
0x11ca   : > { %v3150_v61 = vpop.f32.mrb[40].mxu1 }
0x11cb   : > { %v3151_v62 = vadd.f32 %v5969_v59, %v3150_v61  ;;  %v6331_v63 = vpop.f32.mrb[41].mxu1  ;;  %v5985_v61 = vld [vmem:[#allocation42] ss:$0 sm:$0xff] }
0x11cc   : > { %v3153_v1 = vpop.f32.mrb[42].mxu1 }
0x11cd   : > { %v3159_v52 = vmul.f32 0.044715, %v3151_v62  ;;  %v3154_v48 = vadd.f32 %v5969_v59, %v3153_v1  ;;  %v6332_v25 = vpop.f32.mrb[43].mxu1  ;;  %v3157_v13 = vmul.f32 0.5, %v3151_v62 }
0x11cf   : > { %v3161_v29 = vmul.f32 %v3159_v52, %v3151_v62  ;;  %v3160_v2 = vmul.f32 0.044715, %v3154_v48  ;;  %v3158_v32 = vmul.f32 0.5, %v3154_v48  ;;  %v5989_v52 = vld [vmem:[#allocation45] ss:$0 sm:$0xff] }
0x11d1   : > { %v3163_v3 = vmul.f32 %v3161_v29, %v3151_v62  ;;  %v3162_v4 = vmul.f32 %v3160_v2, %v3154_v48 }
0x11d3   : > { %v3165_v5 = vadd.f32 %v3163_v3, %v3151_v62  ;;  %v3164_v6 = vmul.f32 %v3162_v4, %v3154_v48  ;;  %v5981_v3 = vld [vmem:[#allocation39] ss:$0 sm:$0xff] }
0x11d5   : > { %v3167_v7 = vmul.f32 0.7978846, %v3165_v5  ;;  %v3166_v8 = vadd.f32 %v3164_v6, %v3154_v48 }
0x11d7   : > { %7008 = vtanh.f32 %v3167_v7  ;;  %v3168_v9 = vmul.f32 0.7978846, %v3166_v8 }
0x11d9   : > { %7010 = vtanh.f32 %v3168_v9 }
0x11e1   : > { %v7009_v10 = vpop.eup %7008 }
0x11e2   : > { %v3171_v11 = vadd.f32 1.0, %v7009_v10 }
0x11e3   : > { %v7011_v12 = vpop.eup %7010 }
0x11e4   : > { %v3172_v37 = vadd.f32 1.0, %v7011_v12  ;;  %v3173_v47 = vmul.f32 %v3171_v11, %v3157_v13 }
0x11e6   : > { %v3174_v51 = vmul.f32 %v3172_v37, %v3158_v32 }
0x11e8   : > { %v3183_v14 = vpack.c.bf16 %v3174_v51, %v3173_v47 }
0x11ea   : > { %6342 = vmatmul.mubr.msk.bf16.vlgmr.msra.gmra.mrb[44].mxu0 %vm3208_vm8, %v3183_v14 }
0x11eb   : > { %6365 = vmatprep.mubr.msk.bf16.mxu0 %vm8335_vm0, %v8334_v0  ;;  %6362 = vmatpush3.bf16.msra.mxu0 %v6947_v16 }
0x11ec   : > { %6363 = vmatprep.subr.bf16.mxu0 %v8334_v0 }
0x11ef   : > { %6364 = vmatpush3.bf16.msra.mxu0 %v6949_v18 }
0x11f0   : > { %6375 = vmatprep.subr.bf16.mxu0 %v8334_v0 }
0x12bd   : > { %v3246_v22 = vpop.f32.mrb[44].mxu0 }
0x12be   : > { %v3260_v23 = vadd.f32 %v5978_v21, %v3246_v22  ;;  %v6343_v24 = vpop.f32.mrb[45].mxu0 }
0x12bf   : > { %v3249_v27 = vpop.f32.mrb[46].mxu0 }
0x12c0   : > { %v3262_v30 = vadd.f32 %v3260_v23, %v9622_v53  ;;  %v3261_v31 = vadd.f32 %v5978_v21, %v3249_v27  ;;  %v6344_v33 = vpop.f32.mrb[47].mxu0 }
0x12c2   : > { %v3271_v34 = vmul.f32 %v5979_v26, %v3262_v30  ;;  %v3263_v36 = vadd.f32 %v3261_v31, %v9624_v54 }
0x12c4   : > { %v3272_v40 = vmul.f32 %v5979_v26, %v3263_v36  ;;  %v9644_v42 = vadd.f32 %v5980_v39, %v3271_v34 }
0x12c6   : > { %v9646_v44 = vadd.f32 %v5980_v39, %v3272_v40 }
0x12c8   : > { %v3286_v46 = vpack.c.bf16 %v9646_v44, %v9644_v42 }
0x12ca   : > { %6350 = vmatmul.mubr.msk.bf16.vlgmr.msra.gmra.mrb[44].mxu1 %vm1899_vm2, %v3286_v46  ;;  %6366 = vmatmul.mubr.msk.bf16.vlgmr.msra.gmra.mrb[48].mxu0 %vm1899_vm2, %v3286_v46 }
0x12cb   : > { %6354 = vmatpush3.bf16.msra.mxu1 %v6950_v45  ;;  %6357 = vmatprep.mubr.msk.bf16.mxu1 %vm8335_vm0, %v8334_v0 }
0x12cc   : > { %6355 = vmatprep.subr.bf16.mxu1 %v8334_v0  ;;  %6377 = vmatprep.mubr.msk.bf16.mxu0 %vm8335_vm0, %v8334_v0 }
0x12cf   : > { %6356 = vmatpush3.bf16.msra.mxu1 %v6951_v50 }
0x12d0   : > { %6369 = vmatprep.subr.bf16.mxu1 %v8334_v0 }
0x12d2   : > { %6358 = vmatmul.mubr.msk.bf16.vlgmr.msra.gmra.mrb[48].mxu1 %vm1899_vm2, %v3286_v46 }
0x12d3   : > { %6371 = vmatprep.mubr.msk.bf16.mxu1 %vm8335_vm0, %v8334_v0 }
0x139d   : > { %v3343_v53 = vpop.f32.mrb[44].mxu1  ;;  %v3471_v54 = vpop.f32.mrb[48].mxu0 }
0x139e   : > { %v6351_v55 = vpop.f32.mrb[45].mxu1  ;;  %v6367_v19 = vpop.f32.mrb[49].mxu0  ;;  %v3472_v4 = vadd.f32 %v5989_v52, %v3471_v54  ;;  %v3344_v7 = vadd.f32 %v5981_v3, %v3343_v53 }
0x139f   : > { %v3346_v20 = vpop.f32.mrb[46].mxu1  ;;  %v3474_v57 = vpop.f32.mrb[50].mxu0 }
0x13a0   : > { %v6352_v58 = vpop.f32.mrb[47].mxu1  ;;  %v6368_v59 = vpop.f32.mrb[51].mxu0  ;;  %v3475_v8 = vadd.f32 %v5989_v52, %v3474_v57  ;;  %v9670_v10 = vpack.c.bf16 %v3472_v4, %v3472_v4  ;;  %v3347_v11 = vadd.f32 %v5981_v3, %v3346_v20  ;;  %v9673_v12 = vpack.c.bf16 %v3344_v7, %v3344_v7 }
0x13a2   : > { %v9675_v13 = vpack.c.bf16 %v3475_v8, %v3475_v8  ;;  %v9677_v32 = vpack.c.bf16 %v3347_v11, %v3347_v11  ;;  %v3608_v37 = vsel %vm2200_vm4, %v9670_v10, 0 }
0x13a4   : > { %v3654_v47 = vsel %vm2200_vm4, %v9675_v13, 0 }
0x13a5   : > { %v3407_v62 = vpop.f32.mrb[48].mxu1 }
0x13a6   : > { %v3408_v63 = vadd.f32 %v5985_v61, %v3407_v62  ;;  %v6359_v1 = vpop.f32.mrb[49].mxu1 }
0x13a7   : > { %v3410_v48 = vpop.f32.mrb[50].mxu1 }
0x13a8   : > { %v9661_v25 = vpack.c.bf16 %v3408_v63, %v3408_v63  ;;  %v3411_v29 = vadd.f32 %v5985_v61, %v3410_v48  ;;  %v6360_v2 = vpop.f32.mrb[51].mxu1 }
0x13aa   : > { %v9663_v5 = vpack.c.bf16 %v3411_v29, %v3411_v29  ;;  %v3488_v6 = vsel %vm2078_vm3, %v9661_v25, 0 }
0x13ab   : > { %6370 = vmatpush3.bf16.xpose.msra.mxu1 %v3488_v6 }
0x13ac   : > { %v3534_v9 = vsel %vm2078_vm3, %v9663_v5, 0  ;;  %6381 = vmatprep.subr.bf16.mxu1 %v8334_v0 }
0x13ad   : > { %6376 = vmatpush3.bf16.xpose.msra.mxu0 %v3534_v9 }
0x13ae   : > { %6387 = vmatprep.subr.bf16.mxu0 %v8334_v0 }
0x13b2   : > { %6372 = vmatmul.mubr.msk.bf16.vlgmr.msra.gmra.mrb[52].mxu1 %vm2078_vm3, %v9673_v12 }
0x13b3   : > { %6382 = vmatpush3.bf16.msra.mxu1 %v3608_v37  ;;  %6383 = vmatprep.mubr.msk.bf16.mxu1 %vm8335_vm0, %v8334_v0 }
0x13b4   : > { %6378 = vmatmul.mubr.msk.bf16.vlgmr.msra.gmra.mrb[52].mxu0 %vm2078_vm3, %v9677_v32  ;;  %6393 = vmatprep.subr.bf16.mxu1 %v8334_v0 }
0x13b5   : > { %6388 = vmatpush3.bf16.msra.mxu0 %v3654_v47  ;;  %6389 = vmatprep.mubr.msk.bf16.mxu0 %vm8335_vm0, %v8334_v0 }
0x13b6   : > { %6399 = vmatprep.subr.bf16.mxu0 %v8334_v0 }
0x1485   : > { %v3524_v51 = vpop.f32.mrb[52].mxu1 }
0x1486   : > { %v3576_v14 = vmul.f32 0.35355338, %v3524_v51  ;;  %v6373_v15 = vpop.f32.mrb[53].mxu1 }
0x1487   : > { %v3527_v16 = vpop.f32.mrb[54].mxu1  ;;  %v3570_v17 = vpop.f32.mrb[52].mxu0 }
0x1488   : > { %v3577_v18 = vmul.f32 0.35355338, %v3570_v17  ;;  %v6374_v21 = vpop.f32.mrb[55].mxu1  ;;  %v6379_v22 = vpop.f32.mrb[53].mxu0  ;;  %v3578_v23 = vadd.f32 %v3576_v14, %v9443_v56 }
0x1489   : > { %v3573_v24 = vpop.f32.mrb[54].mxu0 }
0x148a   : > { %v6380_v26 = vpop.f32.mrb[55].mxu0  ;;  %v3580_v27 = vsel %vm2078_vm3, %v3578_v23, -inf  ;;  %v3579_v30 = vadd.f32 %v3577_v18, %v9445_v60 }
0x148b   : > { %3581 = vmax.xlane.f32.xlu1 %v3580_v27 }
0x148c   : > { %v3583_v31 = vsel %vm2078_vm3, %v3579_v30, -inf }
0x148d   : > { %3584 = vmax.xlane.f32.xlu0 %v3583_v31 }
0x1518   : > { %v3582_v33 = vpop.xlane.xlu1 %3581 }
0x1519   : > { %v3586_v34 = vsub.f32 %v3578_v23, %v3582_v33 }
0x151a   : > { %v3585_v36 = vpop.xlane.xlu0 %3584 }
0x151b   : > { %v3588_v39 = vmul.f32 1.442695, %v3586_v34  ;;  %v3587_v40 = vsub.f32 %v3579_v30, %v3585_v36 }
0x151d   : > { %7012 = vpow2.f32 %v3588_v39  ;;  %v3590_v45 = vmul.f32 1.442695, %v3587_v40 }
0x151f   : > { %7014 = vpow2.f32 %v3590_v45 }
0x1527   : > { %v7013_v46 = vpop.eup %7012 }
0x1528   : > { %v3592_v56 = vsel %vm2078_vm3, %v7013_v46, 0.0 }
0x1529   : > { %v7015_v50 = vpop.eup %7014  ;;  %3593 = vadd.xlane.f32.xlu0 %v3592_v56 }
0x152a   : > { %v3595_v53 = vsel %vm2078_vm3, %v7015_v50, 0.0 }
0x152b   : > { %3596 = vadd.xlane.f32.xlu1 %v3595_v53 }
0x153c   : > { %3754 = vrot.lane.b32.xlu1 %v9663_v5, %s8337_s28 }
0x153f   : > { %3702 = vrot.lane.b32.xlu0 %v9661_v25, %s8337_s28 }
0x1540   : > { %3699 = vrot.lane.b32.xlu1 %v9673_v12, %s8337_s28 }
0x1543   : > { %3751 = vrot.lane.b32.xlu0 %v9677_v32, %s8337_s28 }
0x15b6   : > { %v3594_v60 = vpop.xlane.xlu0 %3593 }
0x15b7   : > { %7016 = vrcp.f32 %v3594_v60 }
0x15b8   : > { %v3597_v54 = vpop.xlane.xlu1 %3596 }
0x15b9   : > { %7018 = vrcp.f32 %v3597_v54 }
0x15ba   : > { %v3703_v57 = vpop.permute.xlu0 %3702 }
0x15bb   : > { %v3708_v62 = vsel %vm2078_vm3, %v3703_v57, 0 }
0x15bc   : > { %v3755_v61 = vpop.permute.xlu1 %3754 }
0x15bd   : > { %v3760_v1 = vsel %vm2078_vm3, %v3755_v61, 0 }
0x15be   : > { %v3752_v48 = vpop.permute.xlu0 %3751 }
0x15c0   : > { %v3700_v52 = vpop.permute.xlu1 %3699 }
0x15c1   : > { %v7017_v55 = vpop.eup %7016 }
0x15c2   : > { %v3600_v19 = vmul.f32 %v7017_v55, %v7013_v46 }
0x15c3   : > { %v7019_v20 = vpop.eup %7018 }
0x15c4   : > { %v3601_v58 = vmul.f32 %v7019_v20, %v7015_v50  ;;  %v3602_v59 = vpack.c.bf16 %v3600_v19, %v3600_v19 }
0x15c6   : > { %6384 = vmatmul.mubr.msk.bf16.vlgmr.msra.gmra.mrb[56].mxu1 %vm2078_vm3, %v3602_v59  ;;  %v3603_v63 = vpack.c.bf16 %v3601_v58, %v3601_v58 }
0x15c7   : > { %6394 = vmatpush3.bf16.xpose.msra.mxu1 %v3708_v62  ;;  %6395 = vmatprep.mubr.msk.bf16.mxu1 %vm8335_vm0, %v8334_v0 }
0x15c8   : > { %6390 = vmatmul.mubr.msk.bf16.vlgmr.msra.gmra.mrb[56].mxu0 %vm2078_vm3, %v3603_v63  ;;  %6405 = vmatprep.subr.bf16.mxu1 %v8334_v0 }
0x15c9   : > { %6400 = vmatpush3.bf16.xpose.msra.mxu0 %v3760_v1  ;;  %6401 = vmatprep.mubr.msk.bf16.mxu0 %vm8335_vm0, %v8334_v0 }
0x15ca   : > { %6411 = vmatprep.subr.bf16.mxu0 %v8334_v0 }
0x15ce   : > { %6396 = vmatmul.mubr.msk.bf16.vlgmr.msra.gmra.mrb[60].mxu1 %vm2078_vm3, %v3700_v52 }
0x15cf   : > { %6407 = vmatprep.mubr.msk.bf16.mxu1 %vm8335_vm0, %v8334_v0 }
0x15d0   : > { %6402 = vmatmul.mubr.msk.bf16.vlgmr.msra.gmra.mrb[60].mxu0 %vm2078_vm3, %v3752_v48 }
0x15d1   : > { %6413 = vmatprep.mubr.msk.bf16.mxu0 %vm8335_vm0, %v8334_v0 }
0x1699   : > { %v3644_v29 = vpop.f32.mrb[56].mxu1 }
0x169a   : > { %3696 = vst.msk [vmem:[#allocation2] sm:$0xff] %vm2078_vm3, %v3644_v29  ;;  %v6385_v2 = vpop.f32.mrb[57].mxu1 }
0x169b   : > { %v3647_v3 = vpop.f32.mrb[58].mxu1  ;;  %v3690_v4 = vpop.f32.mrb[56].mxu0 }
0x169c   : > { %3697 = vst.msk [vmem:[#allocation2 + $0x8] sm:$0xff] %vm2078_vm3, %v3690_v4  ;;  %v6386_v6 = vpop.f32.mrb[59].mxu1  ;;  %v6391_v7 = vpop.f32.mrb[57].mxu0 }
0x169d   : > { %v3693_v8 = vpop.f32.mrb[58].mxu0 }
0x169e   : > { %v6392_v9 = vpop.f32.mrb[59].mxu0 }
0x16a1   : > { %v3744_v11 = vpop.f32.mrb[60].mxu1 }
0x16a2   : > { %v3802_v37 = vmul.f32 0.35355338, %v3744_v11  ;;  %v6397_v47 = vpop.f32.mrb[61].mxu1 }
0x16a3   : > { %v3747_v51 = vpop.f32.mrb[62].mxu1  ;;  %v3796_v14 = vpop.f32.mrb[60].mxu0 }
0x16a4   : > { %v3803_v15 = vmul.f32 0.35355338, %v3796_v14  ;;  %v6398_v16 = vpop.f32.mrb[63].mxu1  ;;  %v6403_v17 = vpop.f32.mrb[61].mxu0  ;;  %v3804_v18 = vadd.f32 %v3802_v37, %v9481_v41 }
0x16a5   : > { %v3799_v21 = vpop.f32.mrb[62].mxu0 }
0x16a6   : > { %v6404_v22 = vpop.f32.mrb[63].mxu0  ;;  %v3806_v23 = vsel %vm2078_vm3, %v3804_v18, -inf  ;;  %v3805_v24 = vadd.f32 %v3803_v15, %v9485_v49 }
0x16a7   : > { %3807 = vmax.xlane.f32.xlu1 %v3806_v23 }
0x16a8   : > { %v3809_v26 = vsel %vm2078_vm3, %v3805_v24, -inf }
0x16a9   : > { %3810 = vmax.xlane.f32.xlu0 %v3809_v26 }
0x16b8   : > { %3880 = vrot.lane.b32.xlu1 %v9675_v13, %s8337_s28 }
0x16bf   : > { %3831 = vrot.lane.b32.xlu0 %v9670_v10, %s8337_s28 }
0x1734   : > { %v3808_v27 = vpop.xlane.xlu1 %3807 }
0x1735   : > { %v3812_v30 = vsub.f32 %v3804_v18, %v3808_v27 }
0x1736   : > { %v3811_v31 = vpop.xlane.xlu0 %3810 }
0x1737   : > { %v3814_v41 = vmul.f32 1.442695, %v3812_v30  ;;  %v3813_v33 = vsub.f32 %v3805_v24, %v3811_v31 }
0x1738   : > { %v3881_v34 = vpop.permute.xlu1 %3880 }
0x1739   : > { %7020 = vpow2.f32 %v3814_v41  ;;  %v3816_v36 = vmul.f32 1.442695, %v3813_v33  ;;  %v3886_v49 = vsel %vm2200_vm4, %v3881_v34, 0 }
0x173a   : > { %6412 = vmatpush3.bf16.msra.mxu0 %v3886_v49  ;;  %v3832_v39 = vpop.permute.xlu0 %3831 }
0x173b   : > { %7022 = vpow2.f32 %v3816_v36  ;;  %v3837_v40 = vsel %vm2200_vm4, %v3832_v39, 0  ;;  %6423 = vmatprep.subr.bf16.mxu0 %v8334_v0 }
0x173c   : > { %6406 = vmatpush3.bf16.msra.mxu1 %v3837_v40 }
0x173d   : > { %6417 = vmatprep.subr.bf16.mxu1 %v8334_v0 }
0x1743   : > { %v7021_v45 = vpop.eup %7020 }
0x1744   : > { %v3818_v46 = vsel %vm2078_vm3, %v7021_v45, 0.0 }
0x1745   : > { %v7023_v56 = vpop.eup %7022  ;;  %3819 = vadd.xlane.f32.xlu0 %v3818_v46 }
0x1746   : > { %v3821_v50 = vsel %vm2078_vm3, %v7023_v56, 0.0 }
0x1747   : > { %3822 = vadd.xlane.f32.xlu1 %v3821_v50 }
0x1758   : > { %3940 = vrot.lane.b32.xlu1 %v9661_v25, %s8338_s13 }
0x175b   : > { %3990 = vrot.lane.b32.xlu0 %v9663_v5, %s8338_s13 }
0x175c   : > { %3938 = vrot.lane.b32.xlu1 %v9673_v12, %s8338_s13 }
0x175f   : > { %3988 = vrot.lane.b32.xlu0 %v9677_v32, %s8338_s13 }
0x17d2   : > { %v3820_v53 = vpop.xlane.xlu0 %3819 }
0x17d3   : > { %7024 = vrcp.f32 %v3820_v53 }
0x17d4   : > { %v3823_v60 = vpop.xlane.xlu1 %3822 }
0x17d5   : > { %7026 = vrcp.f32 %v3823_v60 }
0x17d6   : > { %v3991_v59 = vpop.permute.xlu0 %3990 }
0x17d7   : > { %v3996_v63 = vsel %vm2078_vm3, %v3991_v59, 0 }
0x17d8   : > { %v3941_v20 = vpop.permute.xlu1 %3940 }
0x17d9   : > { %v3946_v61 = vsel %vm2078_vm3, %v3941_v20, 0 }
0x17da   : > { %v3989_v52 = vpop.permute.xlu0 %3988 }
0x17dc   : > { %v3939_v1 = vpop.permute.xlu1 %3938 }
0x17dd   : > { %v7025_v54 = vpop.eup %7024 }
0x17de   : > { %v3826_v55 = vmul.f32 %v7025_v54, %v7021_v45 }
0x17df   : > { %v7027_v19 = vpop.eup %7026 }
0x17e0   : > { %v3827_v57 = vmul.f32 %v7027_v19, %v7023_v56  ;;  %v3828_v58 = vpack.c.bf16 %v3826_v55, %v3826_v55 }
0x17e2   : > { %6408 = vmatmul.mubr.msk.bf16.vlgmr.msra.gmra.mrb[64].mxu1 %vm2078_vm3, %v3828_v58  ;;  %v3829_v62 = vpack.c.bf16 %v3827_v57, %v3827_v57 }
0x17e3   : > { %6418 = vmatpush3.bf16.xpose.msra.mxu1 %v3946_v61  ;;  %6419 = vmatprep.mubr.msk.bf16.mxu1 %vm8335_vm0, %v8334_v0 }
0x17e4   : > { %6414 = vmatmul.mubr.msk.bf16.vlgmr.msra.gmra.mrb[64].mxu0 %vm2078_vm3, %v3829_v62  ;;  %6429 = vmatprep.subr.bf16.mxu1 %v8334_v0 }
0x17e5   : > { %6424 = vmatpush3.bf16.xpose.msra.mxu0 %v3996_v63  ;;  %6425 = vmatprep.mubr.msk.bf16.mxu0 %vm8335_vm0, %v8334_v0 }
0x17e6   : > { %6435 = vmatprep.subr.bf16.mxu0 %v8334_v0 }
0x17ea   : > { %6420 = vmatmul.mubr.msk.bf16.vlgmr.msra.gmra.mrb[68].mxu1 %vm2078_vm3, %v3939_v1 }
0x17eb   : > { %6431 = vmatprep.mubr.msk.bf16.mxu1 %vm8335_vm0, %v8334_v0 }
0x17ec   : > { %6426 = vmatmul.mubr.msk.bf16.vlgmr.msra.gmra.mrb[68].mxu0 %vm2078_vm3, %v3989_v52 }
0x17ed   : > { %6437 = vmatprep.mubr.msk.bf16.mxu0 %vm8335_vm0, %v8334_v0 }
0x18b5   : > { %v9763_v48 = vpop.f32.mrb[64].mxu1 }
0x18b6   : > { %v6409_v29 = vpop.f32.mrb[65].mxu1 }
0x18b7   : > { %v3876_v2 = vpop.f32.mrb[66].mxu1  ;;  %v9765_v3 = vpop.f32.mrb[64].mxu0 }
0x18b8   : > { %v6410_v4 = vpop.f32.mrb[67].mxu1  ;;  %v6415_v6 = vpop.f32.mrb[65].mxu0 }
0x18b9   : > { %v3925_v7 = vpop.f32.mrb[66].mxu0 }
0x18ba   : > { %v6416_v8 = vpop.f32.mrb[67].mxu0 }
0x18bd   : > { %v3982_v9 = vpop.f32.mrb[68].mxu1 }
0x18be   : > { %v4038_v11 = vmul.f32 0.35355338, %v3982_v9  ;;  %v6421_v37 = vpop.f32.mrb[69].mxu1 }
0x18bf   : > { %v3985_v47 = vpop.f32.mrb[70].mxu1  ;;  %v4032_v51 = vpop.f32.mrb[68].mxu0 }
0x18c0   : > { %v4039_v14 = vmul.f32 0.35355338, %v4032_v51  ;;  %v6422_v15 = vpop.f32.mrb[71].mxu1  ;;  %v6427_v16 = vpop.f32.mrb[69].mxu0  ;;  %v4040_v17 = vadd.f32 %v4038_v11, %v9529_v35 }
0x18c1   : > { %v4035_v18 = vpop.f32.mrb[70].mxu0 }
0x18c2   : > { %v6428_v21 = vpop.f32.mrb[71].mxu0  ;;  %v4042_v22 = vsel %vm2078_vm3, %v4040_v17, -inf  ;;  %v4041_v23 = vadd.f32 %v4039_v14, %v9533_v43 }
0x18c3   : > { %4043 = vmax.xlane.f32.xlu1 %v4042_v22 }
0x18c4   : > { %v4045_v24 = vsel %vm2078_vm3, %v4041_v23, -inf }
0x18c5   : > { %4046 = vmax.xlane.f32.xlu0 %v4045_v24 }
0x18d4   : > { %4114 = vrot.lane.b32.xlu1 %v9675_v13, %s8338_s13 }
0x18db   : > { %4066 = vrot.lane.b32.xlu0 %v9670_v10, %s8338_s13 }
0x1950   : > { %v4044_v26 = vpop.xlane.xlu1 %4043 }
0x1951   : > { %v4048_v27 = vsub.f32 %v4040_v17, %v4044_v26 }
0x1952   : > { %v4047_v30 = vpop.xlane.xlu0 %4046 }
0x1953   : > { %v4050_v35 = vmul.f32 1.442695, %v4048_v27  ;;  %v4049_v31 = vsub.f32 %v4041_v23, %v4047_v30 }
0x1954   : > { %v4115_v41 = vpop.permute.xlu1 %4114 }
0x1955   : > { %7028 = vpow2.f32 %v4050_v35  ;;  %v4052_v33 = vmul.f32 1.442695, %v4049_v31  ;;  %v4120_v43 = vsel %vm2200_vm4, %v4115_v41, 0 }
0x1956   : > { %6436 = vmatpush3.bf16.msra.mxu0 %v4120_v43  ;;  %v4067_v34 = vpop.permute.xlu0 %4066 }
0x1957   : > { %7030 = vpow2.f32 %v4052_v33  ;;  %v4072_v36 = vsel %vm2200_vm4, %v4067_v34, 0  ;;  %6447 = vmatprep.subr.bf16.mxu0 %v8334_v0 }
0x1958   : > { %6430 = vmatpush3.bf16.msra.mxu1 %v4072_v36 }
0x1959   : > { %6441 = vmatprep.subr.bf16.mxu1 %v8334_v0 }
0x195f   : > { %v7029_v49 = vpop.eup %7028 }
0x1960   : > { %v4054_v39 = vsel %vm2078_vm3, %v7029_v49, 0.0 }
0x1961   : > { %v7031_v40 = vpop.eup %7030  ;;  %4055 = vadd.xlane.f32.xlu0 %v4054_v39 }
0x1962   : > { %v4057_v45 = vsel %vm2078_vm3, %v7031_v40, 0.0 }
0x1963   : > { %4058 = vadd.xlane.f32.xlu1 %v4057_v45 }
0x1974   : > { %4174 = vrot.lane.b32.xlu1 %v9661_v25, %s8339_s20 }
0x1977   : > { %4224 = vrot.lane.b32.xlu0 %v9663_v5, %s8339_s20 }
0x1978   : > { %4172 = vrot.lane.b32.xlu1 %v9673_v12, %s8339_s20 }
0x197b   : > { %4222 = vrot.lane.b32.xlu0 %v9677_v32, %s8339_s20 }
0x19ee   : > { %v4056_v46 = vpop.xlane.xlu0 %4055 }
0x19ef   : > { %7032 = vrcp.f32 %v4056_v46 }
0x19f0   : > { %v4059_v56 = vpop.xlane.xlu1 %4058 }
0x19f1   : > { %7034 = vrcp.f32 %v4059_v56  ;;  %v6952_v56 = vld [vmem:[#allocation47] sm:$0xff]  }
0x19f2   : > { %v4225_v25 = vpop.permute.xlu0 %4224 }
0x19f3   : > { %v4230_v12 = vsel %vm2078_vm3, %v4225_v25, 0 }
0x19f4   : > { %v4175_v54 = vpop.permute.xlu1 %4174 }
0x19f5   : > { %v4180_v20 = vsel %vm2078_vm3, %v4175_v54, 0 }
0x19f6   : > { %v4223_v57 = vpop.permute.xlu0 %4222 }
0x19f8   : > { %v4173_v32 = vpop.permute.xlu1 %4172 }
0x19f9   : > { %v7033_v50 = vpop.eup %7032 }
0x19fa   : > { %v4062_v53 = vmul.f32 %v7033_v50, %v7029_v49  ;;  %v6953_v50 = vld [vmem:[#allocation47 + $0x8] sm:$0xff]  }
0x19fb   : > { %v7035_v60 = vpop.eup %7034 }
0x19fc   : > { %v4063_v55 = vmul.f32 %v7035_v60, %v7031_v40  ;;  %v4064_v19 = vpack.c.bf16 %v4062_v53, %v4062_v53 }
0x19fe   : > { %6432 = vmatmul.mubr.msk.bf16.vlgmr.msra.gmra.mrb[72].mxu1 %vm2078_vm3, %v4064_v19  ;;  %v4065_v5 = vpack.c.bf16 %v4063_v55, %v4063_v55  ;;  %v5213_v19 = vld [vmem:[%s1533_s4] sm:$0x1] }
0x19ff   : > { %6442 = vmatpush3.bf16.xpose.msra.mxu1 %v4180_v20  ;;  %6443 = vmatprep.mubr.msk.bf16.mxu1 %vm8335_vm0, %v8334_v0 }
0x1a00   : > { %6438 = vmatmul.mubr.msk.bf16.vlgmr.msra.gmra.mrb[72].mxu0 %vm2078_vm3, %v4065_v5  ;;  %6453 = vmatprep.subr.bf16.mxu1 %v8334_v0 }
0x1a01   : > { %6448 = vmatpush3.bf16.xpose.msra.mxu0 %v4230_v12  ;;  %6449 = vmatprep.mubr.msk.bf16.mxu0 %vm8335_vm0, %v8334_v0  ;;  %v5214_v12 = vld [vmem:[%s1533_s4 + $0x1] sm:$0x1]  ;;  %s8106_s4 = scalar_lea.vmem %s8105_s16, 64 }
0x1a02   : > { %6459 = vmatprep.subr.bf16.mxu0 %v8334_v0  ;;  %p8108_p13 = scmp.lt.s32.totalorder %s8106_s4, %s8100_s15 }
0x1a04   : > { %p8109_p1 = por %p8108_p13, %p8107_p11 }
0x1a06   : > { %6444 = vmatmul.mubr.msk.bf16.vlgmr.msra.gmra.mrb[76].mxu1 %vm2078_vm3, %v4173_v32  ;;  %p8110_p2 = pnand %p8109_p1, %p8103_p10 }
0x1a07   : > { %6455 = vmatprep.mubr.msk.bf16.mxu1 %vm8335_vm0, %v8334_v0 }
0x1a08   : > { %6450 = vmatmul.mubr.msk.bf16.vlgmr.msra.gmra.mrb[76].mxu0 %vm2078_vm3, %v4223_v57  ;;  %v5252_v57 = vld [vmem:[%s1542_s0] sm:$0x1] }
0x1a09   : > { %6461 = vmatprep.mubr.msk.bf16.mxu0 %vm8335_vm0, %v8334_v0 }
0x1ad1   : > { %v4108_v58 = vpop.f32.mrb[72].mxu1 }
0x1ad2   : > { %v6433_v59 = vpop.f32.mrb[73].mxu1 }
0x1ad3   : > { %v4111_v61 = vpop.f32.mrb[74].mxu1  ;;  %v4156_v62 = vpop.f32.mrb[72].mxu0 }
0x1ad4   : > { %v6434_v63 = vpop.f32.mrb[75].mxu1  ;;  %v6439_v1 = vpop.f32.mrb[73].mxu0 }
0x1ad5   : > { %v4159_v52 = vpop.f32.mrb[74].mxu0 }
0x1ad6   : > { %v6440_v29 = vpop.f32.mrb[75].mxu0  ;;  %v6954_v52 = vld [vmem:[#allocation53] sm:$0xff]  }
0x1ad7   : > { %v6955_v29 = vld [vmem:[#allocation53 + $0x8] sm:$0xff]  }
0x1ad9   : > { %v4216_v2 = vpop.f32.mrb[76].mxu1 }
0x1ada   : > { %v4272_v4 = vmul.f32 0.35355338, %v4216_v2  ;;  %v6445_v6 = vpop.f32.mrb[77].mxu1 }
0x1adb   : > { %v4219_v7 = vpop.f32.mrb[78].mxu1  ;;  %v4266_v8 = vpop.f32.mrb[76].mxu0 }
0x1adc   : > { %v4273_v9 = vmul.f32 0.35355338, %v4266_v8  ;;  %v6446_v11 = vpop.f32.mrb[79].mxu1  ;;  %v6451_v37 = vpop.f32.mrb[77].mxu0  ;;  %v4274_v47 = vadd.f32 %v4272_v4, %v9573_v28  ;;  %v6012_v4 = vld [vmem:[#allocation48] ss:$0 sm:$0xff] }
0x1add   : > { %v4269_v51 = vpop.f32.mrb[78].mxu0  ;;  %v6013_v8 = vld [vmem:[#allocation50] ss:$0 sm:$0xff] }
0x1ade   : > { %v6452_v14 = vpop.f32.mrb[79].mxu0  ;;  %v4276_v15 = vsel %vm2078_vm3, %v4274_v47, -inf  ;;  %v4275_v16 = vadd.f32 %v4273_v9, %v9577_v38 }
0x1adf   : > { %4277 = vmax.xlane.f32.xlu1 %v4276_v15  ;;  %v6014_v15 = vld [vmem:[#allocation51] ss:$0 sm:$0xff] }
0x1ae0   : > { %v4279_v17 = vsel %vm2078_vm3, %v4275_v16, -inf }
0x1ae1   : > { %4280 = vmax.xlane.f32.xlu0 %v4279_v17 }
0x1b6c   : > { %v4278_v18 = vpop.xlane.xlu1 %4277 }
0x1b6d   : > { %v4282_v21 = vsub.f32 %v4274_v47, %v4278_v18 }
0x1b6e   : > { %v4281_v22 = vpop.xlane.xlu0 %4280 }
0x1b6f   : > { %v4284_v23 = vmul.f32 1.442695, %v4282_v21  ;;  %v4283_v24 = vsub.f32 %v4275_v16, %v4281_v22  ;;  %v6958_v22 = vld [vmem:[#allocation56 + $0x10] sm:$0xff]  }
0x1b71   : > { %7036 = vpow2.f32 %v4284_v23  ;;  %v4286_v26 = vmul.f32 1.442695, %v4283_v24  ;;  %v6959_v23 = vld [vmem:[#allocation56 + $0x18] sm:$0xff]  }
0x1b72   : > { %v6015_v24 = vld [vmem:[#allocation54] ss:$0 sm:$0xff] }
0x1b73   : > { %7038 = vpow2.f32 %v4286_v26 }
0x1b7b   : > { %v7037_v27 = vpop.eup %7036 }
0x1b7c   : > { %v4288_v28 = vsel %vm2078_vm3, %v7037_v27, 0.0 }
0x1b7d   : > { %v7039_v30 = vpop.eup %7038  ;;  %4289 = vadd.xlane.f32.xlu0 %v4288_v28 }
0x1b7e   : > { %v4291_v35 = vsel %vm2078_vm3, %v7039_v30, 0.0 }
0x1b7f   : > { %4292 = vadd.xlane.f32.xlu1 %v4291_v35 }
0x1b90   : > { %4348 = vrot.lane.b32.xlu1 %v9675_v13, %s8339_s20 }
0x1b93   : > { %4300 = vrot.lane.b32.xlu0 %v9670_v10, %s8339_s20 }
0x1b94   : > { %3930 = vrot.lane.b32.xlu1 %v9763_v48, %s8340_s18 }
0x1b97   : > { %3932 = vrot.lane.b32.xlu0 %v9765_v3, %s8340_s18 }
0x1b98   : > { %4164 = vrot.lane.b32.xlu1 %v4108_v58, %s8341_s19  ;;  %v5253_v58 = vld [vmem:[%s1542_s0 + $0x1] sm:$0x1] }
0x1b9b   : > { %4166 = vrot.lane.b32.xlu0 %v4156_v62, %s8341_s19 }
0x1c0a   : > { %v4290_v38 = vpop.xlane.xlu0 %4289 }
0x1c0b   : > { %7040 = vrcp.f32 %v4290_v38 }
0x1c0c   : > { %v4293_v31 = vpop.xlane.xlu1 %4292 }
0x1c0d   : > { %7042 = vrcp.f32 %v4293_v31 }
0x1c0e   : > { %v4301_v41 = vpop.permute.xlu0 %4300 }
0x1c0f   : > { %v4306_v13 = vsel %vm2200_vm4, %v4301_v41, 0 }
0x1c10   : > { %v4349_v33 = vpop.permute.xlu1 %4348  ;;  %6454 = vmatpush3.bf16.msra.mxu1 %v4306_v13 }
0x1c11   : > { %v4354_v10 = vsel %vm2200_vm4, %v4349_v33, 0  ;;  %6465 = vmatprep.subr.bf16.mxu1 %v8334_v0 }
0x1c12   : > { %6460 = vmatpush3.bf16.msra.mxu0 %v4354_v10  ;;  %v3933_v48 = vpop.permute.xlu0 %3932 }
0x1c13   : > { %3937 = vst.msk [vmem:[#allocation2 + $0x8] sm:$0xff] %vm2528_vm5, %v3933_v48  ;;  %6473 = vmatprep.subr.bf16.mxu0 %v8334_v0 }
0x1c14   : > { %v3931_v3 = vpop.permute.xlu1 %3930 }
0x1c15   : > { %v7041_v43 = vpop.eup %7040  ;;  %3936 = vst.msk [vmem:[#allocation2] sm:$0xff] %vm2528_vm5, %v3931_v3 }
0x1c16   : > { %v4296_v34 = vmul.f32 %v7041_v43, %v7037_v27  ;;  %v4167_v36 = vpop.permute.xlu0 %4166 }
0x1c17   : > { %v7043_v49 = vpop.eup %7042  ;;  %4171 = vst.msk [vmem:[#allocation2 + $0x8] sm:$0xff] %vm2761_vm6, %v4167_v36 }
0x1c18   : > { %v4297_v39 = vmul.f32 %v7043_v49, %v7039_v30  ;;  %v4165_v40 = vpop.permute.xlu1 %4164  ;;  %v4298_v45 = vpack.c.bf16 %v4296_v34, %v4296_v34 }
0x1c19   : > { %4170 = vst.msk [vmem:[#allocation2] sm:$0xff] %vm2761_vm6, %v4165_v40 }
0x1c1a   : > { %6456 = vmatmul.mubr.msk.bf16.vlgmr.msra.gmra.mrb[80].mxu1 %vm2078_vm3, %v4298_v45  ;;  %v4299_v46 = vpack.c.bf16 %v4297_v39, %v4297_v39 }
0x1c1b   : > { %6469 = vmatprep.mubr.msk.bf16.mxu1 %vm8335_vm0, %v8334_v0  ;;  %6466 = vmatpush3.bf16.msra.mxu1 %v6952_v56 }
0x1c1c   : > { %6462 = vmatmul.mubr.msk.bf16.vlgmr.msra.gmra.mrb[80].mxu0 %vm2078_vm3, %v4299_v46  ;;  %6467 = vmatprep.subr.bf16.mxu1 %v8334_v0 }
0x1c1d   : > { %6477 = vmatprep.mubr.msk.bf16.mxu0 %vm8335_vm0, %v8334_v0  ;;  %6474 = vmatpush3.bf16.msra.mxu0 %v6954_v52 }
0x1c1e   : > { %6475 = vmatprep.subr.bf16.mxu0 %v8334_v0 }
0x1c1f   : > { %6468 = vmatpush3.bf16.msra.mxu1 %v6953_v50 }
0x1c20   : > { %6481 = vmatprep.subr.bf16.mxu1 %v8334_v0 }
0x1c21   : > { %6476 = vmatpush3.bf16.msra.mxu0 %v6955_v29 }
0x1c22   : > { %6493 = vmatprep.subr.bf16.mxu0 %v8334_v0 }
0x1ced   : > { %v4342_v53 = vpop.f32.mrb[80].mxu1 }
0x1cee   : > { %4398 = vrot.lane.b32.xlu1 %v4342_v53, %s8342_s11  ;;  %v6457_v60 = vpop.f32.mrb[81].mxu1 }
0x1cef   : > { %v4345_v54 = vpop.f32.mrb[82].mxu1  ;;  %v4390_v55 = vpop.f32.mrb[80].mxu0 }
0x1cf0   : > { %v6458_v25 = vpop.f32.mrb[83].mxu1  ;;  %4400 = vrot.lane.b32.xlu0 %v4390_v55, %s8342_s11  ;;  %v6463_v20 = vpop.f32.mrb[81].mxu0  ;;  %v6960_v54 = vld [vmem:[#allocation62 + $0x10] sm:$0xff]   ;;  %v6961_v55 = vld [vmem:[#allocation62 + $0x20] sm:$0xff]  }
0x1cf1   : > { %v4393_v5 = vpop.f32.mrb[82].mxu0  ;;  %v6963_v25 = vld [vmem:[#allocation62 + $0x28] sm:$0xff]   ;;  %v6024_v20 = vld [vmem:[#allocation57] ss:$0 sm:$0xff] }
0x1cf2   : > { %v6464_v32 = vpop.f32.mrb[83].mxu0  ;;  %5217 = vperm.xlu1 %6930, %v5213_v19   ;;  %v6962_v19 = vld [vmem:[#allocation62 + $0x18] sm:$0xff]  }
0x1cf4   : > { %5226 = vperm.xlu0 %6929, %v5214_v12  }
0x1cf6   : > { %5256 = vperm.xlu1 %6930, %v5252_v57   ;;  %v6025_v57 = vld [vmem:[#allocation59] ss:$0 sm:$0xff] }
0x1cf8   : > { %5265 = vperm.xlu0 %6929, %v5253_v58  }
0x1d60   : > { %v4399_v59 = vpop.permute.xlu1 %4398 }
0x1d61   : > { %4404 = vst.msk [vmem:[#allocation2] sm:$0xff] %vm2994_vm7, %v4399_v59 }
0x1d62   : > { %v4401_v61 = vpop.permute.xlu0 %4400 }
0x1d63   : > { %4405 = vst.msk [vmem:[#allocation2 + $0x8] sm:$0xff] %vm2994_vm7, %v4401_v61 }
0x1d68   : > { %v4406_v62 = vld [vmem:[#allocation2] sm:$0xff] }
0x1d6a   : > { %v4407_v63 = vld [vmem:[#allocation2 + $0x8] sm:$0xff] }
0x1d6b   : > { %v4412_v1 = vpack.c.bf16 %v4407_v63, %v4406_v62  ;;  %v6026_v63 = vld [vmem:[#allocation60] ss:$0 sm:$0xff] }
0x1d6d   : > { %6470 = vmatmul.mubr.msk.bf16.vlgmr.msra.gmra.mrb[84].mxu1 %vm1899_vm2, %v4412_v1 }
0x1d6e   : > { %6489 = vmatprep.mubr.msk.bf16.mxu1 %vm8335_vm0, %v8334_v0 }
0x1e40   : > { %v4462_v2 = vpop.f32.mrb[84].mxu1 }
0x1e41   : > { %v4469_v6 = vadd.f32 %v4462_v2, %v9644_v42  ;;  %v6471_v7 = vpop.f32.mrb[85].mxu1  ;;  %v6956_v42 = vld [vmem:[#allocation56] sm:$0xff]  }
0x1e42   : > { %v4465_v9 = vpop.f32.mrb[86].mxu1  ;;  %6482 = vmatpush3.bf16.msra.mxu1 %v6956_v42 }
0x1e43   : > { %v4478_v11 = vadd.f32 %v6012_v4, %v4469_v6  ;;  %v4470_v37 = vadd.f32 %v4465_v9, %v9646_v44  ;;  %v6472_v47 = vpop.f32.mrb[87].mxu1  ;;  %v6957_v44 = vld [vmem:[#allocation56 + $0x8] sm:$0xff]   ;;  %6483 = vmatprep.subr.bf16.mxu1 %v8334_v0 }
0x1e45   : > { %v4487_v51 = vmul.f32 %v6013_v8, %v4478_v11  ;;  %v4479_v14 = vadd.f32 %v6012_v4, %v4470_v37 }
0x1e46   : > { %6484 = vmatpush3.bf16.msra.mxu1 %v6957_v44 }
0x1e47   : > { %v4488_v16 = vmul.f32 %v6013_v8, %v4479_v14  ;;  %v9856_v17 = vadd.f32 %v6014_v15, %v4487_v51  ;;  %6485 = vmatprep.subr.bf16.mxu1 %v8334_v0 }
0x1e49   : > { %v9858_v18 = vadd.f32 %v6014_v15, %v4488_v16 }
0x1e4a   : > { %6486 = vmatpush3.bf16.msra.mxu1 %v6958_v22 }
0x1e4b   : > { %v4502_v21 = vpack.c.bf16 %v9858_v18, %v9856_v17  ;;  %6487 = vmatprep.subr.bf16.mxu1 %v8334_v0 }
0x1e4d   : > { %6478 = vmatmul.mubr.msk.bf16.vlgmr.msra.gmra.mrb[84].mxu0 %vm1899_vm2, %v4502_v21 }
0x1e4e   : > { %6497 = vmatprep.mubr.msk.bf16.mxu0 %vm8335_vm0, %v8334_v0  ;;  %6488 = vmatpush3.bf16.msra.mxu1 %v6959_v23 }
0x1e4f   : > { %6509 = vmatprep.subr.bf16.mxu1 %v8334_v0  ;;  %6494 = vmatpush3.bf16.msra.mxu0 %v6960_v54  ;;  %v6975_v54 = vld [vmem:[#allocation62 + $0x78] sm:$0xff]  }
0x1e50   : > { %6495 = vmatprep.subr.bf16.mxu0 %v8334_v0 }
0x1e53   : > { %6496 = vmatpush3.bf16.msra.mxu0 %v6962_v19 }
0x1e54   : > { %6501 = vmatprep.subr.bf16.mxu0 %v8334_v0 }
0x1f20   : > { %v4559_v26 = vpop.f32.mrb[84].mxu0 }
0x1f21   : > { %v4560_v27 = vadd.f32 %v6015_v24, %v4559_v26  ;;  %v6479_v28 = vpop.f32.mrb[85].mxu0 }
0x1f22   : > { %v4562_v30 = vpop.f32.mrb[86].mxu0 }
0x1f23   : > { %v4568_v35 = vmul.f32 0.044715, %v4560_v27  ;;  %v4563_v38 = vadd.f32 %v6015_v24, %v4562_v30  ;;  %v6480_v31 = vpop.f32.mrb[87].mxu0  ;;  %v4566_v45 = vmul.f32 0.5, %v4560_v27 }
0x1f25   : > { %v4570_v41 = vmul.f32 %v4568_v35, %v4560_v27  ;;  %v4569_v13 = vmul.f32 0.044715, %v4563_v38  ;;  %v4567_v46 = vmul.f32 0.5, %v4563_v38 }
0x1f27   : > { %v4572_v33 = vmul.f32 %v4570_v41, %v4560_v27  ;;  %v4571_v10 = vmul.f32 %v4569_v13, %v4563_v38  ;;  %v6966_v13 = vld [vmem:[#allocation62 + $0x8] sm:$0xff]  }
0x1f29   : > { %v4574_v48 = vadd.f32 %v4572_v33, %v4560_v27  ;;  %v4573_v3 = vmul.f32 %v4571_v10, %v4563_v38  ;;  %v6965_v27 = vld [vmem:[#allocation62 + $0x40] sm:$0xff]  }
0x1f2b   : > { %v4576_v43 = vmul.f32 0.7978846, %v4574_v48  ;;  %v4575_v34 = vadd.f32 %v4573_v3, %v4563_v38  ;;  %v6967_v3 = vld [vmem:[#allocation62 + $0x48] sm:$0xff]  }
0x1f2d   : > { %7044 = vtanh.f32 %v4576_v43  ;;  %v4577_v36 = vmul.f32 0.7978846, %v4575_v34  ;;  %v6968_v43 = vld [vmem:[#allocation62 + $0x30] sm:$0xff]  }
0x1f2f   : > { %7046 = vtanh.f32 %v4577_v36  ;;  %v6969_v36 = vld [vmem:[#allocation62 + $0x60] sm:$0xff]  }
0x1f37   : > { %v7045_v49 = vpop.eup %7044 }
0x1f38   : > { %v4580_v39 = vadd.f32 1.0, %v7045_v49 }
0x1f39   : > { %v7047_v40 = vpop.eup %7046 }
0x1f3a   : > { %v4581_v56 = vadd.f32 1.0, %v7047_v40  ;;  %v4582_v50 = vmul.f32 %v4580_v39, %v4566_v45  ;;  %v6970_v39 = vld [vmem:[#allocation62 + $0x38] sm:$0xff]   ;;  %v6971_v40 = vld [vmem:[#allocation62 + $0x68] sm:$0xff]   ;;  %v6972_v45 = vld [vmem:[#allocation62 + $0x50] sm:$0xff]  }
0x1f3c   : > { %v4583_v53 = vmul.f32 %v4581_v56, %v4567_v46 }
0x1f3e   : > { %v4592_v60 = vpack.c.bf16 %v4583_v53, %v4582_v50  ;;  %v6973_v50 = vld [vmem:[#allocation62 + $0x58] sm:$0xff]   ;;  %v6974_v53 = vld [vmem:[#allocation62 + $0x70] sm:$0xff]  }
0x1f40   : > { %6490 = vmatmul.mubr.msk.bf16.vlgmr.msra.gmra.mrb[88].mxu1 %vm3208_vm8, %v4592_v60 }
0x1f41   : > { %6513 = vmatprep.mubr.msk.bf16.mxu1 %vm8335_vm0, %v8334_v0  ;;  %6510 = vmatpush3.bf16.msra.mxu1 %v6961_v55 }
0x1f42   : > { %6511 = vmatprep.subr.bf16.mxu1 %v8334_v0 }
0x1f45   : > { %6512 = vmatpush3.bf16.msra.mxu1 %v6963_v25 }
0x1f46   : > { %6525 = vmatprep.subr.bf16.mxu1 %v8334_v0 }
0x2013   : > { %v4654_v5 = vpop.f32.mrb[88].mxu1 }
0x2014   : > { %v4668_v12 = vadd.f32 %v6024_v20, %v4654_v5  ;;  %v6491_v32 = vpop.f32.mrb[89].mxu1 }
0x2015   : > { %v4657_v58 = vpop.f32.mrb[90].mxu1 }
0x2016   : > { %v4670_v59 = vadd.f32 %v4668_v12, %v9856_v17  ;;  %v4669_v61 = vadd.f32 %v6024_v20, %v4657_v58  ;;  %v6492_v62 = vpop.f32.mrb[91].mxu1  ;;  %v6964_v17 = vld [vmem:[#allocation62] sm:$0xff]  }
0x2018   : > { %v4679_v1 = vmul.f32 %v6025_v57, %v4670_v59  ;;  %v4671_v52 = vadd.f32 %v4669_v61, %v9858_v18 }
0x201a   : > { %v4688_v29 = vadd.f32 %v6026_v63, %v4679_v1  ;;  %v4680_v2 = vmul.f32 %v6025_v57, %v4671_v52  ;;  %v5220_v52 = vlaneseq }
0x201c   : > { %v4722_v4 = vpack.c.bf16 %v4688_v29, %v4688_v29  ;;  %v4689_v6 = vadd.f32 %v6026_v63, %v4680_v2 }
0x201e   : > { %v4726_v7 = vunpack.c.l.b16 %v4722_v4  ;;  %v4723_v8 = vpack.c.bf16 %v4689_v6, %v4689_v6 }
0x2020   : > { %v4727_v9 = vunpack.c.l.b16 %v4723_v8  ;;  %v4728_v11 = vrot.slane %v4726_v7, 1  ;;  %v4845_v37 = vrot.slane %v4726_v7, 2  ;;  %v4965_v47 = vrot.slane %v4726_v7, 4  ;;  %v5218_v8 = vpop.permute.xlu1 %5217 }
0x2021   : > { %v4905_v51 = vrot.slane %v4726_v7, 3  ;;  %v5085_v14 = vrot.slane %v4726_v7, 6  ;;  %v5025_v15 = vrot.slane %v4726_v7, 5  ;;  %v5145_v41 = vrot.slane %v4726_v7, 7 }
0x2022   : > { %v4730_v16 = vsel %vm4729_vm9, %v4727_v9, %v4728_v11  ;;  %v4846_v21 = vrot.slane %v4727_v9, 1  ;;  %v4787_v42 = vrot.slane %v4727_v9, 7  ;;  %v4966_v18 = vrot.slane %v4727_v9, 3 }
0x2023   : > { %v4731_v44 = vpack.c.b16 %v4730_v16, %v4730_v16  ;;  %v4906_v22 = vrot.slane %v4727_v9, 2  ;;  %v5086_v23 = vrot.slane %v4727_v9, 5  ;;  %v5026_v24 = vrot.slane %v4727_v9, 4 }
0x2024   : > { %v4847_v26 = vsel %vm4729_vm9, %v4846_v21, %v4845_v37  ;;  %v4788_v28 = vsel %vm4729_vm9, %v4787_v42, %v4726_v7  ;;  %v4967_v30 = vsel %vm4729_vm9, %v4966_v18, %v4965_v47  ;;  %v5146_v35 = vrot.slane %v4727_v9, 6  ;;  %v5227_v9 = vpop.permute.xlu0 %5226 }
0x2025   : > { %6498 = vmatmul.mubr.msk.bf16.vlgmr.msra.gmra.mrb[88].mxu0 %vm1899_vm2, %v4731_v44  ;;  %v4848_v38 = vpack.c.b16 %v4847_v26, %v4847_v26  ;;  %v4907_v31 = vsel %vm4729_vm9, %v4906_v22, %v4905_v51  ;;  %v5087_v33 = vsel %vm4729_vm9, %v5086_v23, %v5085_v14  ;;  %v5027_v10 = vsel %vm4729_vm9, %v5026_v24, %v5025_v15  ;;  %v5257_v23 = vpop.permute.xlu1 %5256 }
0x2026   : > { %6502 = vmatpush3.bf16.msra.mxu0 %v6964_v17  ;;  %6505 = vmatprep.mubr.msk.bf16.mxu0 %vm8335_vm0, %v8334_v0  ;;  %v5147_v48 = vsel %vm4729_vm9, %v5146_v35, %v5145_v41  ;;  %v4789_v34 = vpack.c.b16 %v4788_v28, %v4788_v28  ;;  %v4968_v49 = vpack.c.b16 %v4967_v30, %v4967_v30  ;;  %v5221_v7 = vshrl.u32 %v5220_v52, 7 }
0x2027   : > { %6514 = vmatmul.mubr.msk.bf16.vlgmr.msra.gmra.mrb[92].mxu1 %vm1899_vm2, %v4848_v38  ;;  %6503 = vmatprep.subr.bf16.mxu0 %v8334_v0  ;;  %v4908_v46 = vpack.c.b16 %v4907_v31, %v4907_v31  ;;  %v5088_v56 = vpack.c.b16 %v5087_v33, %v5087_v33  ;;  %v5028_v60 = vpack.c.b16 %v5027_v10, %v5027_v10  ;;  %v8343_v16 = vmov 1966171168  }
0x2028   : > { %6526 = vmatpush3.bf16.msra.mxu1 %v6965_v27  ;;  %6529 = vmatprep.mubr.msk.bf16.mxu1 %vm8335_vm0, %v8334_v0  ;;  %v5148_v55 = vpack.c.b16 %v5147_v48, %v5147_v48  ;;  %v5222_v15 = vsub.s32 0, %v5221_v7  ;;  %v5237_v17 = vunpack.c.l.s4 %v8343_v16  ;;  %v5266_v24 = vpop.permute.xlu0 %5265 }
0x2029   : > { %6527 = vmatprep.subr.bf16.mxu1 %v8334_v0 }
0x202a   : > { %6504 = vmatpush3.bf16.msra.mxu0 %v6966_v13  ;;  %v5238_v26 = vunpack.c.0.s8 %v5237_v17  ;;  %v5223_v27 = vrot.slane %v5218_v8, %v5222_v15  ;;  %v5232_v28 = vrot.slane %v5227_v9, %v5222_v15  ;;  %v5262_v35 = vrot.slane %v5257_v23, %v5222_v15 }
0x202b   : > { %6517 = vmatprep.subr.bf16.mxu0 %v8334_v0  ;;  %v5271_v38 = vrot.slane %v5266_v24, %v5222_v15 }
0x202c   : > { %6528 = vmatpush3.bf16.msra.mxu1 %v6967_v3  ;;  %v5241_v33 = vsub.s32 %v5238_v26, %v5221_v7  ;;  %v5235_v10 = vcombine.low %v5223_v27, %v5232_v28 }
0x202d   : > { %6506 = vmatmul.mubr.msk.bf16.vlgmr.msra.gmra.mrb[92].mxu0 %vm1899_vm2, %v4789_v34  ;;  %6541 = vmatprep.subr.bf16.mxu1 %v8334_v0 }
0x202e   : > { %6518 = vmatpush3.bf16.msra.mxu0 %v6968_v43  ;;  %6521 = vmatprep.mubr.msk.bf16.mxu0 %vm8335_vm0, %v8334_v0  ;;  %v5274_v43 = vcombine.low %v5262_v35, %v5271_v38  ;;  %v5242_v34 = vrot.slane %v5235_v10, %v5241_v33 }
0x202f   : > { %6530 = vmatmul.mubr.msk.bf16.vlgmr.msra.gmra.mrb[96].mxu1 %vm1899_vm2, %v4968_v49  ;;  %6519 = vmatprep.subr.bf16.mxu0 %v8334_v0  ;;  %v6051_v49 = vld [vmem:[#allocation63] ss:$0 sm:$0xff] }
0x2030   : > { %6542 = vmatpush3.bf16.msra.mxu1 %v6969_v36  ;;  %6545 = vmatprep.mubr.msk.bf16.mxu1 %vm8335_vm0, %v8334_v0 }
0x2031   : > { %6543 = vmatprep.subr.bf16.mxu1 %v8334_v0 }
0x2032   : > { %6520 = vmatpush3.bf16.msra.mxu0 %v6970_v39  ;;  %v5281_v39 = vrot.slane %v5274_v43, %v5241_v33 }
0x2033   : > { %6533 = vmatprep.subr.bf16.mxu0 %v8334_v0 }
0x2034   : > { %6544 = vmatpush3.bf16.msra.mxu1 %v6971_v40 }
0x2035   : > { %6522 = vmatmul.mubr.msk.bf16.vlgmr.msra.gmra.mrb[96].mxu0 %vm1899_vm2, %v4908_v46 }
0x2036   : > { %6534 = vmatpush3.bf16.msra.mxu0 %v6972_v45  ;;  %6537 = vmatprep.mubr.msk.bf16.mxu0 %vm8335_vm0, %v8334_v0 }
0x2037   : > { %6546 = vmatmul.mubr.msk.bf16.vlgmr.msra.gmra.mrb[100].mxu1 %vm1899_vm2, %v5088_v56  ;;  %6535 = vmatprep.subr.bf16.mxu0 %v8334_v0 }
0x203a   : > { %6536 = vmatpush3.bf16.msra.mxu0 %v6973_v50  ;;  %v5249_v50 = vrot.slane %v5242_v34, %v5241_v33 }
0x203b   : > { %6549 = vmatprep.subr.bf16.mxu0 %v8334_v0 }
0x203d   : > { %6538 = vmatmul.mubr.msk.bf16.vlgmr.msra.gmra.mrb[100].mxu0 %vm1899_vm2, %v5028_v60  ;;  %v5288_v60 = vrot.slane %v5281_v39, %v5241_v33 }
0x203e   : > { %6550 = vmatpush3.bf16.msra.mxu0 %v6974_v53  ;;  %6553 = vmatprep.mubr.msk.bf16.mxu0 %vm8335_vm0, %v8334_v0 }
0x203f   : > { %6551 = vmatprep.subr.bf16.mxu0 %v8334_v0 }
0x2042   : > { %6552 = vmatpush3.bf16.msra.mxu0 %v6975_v54 }
0x2045   : > { %6554 = vmatmul.mubr.msk.bf16.vlgmr.msra.gmra.mrb[104].mxu0 %vm1899_vm2, %v5148_v55 }
0x20f8   : > { %v4781_v19 = vpop.f32.mrb[88].mxu0 }
0x20f9   : > { %v6499_v25 = vpop.f32.mrb[89].mxu0 }
0x20fa   : > { %v4784_v20 = vpop.f32.mrb[90].mxu0  ;;  %v4898_v5 = vpop.f32.mrb[92].mxu1 }
0x20fb   : > { %v6500_v12 = vpop.f32.mrb[91].mxu0  ;;  %v6515_v32 = vpop.f32.mrb[93].mxu1 }
0x20fc   : > { %v4901_v57 = vpop.f32.mrb[94].mxu1 }
0x20fd   : > { %v6516_v58 = vpop.f32.mrb[95].mxu1 }
0x2100   : > { %v4839_v59 = vpop.f32.mrb[92].mxu0 }
0x2101   : > { %v4840_v61 = vadd.f32 %v4839_v59, %v4781_v19  ;;  %v6507_v62 = vpop.f32.mrb[93].mxu0 }
0x2102   : > { %v4842_v63 = vpop.f32.mrb[94].mxu0  ;;  %v5018_v1 = vpop.f32.mrb[96].mxu1 }
0x2103   : > { %v6508_v29 = vpop.f32.mrb[95].mxu0  ;;  %v6531_v0 = vpop.f32.mrb[97].mxu1  ;;  %v4904_v2 = vadd.f32 %v4898_v5, %v4840_v61 }
0x2104   : > { %v5021_v4 = vpop.f32.mrb[98].mxu1 }
0x2105   : > { %v6532_v6 = vpop.f32.mrb[99].mxu1 }
0x2108   : > { %v4958_v11 = vpop.f32.mrb[96].mxu0 }
0x2109   : > { %v4964_v37 = vadd.f32 %v4958_v11, %v4904_v2  ;;  %v6523_v47 = vpop.f32.mrb[97].mxu0 }
0x210a   : > { %v4961_v51 = vpop.f32.mrb[98].mxu0  ;;  %v5138_v14 = vpop.f32.mrb[100].mxu1 }
0x210b   : > { %v6524_v21 = vpop.f32.mrb[99].mxu0  ;;  %v6547_v42 = vpop.f32.mrb[101].mxu1  ;;  %v5024_v18 = vadd.f32 %v5018_v1, %v4964_v37 }
0x210c   : > { %v5141_v44 = vpop.f32.mrb[102].mxu1 }
0x210d   : > { %v6548_v22 = vpop.f32.mrb[103].mxu1 }
0x2110   : > { %v5078_v30 = vpop.f32.mrb[100].mxu0 }
0x2111   : > { %v5084_v31 = vadd.f32 %v5078_v30, %v5024_v18  ;;  %v6539_v41 = vpop.f32.mrb[101].mxu0 }
0x2112   : > { %v5081_v13 = vpop.f32.mrb[102].mxu0 }
0x2113   : > { %v6540_v48 = vpop.f32.mrb[103].mxu0  ;;  %v5144_v3 = vadd.f32 %v5138_v14, %v5084_v31 }
0x2118   : > { %v5198_v36 = vpop.f32.mrb[104].mxu0 }
0x2119   : > { %v5204_v40 = vadd.f32 %v5198_v36, %v5144_v3  ;;  %v6555_v45 = vpop.f32.mrb[105].mxu0 }
0x211a   : > { %v5201_v46 = vpop.f32.mrb[106].mxu0 }
0x211b   : > { %v5212_v56 = vadd.f32 %v6051_v49, %v5204_v40  ;;  %v6556_v53 = vpop.f32.mrb[107].mxu0 }
0x211d   : > { %v5251_v54 = vmul.f32 %v5249_v50, %v5212_v56 }
0x211f   : > { %v5290_v55 = vadd.f32 %v5288_v60, %v5251_v54 }
0x2121   : > { %v5298_v19 = vrot.slane %v5290_v55, %v5241_v33 }
0x2123   : > { %v5299_v25 = vcombine.high %v5298_v19, %v5298_v19  ;;  %v5306_v20 = vrot.slane %v5298_v19, %v5241_v33 }
0x2125   : > { %v5313_v5 = vrot.slane %v5299_v25, %v5241_v33  ;;  %5317 = vst.msk [vmem:[%s1796_s8] sm:$0x1] %vm5316_vm10, %v5306_v20 }
0x2127   : > { %5318 = vst.msk [vmem:[%s1796_s8 + $0x1] sm:$0x1] %vm5316_vm10, %v5313_v5 }
0x2128   : > { %8113 = shalt.err (!%p8110_p2)
}
0x2129   : > { %s8114_s0 = scalar_lea.hbm %s9919_s17, 32  ;;  %s8118_s28 = scalar_lea.hbm %s10169_s10, 128 }
0x212a   : > { %p8115_p4 = scmp.ne.s32.totalorder %s9919_s17, %s8114_s0  ;;  %p8119_p8 = scmp.lt.u32.totalorder %s9919_s17, %s10169_s10 }
0x212b   : > { %p8120_p3 = scmp.lt.u32.totalorder %s8118_s28, %s8114_s0  ;;  %p8122_p6 = scmp.lt.u32.totalorder %s8114_s0, %s9919_s17 }
0x212c   : > { %p8116_p0 = pnand %p8115_p4, %p10171_p5 }
0x212d   : > { %p8121_p9 = por %p8120_p3, %p8119_p8 }
0x212e   : > { %p8117_p7 = pneg %p8116_p0 }
0x212f   : > { %p8123_p12 = por %p8122_p6, %p8121_p9 }
0x2131   : > { %p8124_p10 = pnand %p8123_p12, %p8117_p7 }
0x2133   : > { %8127 = shalt.err (!%p8124_p10)
}
0x2134   : > { %s8345_s13 = smov 1  }
0x2135   : > { %6711 = dma.vmem_to_hbm [thread:$0]  (%p10171_p5), %s9921_s14, 32, %s9919_s17, %s5320_s5, %s8341_s19, %s8341_s19, %s8345_s13  }
0x2136 PF: > { %s10172_s20 = sld [smem:[#allocation123_spill]]  ;;  %s10173_s18 = sld [smem:[#allocation129_spill]] }
0x2137   : > { %p6802_p11 = scmp.ge.s32.totalorder %s8246_s2, 2 }
0x213c   : > { %s5348_s11 = sand.u32 1, %s10172_s20   ;;  %p10174_p13 = scmp.ne.s32.totalorder %s10173_s18, 0 }
0x213d   : > { %s5349_s12 = scalar_lea.sflag [#allocation5], %s5348_s11 }
0x213e   : > { %p6724_p1 = pnand %p6802_p11, %p10174_p13 }
0x2140   : > { %8229 = dma.done.wait (!%p6724_p1), %s5349_s12, 32  }
0x2141   : > { %8231 = vsyncadd (!%p6724_p1), %s5349_s12, 4294967264  ;;  %s10175_s2 = sld [smem:[#allocation125_spill]]  ;;  %s10176_s0 = sld [smem:[#allocation124_spill]] }
0x2142   : > { %s10177_s6 = sld [smem:[#allocation126_spill]]  ;;  %s10178_s28 = smov %s8242_s1 }
0x2147   : > { %p116_p2 = scmp.ge.s32.totalorder %s10175_s2, 6  }
0x2148   : > { %s10179_s1 = smov %s10177_s6 }
0x2149   :  { %118 = sbr.rel (!%p116_p2) target bundleno = 109 (0x6d), region = 437 }
0x2150   :  { %5354 = vsyncpa [#allocation4], 1 }
0x2151   :  { %5356 = vsyncpa [#allocation4 + $0x1], 1 }
0x2152   :  { %5357 = vsyncpa [#allocation7], 1 }
0x2153   :  { %5359 = vsyncpa [#allocation7 + $0x1], 1 }
0x2154   :  { %5360 = vsyncpa [#allocation10], 1 }
0x2155   :  { %5361 = vsyncpa [#allocation13], 1 }
0x2156   :  { %5362 = vsyncpa [#allocation16], 1 }
0x2157   :  { %5363 = vsyncpa [#allocation19], 1 }
0x2158   :  { %5364 = vsyncpa [#allocation22], 1 }
0x2159   :  { %5365 = vsyncpa [#allocation25], 1 }
0x215a   :  { %5366 = vsyncpa [#allocation28], 1 }
0x215b   :  { %5367 = vsyncpa [#allocation31], 1 }
0x215c   :  { %5368 = vsyncpa [#allocation34], 1 }
0x215d   :  { %5369 = vsyncpa [#allocation37], 1 }
0x215e   :  { %5370 = vsyncpa [#allocation40], 1 }
0x215f   :  { %5371 = vsyncpa [#allocation43], 1 }
0x2160   :  { %5372 = vsyncpa [#allocation46], 1 }
0x2161   :  { %5373 = vsyncpa [#allocation49], 1 }
0x2162   :  { %5374 = vsyncpa [#allocation52], 1 }
0x2163   :  { %5375 = vsyncpa [#allocation55], 1 }
0x2164   :  { %5376 = vsyncpa [#allocation58], 1 }
0x2165   :  { %5377 = vsyncpa [#allocation61], 1 }
0x2166   :  { %5378 = vsyncpa [#allocation64], 1 }
0x2167   :  { %5379 = vsyncpa [#allocation5], 1 }
0x2168   :  { %5381 = vsyncpa [#allocation5 + $0x1], 1 }

</bundles_post_ra>
